<compile_context>
chip_gen: v5e
topology: v5e:2x2
jax: 0.10.0
libtpu: 0.0.40
codegen_flags: <defaults>
</compile_context>

<pallas_src>
import functools

import jax
import jax.numpy as jnp
from jax import lax
from jax.experimental import pallas as pl
from jax.experimental.pallas import tpu as pltpu


# ----------------------------- Pallas kernel ------------------------------
def block_kernel(x_ref, bias_ref, wqkv_ref, wp_ref, bp_ref,
                 g1_ref, be1_ref, g2_ref, be2_ref,
                 w1_ref, b1_ref, w2_ref, b2_ref,
                 o_ref, *, approx_recip):
    BB, T, C = x_ref.shape
    H = bias_ref.shape[0]
    HS = C // H
    N = BB * T
    cdt = wqkv_ref.dtype                  # MXU operand dtype (f32 or bf16)

    def layernorm(v, g, b):
        mu = jnp.mean(v, axis=-1, keepdims=True)
        var = jnp.mean(jnp.square(v - mu), axis=-1, keepdims=True)
        return (v - mu) * lax.rsqrt(var + 1e-5) * g + b

    x = x_ref[...].reshape(N, C)          # (N, C) f32 token slab

    # --- attention branch (on LayerNorm(x)) ---
    ln1 = layernorm(x, g1_ref[...], be1_ref[...])

    # Fused QKV projection: one (N, C) @ (C, 3C) matmul. Columns are grouped
    # per head as [q_h | k_h | v_h]; 1/sqrt(HS) is folded into the Q columns.
    qkv = jnp.dot(ln1.astype(cdt), wqkv_ref[...],
                  preferred_element_type=jnp.float32)        # (N, 3C) f32
    qkv = qkv.reshape(BB, T, 3 * C)

    # Head-batched views (batch index = h*BB + b); one cast for all heads.
    qkv_h = jnp.stack(
        [qkv[:, :, h * 3 * HS:(h + 1) * 3 * HS] for h in range(H)],
        axis=0)                                              # (H, BB, T, 3HS)
    qkv_h = qkv_h.reshape(H * BB, T, 3 * HS).astype(cdt)
    q3 = qkv_h[:, :, 0 * HS:1 * HS]
    k3 = qkv_h[:, :, 1 * HS:2 * HS]
    v3 = qkv_h[:, :, 2 * HS:3 * HS]

    # One batched score matmul + one batched softmax for all heads & batch.
    s = jnp.einsum('bqd,bkd->bqk', q3, k3,
                   preferred_element_type=jnp.float32)       # (H*BB, T, T)
    s = (s.reshape(H, BB, T, T)
         + bias_ref[...][:, None].astype(jnp.float32)).reshape(H * BB, T, T)

    m = jnp.max(s, axis=-1, keepdims=True)
    p = jnp.exp(s - m)
    l = jnp.sum(p, axis=-1, keepdims=True)
    inv_l = pl.reciprocal(l, approx=True) if approx_recip else 1.0 / l

    pv = jnp.einsum('bqk,bkd->bqd', p.astype(cdt), v3,
                    preferred_element_type=jnp.float32) * inv_l  # (H*BB, T, HS)

    # Lay heads side by side in lanes, then ONE fused (N, C) @ (C, C) out-proj.
    pv4 = pv.reshape(H, BB, T, HS)
    ctx = jnp.concatenate([pv4[h] for h in range(H)], axis=-1)   # (BB, T, C)
    ctx = ctx.reshape(N, C)
    attn = jnp.dot(ctx.astype(cdt), wp_ref[...],
                   preferred_element_type=jnp.float32) + bp_ref[...]

    x1 = x + attn

    # --- feed-forward branch ---
    ln2 = layernorm(x1, g2_ref[...], be2_ref[...])
    hdd = jnp.dot(ln2.astype(cdt), w1_ref[...],
                  preferred_element_type=jnp.float32) + b1_ref[...]
    hdd = jnp.maximum(hdd, 0.0)
    ff = jnp.dot(hdd.astype(cdt), w2_ref[...],
                 preferred_element_type=jnp.float32) + b2_ref[...]

    o_ref[...] = (x1 + ff).reshape(BB, T, C)


# ------------------------------- wrapper ----------------------------------
def big_bird_block(x, bias, params, *, compute_dtype=jnp.float32,
                   batch_block=None, approx_softmax_recip=None,
                   single_buffer_weights=True,
                   vmem_limit_bytes=64 * 1024 * 1024):
    B, T, C = x.shape
    H = params["wq"].shape[0]
    HS = C // H
    hidden = params["w1"].shape[1]
    cdt = compute_dtype
    if approx_softmax_recip is None:
        # exact reciprocal for the f32 accuracy path; approx (EUP) for bf16
        approx_softmax_recip = (cdt == jnp.bfloat16)

    assert T % 8 == 0, "T must be a multiple of 8 (sublane tiling)"
    if batch_block is None:
        batch_block = 1
        for bb in range(min(B, 8), 0, -1):
            if B % bb == 0:
                batch_block = bb
                break
    assert B % batch_block == 0
    BB = batch_block

    # --- pack weights (wrapper-side, plain JAX) ---
    scale = float(HS) ** -0.5
    # columns grouped per head as [q_h | k_h | v_h] so the kernel stacks heads
    # with a single major-axis concat; 1/sqrt(HS) folded into Q columns.
    wqkv = jnp.concatenate(
        [jnp.concatenate([params["wq"][h] * scale, params["wk"][h],
                          params["wv"][h]], axis=1) for h in range(H)],
        axis=1).astype(cdt)                                  # (C, 3C)
    wp = params["wp"].astype(cdt)
    w1 = params["w1"].astype(cdt)
    w2 = params["w2"].astype(cdt)

    # --- BlockSpecs ---
    def const_spec(shape):
        nd = len(shape)
        if single_buffer_weights:
            # grid-invariant: single-buffer to halve the weight VMEM footprint
            return pl.BlockSpec(shape, lambda b, _nd=nd: (0,) * _nd,
                                pipeline_mode=pl.Buffered(1))
        return pl.BlockSpec(shape, lambda b, _nd=nd: (0,) * _nd)

    in_specs = [
        pl.BlockSpec((BB, T, C), lambda b: (b, 0, 0)),       # x
        const_spec((H, T, T)),                               # additive mask bias
        const_spec((C, 3 * C)),                              # fused wqkv
        const_spec((C, C)),                                  # wp
        const_spec((1, C)),                                  # bp
        const_spec((1, C)), const_spec((1, C)),              # ln1 gamma / beta
        const_spec((1, C)), const_spec((1, C)),              # ln2 gamma / beta
        const_spec((C, hidden)), const_spec((1, hidden)),    # w1, b1
        const_spec((hidden, C)), const_spec((1, C)),         # w2, b2
    ]

    kernel = functools.partial(block_kernel, approx_recip=approx_softmax_recip)

    return pl.pallas_call(
        kernel,
        out_shape=jax.ShapeDtypeStruct((B, T, C), jnp.float32),
        grid=(B // BB,),
        in_specs=in_specs,
        out_specs=pl.BlockSpec((BB, T, C), lambda b: (b, 0, 0)),
        compiler_params=pltpu.CompilerParams(
            dimension_semantics=("parallel",),
            vmem_limit_bytes=vmem_limit_bytes),
    )(x, bias, wqkv, wp, params["bp"],
      params["g1"], params["be1"], params["g2"], params["be2"],
      w1, params["b1"], w2, params["b2"])


# ------------------------- glue: mask & params -----------------------------
def build_bigbird_mask(key, T, n_head, window_size, n_global, n_random):
    """Boolean (H, T, T) BigBird mask: (local | global | random) & causal."""
    rows = jnp.arange(T)[:, None]
    cols = jnp.arange(T)[None, :]
    causal = rows >= cols
    local = (cols >= rows - window_size + 1) & (cols <= rows)
    global_m = (rows < n_global) | (cols < n_global)
    n_random = min(n_random, T)
    masks = []
    for _ in range(n_head):
        key, sub = jax.random.split(key)
        rand_cols = jax.random.randint(sub, (T, n_random), 0, T)
        rand_mask = jnp.any(jax.nn.one_hot(rand_cols, T, dtype=jnp.bool_), axis=1)
        masks.append((local | global_m | rand_mask) & causal)
    return jnp.stack(masks)


def mask_to_bias(mask, dtype=jnp.bfloat16):
    """Additive bias: 0 where attention allowed, -1e30 where masked.

    Safe because causal+local always keeps the diagonal unmasked (no fully
    masked softmax rows)."""
    return jnp.where(mask, 0.0, -1e30).astype(dtype)


def init_params(key, C, n_head):
    HS = C // n_head
    hidden = 4 * C
    ks = jax.random.split(key, 8)
    std = 0.02
    return {
        # per-head projection weights stored already transposed: y = x @ W
        "wq": jax.random.normal(ks[0], (n_head, C, HS), jnp.float32) * std,
        "wk": jax.random.normal(ks[1], (n_head, C, HS), jnp.float32) * std,
        "wv": jax.random.normal(ks[2], (n_head, C, HS), jnp.float32) * std,
        "wp": jax.random.normal(ks[3], (C, C), jnp.float32) * std,
        "bp": jnp.zeros((1, C), jnp.float32),
        "g1": jnp.ones((1, C), jnp.float32),
        "be1": jnp.zeros((1, C), jnp.float32),
        "g2": jnp.ones((1, C), jnp.float32),
        "be2": jnp.zeros((1, C), jnp.float32),
        "w1": jax.random.normal(ks[4], (C, hidden), jnp.float32) * std,
        "b1": jnp.zeros((1, hidden), jnp.float32),
        "w2": jax.random.normal(ks[5], (hidden, C), jnp.float32) * std,
        "b2": jnp.zeros((1, C), jnp.float32),
    }


# ------------------------- pure-JAX reference -------------------------------
def block_reference(x, mask, p):
    def layernorm(v, g, b):
        mu = jnp.mean(v, axis=-1, keepdims=True)
        var = jnp.mean((v - mu) ** 2, axis=-1, keepdims=True)
        return (v - mu) * lax.rsqrt(var + 1e-5) * g + b

    ln1 = layernorm(x, p["g1"], p["be1"])
    H = p["wq"].shape[0]
    HS = p["wq"].shape[2]
    heads = []
    for h in range(H):
        q = ln1 @ p["wq"][h]
        k = ln1 @ p["wk"][h]
        v = ln1 @ p["wv"][h]
        s = jnp.einsum("btd,bsd->bts", q, k) * HS ** -0.5
        s = jnp.where(mask[h][None], s, -jnp.inf)
        w = jax.nn.softmax(s, axis=-1)
        heads.append(jnp.einsum("bts,bsd->btd", w, v))
    attn = jnp.concatenate(heads, axis=-1) @ p["wp"] + p["bp"]
    x1 = x + attn
    ln2 = layernorm(x1, p["g2"], p["be2"])
    ff = jnp.maximum(ln2 @ p["w1"] + p["b1"], 0.0) @ p["w2"] + p["b2"]
    return x1 + ff


if __name__ == "__main__":
    B, T, C = 2, 16, 32
    n_head = 4
    window_size, n_global, n_random = 3, 2, 2

    key = jax.random.PRNGKey(0)
    k_x, k_mask, k_par = jax.random.split(key, 3)

    x = jax.random.normal(k_x, (B, T, C), jnp.float32)
    mask = build_bigbird_mask(k_mask, T, n_head, window_size,
                              n_global, n_random)
    bias = mask_to_bias(mask, jnp.bfloat16)
    params = init_params(k_par, C, n_head)

    ref = block_reference(x, mask, params)

    def run(compute_dtype):
        try:
            return jax.block_until_ready(
                big_bird_block(x, bias, params, compute_dtype=compute_dtype,
                               batch_block=2, single_buffer_weights=True,
                               vmem_limit_bytes=64 * 1024 * 1024))
        except Exception:
            # TODO(synk): pl.Buffered(1) single-buffering / explicit VMEM limit
            # not supported on this jax version; fall back to default-buffered
            # BlockSpecs and default scoped-VMEM limit.
            return jax.block_until_ready(
                big_bird_block(x, bias, params, compute_dtype=compute_dtype,
                               batch_block=2, single_buffer_weights=False,
                               vmem_limit_bytes=None))

    # f32 compute path (exact softmax reciprocal, tight check)
    out = run(jnp.float32)
    assert out.shape == (B, T, C)
    assert jnp.allclose(out, ref, rtol=1e-3, atol=1e-3), "f32 mismatch vs reference"

    # bf16 MXU-operand path (v6e/v7x-style; on v5e prefer compute_dtype=f32)
    out_bf16 = run(jnp.bfloat16)
    assert jnp.allclose(out_bf16, ref, rtol=5e-2, atol=5e-2), "bf16 mismatch vs reference"

    print("KERNEL_OK")
</pallas_src>

<mosaic_0001>
module attributes {stable_mosaic.version = 11 : i64} {
  func.func @block_kernel(%arg0: i32, %arg1: memref<2x16x32xf32, #tpu.memory_space<vmem>>, %arg2: memref<4x16x16xbf16, #tpu.memory_space<vmem>>, %arg3: memref<32x96xf32, #tpu.memory_space<vmem>>, %arg4: memref<32x32xf32, #tpu.memory_space<vmem>>, %arg5: memref<1x32xf32, #tpu.memory_space<vmem>>, %arg6: memref<1x32xf32, #tpu.memory_space<vmem>>, %arg7: memref<1x32xf32, #tpu.memory_space<vmem>>, %arg8: memref<1x32xf32, #tpu.memory_space<vmem>>, %arg9: memref<1x32xf32, #tpu.memory_space<vmem>>, %arg10: memref<32x128xf32, #tpu.memory_space<vmem>>, %arg11: memref<1x128xf32, #tpu.memory_space<vmem>>, %arg12: memref<128x32xf32, #tpu.memory_space<vmem>>, %arg13: memref<1x32xf32, #tpu.memory_space<vmem>>, %arg14: memref<2x16x32xf32, #tpu.memory_space<vmem>>) attributes {dimension_semantics = [#tpu.dimension_semantics<parallel>], iteration_bounds = array<i64: 1>, scalar_prefetch = 0 : i64, scratch_operands = 0 : i64, tpu.core_type = #tpu.core_type<tc>, window_params = [{transform_indices = @transform_0, window_bounds = array<i64: 2, 16, 32>}, {pipeline_mode = #tpu.pipeline_mode<synchronous>, transform_indices = @transform_1, window_bounds = array<i64: 4, 16, 16>}, {pipeline_mode = #tpu.pipeline_mode<synchronous>, transform_indices = @transform_2, window_bounds = array<i64: 32, 96>}, {pipeline_mode = #tpu.pipeline_mode<synchronous>, transform_indices = @transform_3, window_bounds = array<i64: 32, 32>}, {pipeline_mode = #tpu.pipeline_mode<synchronous>, transform_indices = @transform_4, window_bounds = array<i64: 1, 32>}, {pipeline_mode = #tpu.pipeline_mode<synchronous>, transform_indices = @transform_5, window_bounds = array<i64: 1, 32>}, {pipeline_mode = #tpu.pipeline_mode<synchronous>, transform_indices = @transform_6, window_bounds = array<i64: 1, 32>}, {pipeline_mode = #tpu.pipeline_mode<synchronous>, transform_indices = @transform_7, window_bounds = array<i64: 1, 32>}, {pipeline_mode = #tpu.pipeline_mode<synchronous>, transform_indices = @transform_8, window_bounds = array<i64: 1, 32>}, {pipeline_mode = #tpu.pipeline_mode<synchronous>, transform_indices = @transform_9, window_bounds = array<i64: 32, 128>}, {pipeline_mode = #tpu.pipeline_mode<synchronous>, transform_indices = @transform_10, window_bounds = array<i64: 1, 128>}, {pipeline_mode = #tpu.pipeline_mode<synchronous>, transform_indices = @transform_11, window_bounds = array<i64: 128, 32>}, {pipeline_mode = #tpu.pipeline_mode<synchronous>, transform_indices = @transform_12, window_bounds = array<i64: 1, 32>}, {transform_indices = @transform_13, window_bounds = array<i64: 2, 16, 32>}]} {
    %c0 = arith.constant 0 : index
    %c0_0 = arith.constant 0 : index
    %c0_1 = arith.constant 0 : index
    %0 = vector.load %arg1[%c0, %c0_0, %c0_1] : memref<2x16x32xf32, #tpu.memory_space<vmem>>, vector<2x16x32xf32>
    %1 = vector.shape_cast %0 : vector<2x16x32xf32> to vector<32x32xf32>
    %c0_2 = arith.constant 0 : index
    %c0_3 = arith.constant 0 : index
    %2 = vector.load %arg6[%c0_2, %c0_3] : memref<1x32xf32, #tpu.memory_space<vmem>>, vector<1x32xf32>
    %c0_4 = arith.constant 0 : index
    %c0_5 = arith.constant 0 : index
    %3 = vector.load %arg7[%c0_4, %c0_5] : memref<1x32xf32, #tpu.memory_space<vmem>>, vector<1x32xf32>
    %cst = arith.constant dense<0.000000e+00> : vector<32xf32>
    %4 = vector.multi_reduction <add>, %1, %cst [1] : vector<32x32xf32> to vector<32xf32>
    %5 = vector.shape_cast %4 : vector<32xf32> to vector<32x1xf32>
    %cst_6 = arith.constant 3.200000e+01 : f32
    %6 = vector.broadcast %cst_6 : f32 to vector<32x1xf32>
    %7 = arith.divf %5, %6 : vector<32x1xf32>
    %8 = vector.broadcast %7 : vector<32x1xf32> to vector<32x32xf32>
    %9 = arith.subf %1, %8 : vector<32x32xf32>
    %10 = arith.mulf %9, %9 : vector<32x32xf32>
    %cst_7 = arith.constant dense<0.000000e+00> : vector<32xf32>
    %11 = vector.multi_reduction <add>, %10, %cst_7 [1] : vector<32x32xf32> to vector<32xf32>
    %12 = vector.shape_cast %11 : vector<32xf32> to vector<32x1xf32>
    %cst_8 = arith.constant 3.200000e+01 : f32
    %13 = vector.broadcast %cst_8 : f32 to vector<32x1xf32>
    %14 = arith.divf %12, %13 : vector<32x1xf32>
    %15 = vector.broadcast %7 : vector<32x1xf32> to vector<32x32xf32>
    %16 = arith.subf %1, %15 : vector<32x32xf32>
    %cst_9 = arith.constant 9.99999974E-6 : f32
    %17 = vector.broadcast %cst_9 : f32 to vector<32x1xf32>
    %18 = arith.addf %14, %17 : vector<32x1xf32>
    %19 = math.rsqrt %18 : vector<32x1xf32>
    %20 = vector.broadcast %19 : vector<32x1xf32> to vector<32x32xf32>
    %21 = arith.mulf %16, %20 : vector<32x32xf32>
    %22 = vector.broadcast %2 : vector<1x32xf32> to vector<32x32xf32>
    %23 = arith.mulf %21, %22 : vector<32x32xf32>
    %24 = vector.broadcast %3 : vector<1x32xf32> to vector<32x32xf32>
    %25 = arith.addf %23, %24 : vector<32x32xf32>
    %c0_10 = arith.constant 0 : index
    %c0_11 = arith.constant 0 : index
    %26 = vector.load %arg3[%c0_10, %c0_11] : memref<32x96xf32, #tpu.memory_space<vmem>>, vector<32x96xf32>
    %cst_12 = arith.constant dense<0.000000e+00> : vector<32x96xf32>
    %27 = tpu.matmul %25, %26, %cst_12 {dimension_numbers = #tpu.dot_dimension_numbers<[1], [0], [0], [1], [0, 0, 1, 1], [], []>} : vector<32x32xf32>, vector<32x96xf32>, vector<32x96xf32> -> vector<32x96xf32>
    %28 = vector.shape_cast %27 : vector<32x96xf32> to vector<2x16x96xf32>
    %29 = vector.extract_strided_slice %28 {offsets = [0, 0, 0], sizes = [2, 16, 24], strides = [1, 1, 1]} : vector<2x16x96xf32> to vector<2x16x24xf32>
    %30 = vector.extract_strided_slice %28 {offsets = [0, 0, 24], sizes = [2, 16, 24], strides = [1, 1, 1]} : vector<2x16x96xf32> to vector<2x16x24xf32>
    %31 = vector.extract_strided_slice %28 {offsets = [0, 0, 48], sizes = [2, 16, 24], strides = [1, 1, 1]} : vector<2x16x96xf32> to vector<2x16x24xf32>
    %32 = vector.extract_strided_slice %28 {offsets = [0, 0, 72], sizes = [2, 16, 24], strides = [1, 1, 1]} : vector<2x16x96xf32> to vector<2x16x24xf32>
    %33 = vector.shape_cast %29 : vector<2x16x24xf32> to vector<1x2x16x24xf32>
    %34 = vector.shape_cast %30 : vector<2x16x24xf32> to vector<1x2x16x24xf32>
    %35 = vector.shape_cast %31 : vector<2x16x24xf32> to vector<1x2x16x24xf32>
    %36 = vector.shape_cast %32 : vector<2x16x24xf32> to vector<1x2x16x24xf32>
    %37 = tpu.concatenate %33, %34, %35, %36 in 0 : vector<1x2x16x24xf32>, vector<1x2x16x24xf32>, vector<1x2x16x24xf32>, vector<1x2x16x24xf32> -> vector<4x2x16x24xf32>
    %38 = vector.shape_cast %37 : vector<4x2x16x24xf32> to vector<8x16x24xf32>
    %39 = vector.extract_strided_slice %38 {offsets = [0, 0, 0], sizes = [8, 16, 8], strides = [1, 1, 1]} : vector<8x16x24xf32> to vector<8x16x8xf32>
    %40 = vector.extract_strided_slice %38 {offsets = [0, 0, 8], sizes = [8, 16, 8], strides = [1, 1, 1]} : vector<8x16x24xf32> to vector<8x16x8xf32>
    %41 = vector.extract_strided_slice %38 {offsets = [0, 0, 16], sizes = [8, 16, 8], strides = [1, 1, 1]} : vector<8x16x24xf32> to vector<8x16x8xf32>
    "tpu.trace_start"() <{level = 10 : i32, message = "bqd,bkd->bqk"}> : () -> ()
    %cst_13 = arith.constant dense<0.000000e+00> : vector<8x16x16xf32>
    %42 = tpu.matmul %39, %40, %cst_13 {dimension_numbers = #tpu.dot_dimension_numbers<[2], [2], [1], [1], [0, 0, 0, 1, 1, 1], [0], [0]>} : vector<8x16x8xf32>, vector<8x16x8xf32>, vector<8x16x16xf32> -> vector<8x16x16xf32>
    "tpu.trace_stop"() : () -> ()
    %43 = vector.shape_cast %42 : vector<8x16x16xf32> to vector<4x2x16x16xf32>
    %c0_14 = arith.constant 0 : index
    %c0_15 = arith.constant 0 : index
    %c0_16 = arith.constant 0 : index
    %44 = vector.load %arg2[%c0_14, %c0_15, %c0_16] : memref<4x16x16xbf16, #tpu.memory_space<vmem>>, vector<4x16x16xbf16>
    %45 = vector.shape_cast %44 : vector<4x16x16xbf16> to vector<4x1x16x16xbf16>
    %46 = arith.extf %45 : vector<4x1x16x16xbf16> to vector<4x1x16x16xf32>
    %47 = vector.broadcast %46 : vector<4x1x16x16xf32> to vector<4x2x16x16xf32>
    %48 = arith.addf %43, %47 : vector<4x2x16x16xf32>
    %49 = vector.shape_cast %48 : vector<4x2x16x16xf32> to vector<8x16x16xf32>
    %cst_17 = arith.constant dense<0xFF800000> : vector<8x16xf32>
    %50 = vector.multi_reduction <maximumf>, %49, %cst_17 [2] : vector<8x16x16xf32> to vector<8x16xf32>
    %51 = vector.shape_cast %50 : vector<8x16xf32> to vector<8x16x1xf32>
    %52 = vector.broadcast %51 : vector<8x16x1xf32> to vector<8x16x16xf32>
    %53 = arith.subf %49, %52 : vector<8x16x16xf32>
    %54 = math.exp %53 : vector<8x16x16xf32>
    %cst_18 = arith.constant dense<0.000000e+00> : vector<8x16xf32>
    %55 = vector.multi_reduction <add>, %54, %cst_18 [2] : vector<8x16x16xf32> to vector<8x16xf32>
    %56 = vector.shape_cast %55 : vector<8x16xf32> to vector<8x16x1xf32>
    %cst_19 = arith.constant 1.000000e+00 : f32
    %57 = vector.broadcast %cst_19 : f32 to vector<8x16x1xf32>
    %58 = arith.divf %57, %56 : vector<8x16x1xf32>
    "tpu.trace_start"() <{level = 10 : i32, message = "bqk,bkd->bqd"}> : () -> ()
    %cst_20 = arith.constant dense<0.000000e+00> : vector<8x16x8xf32>
    %59 = tpu.matmul %54, %41, %cst_20 {dimension_numbers = #tpu.dot_dimension_numbers<[2], [1], [1], [2], [0, 0, 0, 1, 1, 2], [0], [0]>} : vector<8x16x16xf32>, vector<8x16x8xf32>, vector<8x16x8xf32> -> vector<8x16x8xf32>
    "tpu.trace_stop"() : () -> ()
    %60 = vector.broadcast %58 : vector<8x16x1xf32> to vector<8x16x8xf32>
    %61 = arith.mulf %59, %60 : vector<8x16x8xf32>
    %62 = vector.shape_cast %61 : vector<8x16x8xf32> to vector<4x2x16x8xf32>
    %63 = vector.extract_strided_slice %62 {offsets = [0, 0, 0, 0], sizes = [1, 2, 16, 8], strides = [1, 1, 1, 1]} : vector<4x2x16x8xf32> to vector<1x2x16x8xf32>
    %64 = vector.shape_cast %63 : vector<1x2x16x8xf32> to vector<2x16x8xf32>
    %65 = vector.extract_strided_slice %62 {offsets = [1, 0, 0, 0], sizes = [1, 2, 16, 8], strides = [1, 1, 1, 1]} : vector<4x2x16x8xf32> to vector<1x2x16x8xf32>
    %66 = vector.shape_cast %65 : vector<1x2x16x8xf32> to vector<2x16x8xf32>
    %67 = vector.extract_strided_slice %62 {offsets = [2, 0, 0, 0], sizes = [1, 2, 16, 8], strides = [1, 1, 1, 1]} : vector<4x2x16x8xf32> to vector<1x2x16x8xf32>
    %68 = vector.shape_cast %67 : vector<1x2x16x8xf32> to vector<2x16x8xf32>
    %69 = vector.extract_strided_slice %62 {offsets = [3, 0, 0, 0], sizes = [1, 2, 16, 8], strides = [1, 1, 1, 1]} : vector<4x2x16x8xf32> to vector<1x2x16x8xf32>
    %70 = vector.shape_cast %69 : vector<1x2x16x8xf32> to vector<2x16x8xf32>
    %71 = tpu.concatenate %64, %66, %68, %70 in 2 : vector<2x16x8xf32>, vector<2x16x8xf32>, vector<2x16x8xf32>, vector<2x16x8xf32> -> vector<2x16x32xf32>
    %72 = vector.shape_cast %71 : vector<2x16x32xf32> to vector<32x32xf32>
    %c0_21 = arith.constant 0 : index
    %c0_22 = arith.constant 0 : index
    %73 = vector.load %arg4[%c0_21, %c0_22] : memref<32x32xf32, #tpu.memory_space<vmem>>, vector<32x32xf32>
    %cst_23 = arith.constant dense<0.000000e+00> : vector<32x32xf32>
    %74 = tpu.matmul %72, %73, %cst_23 {dimension_numbers = #tpu.dot_dimension_numbers<[1], [0], [0], [1], [0, 0, 1, 1], [], []>} : vector<32x32xf32>, vector<32x32xf32>, vector<32x32xf32> -> vector<32x32xf32>
    %c0_24 = arith.constant 0 : index
    %c0_25 = arith.constant 0 : index
    %75 = vector.load %arg5[%c0_24, %c0_25] : memref<1x32xf32, #tpu.memory_space<vmem>>, vector<1x32xf32>
    %76 = vector.broadcast %75 : vector<1x32xf32> to vector<32x32xf32>
    %77 = arith.addf %74, %76 : vector<32x32xf32>
    %78 = arith.addf %1, %77 : vector<32x32xf32>
    %c0_26 = arith.constant 0 : index
    %c0_27 = arith.constant 0 : index
    %79 = vector.load %arg8[%c0_26, %c0_27] : memref<1x32xf32, #tpu.memory_space<vmem>>, vector<1x32xf32>
    %c0_28 = arith.constant 0 : index
    %c0_29 = arith.constant 0 : index
    %80 = vector.load %arg9[%c0_28, %c0_29] : memref<1x32xf32, #tpu.memory_space<vmem>>, vector<1x32xf32>
    %cst_30 = arith.constant dense<0.000000e+00> : vector<32xf32>
    %81 = vector.multi_reduction <add>, %78, %cst_30 [1] : vector<32x32xf32> to vector<32xf32>
    %82 = vector.shape_cast %81 : vector<32xf32> to vector<32x1xf32>
    %cst_31 = arith.constant 3.200000e+01 : f32
    %83 = vector.broadcast %cst_31 : f32 to vector<32x1xf32>
    %84 = arith.divf %82, %83 : vector<32x1xf32>
    %85 = vector.broadcast %84 : vector<32x1xf32> to vector<32x32xf32>
    %86 = arith.subf %78, %85 : vector<32x32xf32>
    %87 = arith.mulf %86, %86 : vector<32x32xf32>
    %cst_32 = arith.constant dense<0.000000e+00> : vector<32xf32>
    %88 = vector.multi_reduction <add>, %87, %cst_32 [1] : vector<32x32xf32> to vector<32xf32>
    %89 = vector.shape_cast %88 : vector<32xf32> to vector<32x1xf32>
    %cst_33 = arith.constant 3.200000e+01 : f32
    %90 = vector.broadcast %cst_33 : f32 to vector<32x1xf32>
    %91 = arith.divf %89, %90 : vector<32x1xf32>
    %92 = vector.broadcast %84 : vector<32x1xf32> to vector<32x32xf32>
    %93 = arith.subf %78, %92 : vector<32x32xf32>
    %cst_34 = arith.constant 9.99999974E-6 : f32
    %94 = vector.broadcast %cst_34 : f32 to vector<32x1xf32>
    %95 = arith.addf %91, %94 : vector<32x1xf32>
    %96 = math.rsqrt %95 : vector<32x1xf32>
    %97 = vector.broadcast %96 : vector<32x1xf32> to vector<32x32xf32>
    %98 = arith.mulf %93, %97 : vector<32x32xf32>
    %99 = vector.broadcast %79 : vector<1x32xf32> to vector<32x32xf32>
    %100 = arith.mulf %98, %99 : vector<32x32xf32>
    %101 = vector.broadcast %80 : vector<1x32xf32> to vector<32x32xf32>
    %102 = arith.addf %100, %101 : vector<32x32xf32>
    %c0_35 = arith.constant 0 : index
    %c0_36 = arith.constant 0 : index
    %103 = vector.load %arg10[%c0_35, %c0_36] : memref<32x128xf32, #tpu.memory_space<vmem>>, vector<32x128xf32>
    %cst_37 = arith.constant dense<0.000000e+00> : vector<32x128xf32>
    %104 = tpu.matmul %102, %103, %cst_37 {dimension_numbers = #tpu.dot_dimension_numbers<[1], [0], [0], [1], [0, 0, 1, 1], [], []>} : vector<32x32xf32>, vector<32x128xf32>, vector<32x128xf32> -> vector<32x128xf32>
    %c0_38 = arith.constant 0 : index
    %c0_39 = arith.constant 0 : index
    %105 = vector.load %arg11[%c0_38, %c0_39] : memref<1x128xf32, #tpu.memory_space<vmem>>, vector<1x128xf32>
    %106 = vector.broadcast %105 : vector<1x128xf32> to vector<32x128xf32>
    %107 = arith.addf %104, %106 : vector<32x128xf32>
    %cst_40 = arith.constant 0.000000e+00 : f32
    %108 = vector.broadcast %cst_40 : f32 to vector<32x128xf32>
    %109 = arith.maximumf %107, %108 : vector<32x128xf32>
    %c0_41 = arith.constant 0 : index
    %c0_42 = arith.constant 0 : index
    %110 = vector.load %arg12[%c0_41, %c0_42] : memref<128x32xf32, #tpu.memory_space<vmem>>, vector<128x32xf32>
    %cst_43 = arith.constant dense<0.000000e+00> : vector<32x32xf32>
    %111 = tpu.matmul %109, %110, %cst_43 {dimension_numbers = #tpu.dot_dimension_numbers<[1], [0], [0], [1], [0, 0, 1, 1], [], []>} : vector<32x128xf32>, vector<128x32xf32>, vector<32x32xf32> -> vector<32x32xf32>
    %c0_44 = arith.constant 0 : index
    %c0_45 = arith.constant 0 : index
    %112 = vector.load %arg13[%c0_44, %c0_45] : memref<1x32xf32, #tpu.memory_space<vmem>>, vector<1x32xf32>
    %113 = vector.broadcast %112 : vector<1x32xf32> to vector<32x32xf32>
    %114 = arith.addf %111, %113 : vector<32x32xf32>
    %115 = arith.addf %78, %114 : vector<32x32xf32>
    %116 = vector.shape_cast %115 : vector<32x32xf32> to vector<2x16x32xf32>
    %c0_46 = arith.constant 0 : index
    %c0_47 = arith.constant 0 : index
    %c0_48 = arith.constant 0 : index
    %117 = vector.load %arg14[%c0_46, %c0_47, %c0_48] : memref<2x16x32xf32, #tpu.memory_space<vmem>>, vector<2x16x32xf32>
    tpu.vector_store %arg14[%c0_46, %c0_47, %c0_48], %116 {strides = array<i32>} : memref<2x16x32xf32, #tpu.memory_space<vmem>>, vector<2x16x32xf32>,
    return
  }
  func.func @transform_0(%arg0: i32) -> (i32, i32, i32) {
    %c0_i32 = arith.constant 0 : i32
    %c0_i32_0 = arith.constant 0 : i32
    %c0_i32_1 = arith.constant 0 : i32
    return %arg0, %c0_i32, %c0_i32_0 : i32, i32, i32
  }
  func.func @transform_1(%arg0: i32) -> (i32, i32, i32) {
    %c0_i32 = arith.constant 0 : i32
    %c0_i32_0 = arith.constant 0 : i32
    %c0_i32_1 = arith.constant 0 : i32
    %c0_i32_2 = arith.constant 0 : i32
    return %c0_i32, %c0_i32_0, %c0_i32_1 : i32, i32, i32
  }
  func.func @transform_2(%arg0: i32) -> (i32, i32) {
    %c0_i32 = arith.constant 0 : i32
    %c0_i32_0 = arith.constant 0 : i32
    %c0_i32_1 = arith.constant 0 : i32
    return %c0_i32, %c0_i32_0 : i32, i32
  }
  func.func @transform_3(%arg0: i32) -> (i32, i32) {
    %c0_i32 = arith.constant 0 : i32
    %c0_i32_0 = arith.constant 0 : i32
    %c0_i32_1 = arith.constant 0 : i32
    return %c0_i32, %c0_i32_0 : i32, i32
  }
  func.func @transform_4(%arg0: i32) -> (i32, i32) {
    %c0_i32 = arith.constant 0 : i32
    %c0_i32_0 = arith.constant 0 : i32
    %c0_i32_1 = arith.constant 0 : i32
    return %c0_i32, %c0_i32_0 : i32, i32
  }
  func.func @transform_5(%arg0: i32) -> (i32, i32) {
    %c0_i32 = arith.constant 0 : i32
    %c0_i32_0 = arith.constant 0 : i32
    %c0_i32_1 = arith.constant 0 : i32
    return %c0_i32, %c0_i32_0 : i32, i32
  }
  func.func @transform_6(%arg0: i32) -> (i32, i32) {
    %c0_i32 = arith.constant 0 : i32
    %c0_i32_0 = arith.constant 0 : i32
    %c0_i32_1 = arith.constant 0 : i32
    return %c0_i32, %c0_i32_0 : i32, i32
  }
  func.func @transform_7(%arg0: i32) -> (i32, i32) {
    %c0_i32 = arith.constant 0 : i32
    %c0_i32_0 = arith.constant 0 : i32
    %c0_i32_1 = arith.constant 0 : i32
    return %c0_i32, %c0_i32_0 : i32, i32
  }
  func.func @transform_8(%arg0: i32) -> (i32, i32) {
    %c0_i32 = arith.constant 0 : i32
    %c0_i32_0 = arith.constant 0 : i32
    %c0_i32_1 = arith.constant 0 : i32
    return %c0_i32, %c0_i32_0 : i32, i32
  }
  func.func @transform_9(%arg0: i32) -> (i32, i32) {
    %c0_i32 = arith.constant 0 : i32
    %c0_i32_0 = arith.constant 0 : i32
    %c0_i32_1 = arith.constant 0 : i32
    return %c0_i32, %c0_i32_0 : i32, i32
  }
  func.func @transform_10(%arg0: i32) -> (i32, i32) {
    %c0_i32 = arith.constant 0 : i32
    %c0_i32_0 = arith.constant 0 : i32
    %c0_i32_1 = arith.constant 0 : i32
    return %c0_i32, %c0_i32_0 : i32, i32
  }
  func.func @transform_11(%arg0: i32) -> (i32, i32) {
    %c0_i32 = arith.constant 0 : i32
    %c0_i32_0 = arith.constant 0 : i32
    %c0_i32_1 = arith.constant 0 : i32
    return %c0_i32, %c0_i32_0 : i32, i32
  }
  func.func @transform_12(%arg0: i32) -> (i32, i32) {
    %c0_i32 = arith.constant 0 : i32
    %c0_i32_0 = arith.constant 0 : i32
    %c0_i32_1 = arith.constant 0 : i32
    return %c0_i32, %c0_i32_0 : i32, i32
  }
  func.func @transform_13(%arg0: i32) -> (i32, i32, i32) {
    %c0_i32 = arith.constant 0 : i32
    %c0_i32_0 = arith.constant 0 : i32
    %c0_i32_1 = arith.constant 0 : i32
    return %arg0, %c0_i32, %c0_i32_0 : i32, i32, i32
  }
}

module attributes {stable_mosaic.version = 11 : i64} {
  func.func @block_kernel(%arg0: i32, %arg1: memref<2x16x32xf32, #tpu.memory_space<vmem>>, %arg2: memref<4x16x16xbf16, #tpu.memory_space<vmem>>, %arg3: memref<32x96xf32, #tpu.memory_space<vmem>>, %arg4: memref<32x32xf32, #tpu.memory_space<vmem>>, %arg5: memref<1x32xf32, #tpu.memory_space<vmem>>, %arg6: memref<1x32xf32, #tpu.memory_space<vmem>>, %arg7: memref<1x32xf32, #tpu.memory_space<vmem>>, %arg8: memref<1x32xf32, #tpu.memory_space<vmem>>, %arg9: memref<1x32xf32, #tpu.memory_space<vmem>>, %arg10: memref<32x128xf32, #tpu.memory_space<vmem>>, %arg11: memref<1x128xf32, #tpu.memory_space<vmem>>, %arg12: memref<128x32xf32, #tpu.memory_space<vmem>>, %arg13: memref<1x32xf32, #tpu.memory_space<vmem>>, %arg14: memref<2x16x32xf32, #tpu.memory_space<vmem>>) attributes {dimension_semantics = [#tpu.dimension_semantics<parallel>], iteration_bounds = array<i64: 1>, scalar_prefetch = 0 : i64, scratch_operands = 0 : i64, tpu.core_type = #tpu.core_type<tc>, window_params = [{transform_indices = @transform_0, window_bounds = array<i64: 2, 16, 32>}, {pipeline_mode = #tpu.pipeline_mode<synchronous>, transform_indices = @transform_1, window_bounds = array<i64: 4, 16, 16>}, {pipeline_mode = #tpu.pipeline_mode<synchronous>, transform_indices = @transform_2, window_bounds = array<i64: 32, 96>}, {pipeline_mode = #tpu.pipeline_mode<synchronous>, transform_indices = @transform_3, window_bounds = array<i64: 32, 32>}, {pipeline_mode = #tpu.pipeline_mode<synchronous>, transform_indices = @transform_4, window_bounds = array<i64: 1, 32>}, {pipeline_mode = #tpu.pipeline_mode<synchronous>, transform_indices = @transform_5, window_bounds = array<i64: 1, 32>}, {pipeline_mode = #tpu.pipeline_mode<synchronous>, transform_indices = @transform_6, window_bounds = array<i64: 1, 32>}, {pipeline_mode = #tpu.pipeline_mode<synchronous>, transform_indices = @transform_7, window_bounds = array<i64: 1, 32>}, {pipeline_mode = #tpu.pipeline_mode<synchronous>, transform_indices = @transform_8, window_bounds = array<i64: 1, 32>}, {pipeline_mode = #tpu.pipeline_mode<synchronous>, transform_indices = @transform_9, window_bounds = array<i64: 32, 128>}, {pipeline_mode = #tpu.pipeline_mode<synchronous>, transform_indices = @transform_10, window_bounds = array<i64: 1, 128>}, {pipeline_mode = #tpu.pipeline_mode<synchronous>, transform_indices = @transform_11, window_bounds = array<i64: 128, 32>}, {pipeline_mode = #tpu.pipeline_mode<synchronous>, transform_indices = @transform_12, window_bounds = array<i64: 1, 32>}, {transform_indices = @transform_13, window_bounds = array<i64: 2, 16, 32>}]} {
    %c0 = arith.constant 0 : index
    %c0_0 = arith.constant 0 : index
    %c0_1 = arith.constant 0 : index
    %0 = vector.load %arg1[%c0, %c0_0, %c0_1] : memref<2x16x32xf32, #tpu.memory_space<vmem>>, vector<2x16x32xf32>
    %1 = vector.shape_cast %0 : vector<2x16x32xf32> to vector<32x32xf32>
    %c0_2 = arith.constant 0 : index
    %c0_3 = arith.constant 0 : index
    %2 = vector.load %arg6[%c0_2, %c0_3] : memref<1x32xf32, #tpu.memory_space<vmem>>, vector<1x32xf32>
    %c0_4 = arith.constant 0 : index
    %c0_5 = arith.constant 0 : index
    %3 = vector.load %arg7[%c0_4, %c0_5] : memref<1x32xf32, #tpu.memory_space<vmem>>, vector<1x32xf32>
    %cst = arith.constant dense<0.000000e+00> : vector<32xf32>
    %4 = vector.multi_reduction <add>, %1, %cst [1] : vector<32x32xf32> to vector<32xf32>
    %5 = vector.shape_cast %4 : vector<32xf32> to vector<32x1xf32>
    %cst_6 = arith.constant 3.200000e+01 : f32
    %6 = vector.broadcast %cst_6 : f32 to vector<32x1xf32>
    %7 = arith.divf %5, %6 : vector<32x1xf32>
    %8 = vector.broadcast %7 : vector<32x1xf32> to vector<32x32xf32>
    %9 = arith.subf %1, %8 : vector<32x32xf32>
    %10 = arith.mulf %9, %9 : vector<32x32xf32>
    %cst_7 = arith.constant dense<0.000000e+00> : vector<32xf32>
    %11 = vector.multi_reduction <add>, %10, %cst_7 [1] : vector<32x32xf32> to vector<32xf32>
    %12 = vector.shape_cast %11 : vector<32xf32> to vector<32x1xf32>
    %cst_8 = arith.constant 3.200000e+01 : f32
    %13 = vector.broadcast %cst_8 : f32 to vector<32x1xf32>
    %14 = arith.divf %12, %13 : vector<32x1xf32>
    %15 = vector.broadcast %7 : vector<32x1xf32> to vector<32x32xf32>
    %16 = arith.subf %1, %15 : vector<32x32xf32>
    %cst_9 = arith.constant 9.99999974E-6 : f32
    %17 = vector.broadcast %cst_9 : f32 to vector<32x1xf32>
    %18 = arith.addf %14, %17 : vector<32x1xf32>
    %19 = math.rsqrt %18 : vector<32x1xf32>
    %20 = vector.broadcast %19 : vector<32x1xf32> to vector<32x32xf32>
    %21 = arith.mulf %16, %20 : vector<32x32xf32>
    %22 = vector.broadcast %2 : vector<1x32xf32> to vector<32x32xf32>
    %23 = arith.mulf %21, %22 : vector<32x32xf32>
    %24 = vector.broadcast %3 : vector<1x32xf32> to vector<32x32xf32>
    %25 = arith.addf %23, %24 : vector<32x32xf32>
    %c0_10 = arith.constant 0 : index
    %c0_11 = arith.constant 0 : index
    %26 = vector.load %arg3[%c0_10, %c0_11] : memref<32x96xf32, #tpu.memory_space<vmem>>, vector<32x96xf32>
    %cst_12 = arith.constant dense<0.000000e+00> : vector<32x96xf32>
    %27 = tpu.matmul %25, %26, %cst_12 {dimension_numbers = #tpu.dot_dimension_numbers<[1], [0], [0], [1], [0, 0, 1, 1], [], []>} : vector<32x32xf32>, vector<32x96xf32>, vector<32x96xf32> -> vector<32x96xf32>
    %28 = vector.shape_cast %27 : vector<32x96xf32> to vector<2x16x96xf32>
    %29 = vector.extract_strided_slice %28 {offsets = [0, 0, 0], sizes = [2, 16, 24], strides = [1, 1, 1]} : vector<2x16x96xf32> to vector<2x16x24xf32>
    %30 = vector.extract_strided_slice %28 {offsets = [0, 0, 24], sizes = [2, 16, 24], strides = [1, 1, 1]} : vector<2x16x96xf32> to vector<2x16x24xf32>
    %31 = vector.extract_strided_slice %28 {offsets = [0, 0, 48], sizes = [2, 16, 24], strides = [1, 1, 1]} : vector<2x16x96xf32> to vector<2x16x24xf32>
    %32 = vector.extract_strided_slice %28 {offsets = [0, 0, 72], sizes = [2, 16, 24], strides = [1, 1, 1]} : vector<2x16x96xf32> to vector<2x16x24xf32>
    %33 = vector.shape_cast %29 : vector<2x16x24xf32> to vector<1x2x16x24xf32>
    %34 = vector.shape_cast %30 : vector<2x16x24xf32> to vector<1x2x16x24xf32>
    %35 = vector.shape_cast %31 : vector<2x16x24xf32> to vector<1x2x16x24xf32>
    %36 = vector.shape_cast %32 : vector<2x16x24xf32> to vector<1x2x16x24xf32>
    %37 = tpu.concatenate %33, %34, %35, %36 in 0 : vector<1x2x16x24xf32>, vector<1x2x16x24xf32>, vector<1x2x16x24xf32>, vector<1x2x16x24xf32> -> vector<4x2x16x24xf32>
    %38 = vector.shape_cast %37 : vector<4x2x16x24xf32> to vector<8x16x24xf32>
    %39 = vector.extract_strided_slice %38 {offsets = [0, 0, 0], sizes = [8, 16, 8], strides = [1, 1, 1]} : vector<8x16x24xf32> to vector<8x16x8xf32>
    %40 = vector.extract_strided_slice %38 {offsets = [0, 0, 8], sizes = [8, 16, 8], strides = [1, 1, 1]} : vector<8x16x24xf32> to vector<8x16x8xf32>
    %41 = vector.extract_strided_slice %38 {offsets = [0, 0, 16], sizes = [8, 16, 8], strides = [1, 1, 1]} : vector<8x16x24xf32> to vector<8x16x8xf32>
    "tpu.trace_start"() <{level = 10 : i32, message = "bqd,bkd->bqk"}> : () -> ()
    %cst_13 = arith.constant dense<0.000000e+00> : vector<8x16x16xf32>
    %42 = tpu.matmul %39, %40, %cst_13 {dimension_numbers = #tpu.dot_dimension_numbers<[2], [2], [1], [1], [0, 0, 0, 1, 1, 1], [0], [0]>} : vector<8x16x8xf32>, vector<8x16x8xf32>, vector<8x16x16xf32> -> vector<8x16x16xf32>
    "tpu.trace_stop"() : () -> ()
    %43 = vector.shape_cast %42 : vector<8x16x16xf32> to vector<4x2x16x16xf32>
    %c0_14 = arith.constant 0 : index
    %c0_15 = arith.constant 0 : index
    %c0_16 = arith.constant 0 : index
    %44 = vector.load %arg2[%c0_14, %c0_15, %c0_16] : memref<4x16x16xbf16, #tpu.memory_space<vmem>>, vector<4x16x16xbf16>
    %45 = vector.shape_cast %44 : vector<4x16x16xbf16> to vector<4x1x16x16xbf16>
    %46 = arith.extf %45 : vector<4x1x16x16xbf16> to vector<4x1x16x16xf32>
    %47 = vector.broadcast %46 : vector<4x1x16x16xf32> to vector<4x2x16x16xf32>
    %48 = arith.addf %43, %47 : vector<4x2x16x16xf32>
    %49 = vector.shape_cast %48 : vector<4x2x16x16xf32> to vector<8x16x16xf32>
    %cst_17 = arith.constant dense<0xFF800000> : vector<8x16xf32>
    %50 = vector.multi_reduction <maximumf>, %49, %cst_17 [2] : vector<8x16x16xf32> to vector<8x16xf32>
    %51 = vector.shape_cast %50 : vector<8x16xf32> to vector<8x16x1xf32>
    %52 = vector.broadcast %51 : vector<8x16x1xf32> to vector<8x16x16xf32>
    %53 = arith.subf %49, %52 : vector<8x16x16xf32>
    %54 = math.exp %53 : vector<8x16x16xf32>
    %cst_18 = arith.constant dense<0.000000e+00> : vector<8x16xf32>
    %55 = vector.multi_reduction <add>, %54, %cst_18 [2] : vector<8x16x16xf32> to vector<8x16xf32>
    %56 = vector.shape_cast %55 : vector<8x16xf32> to vector<8x16x1xf32>
    %cst_19 = arith.constant 1.000000e+00 : f32
    %57 = vector.broadcast %cst_19 : f32 to vector<8x16x1xf32>
    %58 = arith.divf %57, %56 : vector<8x16x1xf32>
    "tpu.trace_start"() <{level = 10 : i32, message = "bqk,bkd->bqd"}> : () -> ()
    %cst_20 = arith.constant dense<0.000000e+00> : vector<8x16x8xf32>
    %59 = tpu.matmul %54, %41, %cst_20 {dimension_numbers = #tpu.dot_dimension_numbers<[2], [1], [1], [2], [0, 0, 0, 1, 1, 2], [0], [0]>} : vector<8x16x16xf32>, vector<8x16x8xf32>, vector<8x16x8xf32> -> vector<8x16x8xf32>
    "tpu.trace_stop"() : () -> ()
    %60 = vector.broadcast %58 : vector<8x16x1xf32> to vector<8x16x8xf32>
    %61 = arith.mulf %59, %60 : vector<8x16x8xf32>
    %62 = vector.shape_cast %61 : vector<8x16x8xf32> to vector<4x2x16x8xf32>
    %63 = vector.extract_strided_slice %62 {offsets = [0, 0, 0, 0], sizes = [1, 2, 16, 8], strides = [1, 1, 1, 1]} : vector<4x2x16x8xf32> to vector<1x2x16x8xf32>
    %64 = vector.shape_cast %63 : vector<1x2x16x8xf32> to vector<2x16x8xf32>
    %65 = vector.extract_strided_slice %62 {offsets = [1, 0, 0, 0], sizes = [1, 2, 16, 8], strides = [1, 1, 1, 1]} : vector<4x2x16x8xf32> to vector<1x2x16x8xf32>
    %66 = vector.shape_cast %65 : vector<1x2x16x8xf32> to vector<2x16x8xf32>
    %67 = vector.extract_strided_slice %62 {offsets = [2, 0, 0, 0], sizes = [1, 2, 16, 8], strides = [1, 1, 1, 1]} : vector<4x2x16x8xf32> to vector<1x2x16x8xf32>
    %68 = vector.shape_cast %67 : vector<1x2x16x8xf32> to vector<2x16x8xf32>
    %69 = vector.extract_strided_slice %62 {offsets = [3, 0, 0, 0], sizes = [1, 2, 16, 8], strides = [1, 1, 1, 1]} : vector<4x2x16x8xf32> to vector<1x2x16x8xf32>
    %70 = vector.shape_cast %69 : vector<1x2x16x8xf32> to vector<2x16x8xf32>
    %71 = tpu.concatenate %64, %66, %68, %70 in 2 : vector<2x16x8xf32>, vector<2x16x8xf32>, vector<2x16x8xf32>, vector<2x16x8xf32> -> vector<2x16x32xf32>
    %72 = vector.shape_cast %71 : vector<2x16x32xf32> to vector<32x32xf32>
    %c0_21 = arith.constant 0 : index
    %c0_22 = arith.constant 0 : index
    %73 = vector.load %arg4[%c0_21, %c0_22] : memref<32x32xf32, #tpu.memory_space<vmem>>, vector<32x32xf32>
    %cst_23 = arith.constant dense<0.000000e+00> : vector<32x32xf32>
    %74 = tpu.matmul %72, %73, %cst_23 {dimension_numbers = #tpu.dot_dimension_numbers<[1], [0], [0], [1], [0, 0, 1, 1], [], []>} : vector<32x32xf32>, vector<32x32xf32>, vector<32x32xf32> -> vector<32x32xf32>
    %c0_24 = arith.constant 0 : index
    %c0_25 = arith.constant 0 : index
    %75 = vector.load %arg5[%c0_24, %c0_25] : memref<1x32xf32, #tpu.memory_space<vmem>>, vector<1x32xf32>
    %76 = vector.broadcast %75 : vector<1x32xf32> to vector<32x32xf32>
    %77 = arith.addf %74, %76 : vector<32x32xf32>
    %78 = arith.addf %1, %77 : vector<32x32xf32>
    %c0_26 = arith.constant 0 : index
    %c0_27 = arith.constant 0 : index
    %79 = vector.load %arg8[%c0_26, %c0_27] : memref<1x32xf32, #tpu.memory_space<vmem>>, vector<1x32xf32>
    %c0_28 = arith.constant 0 : index
    %c0_29 = arith.constant 0 : index
    %80 = vector.load %arg9[%c0_28, %c0_29] : memref<1x32xf32, #tpu.memory_space<vmem>>, vector<1x32xf32>
    %cst_30 = arith.constant dense<0.000000e+00> : vector<32xf32>
    %81 = vector.multi_reduction <add>, %78, %cst_30 [1] : vector<32x32xf32> to vector<32xf32>
    %82 = vector.shape_cast %81 : vector<32xf32> to vector<32x1xf32>
    %cst_31 = arith.constant 3.200000e+01 : f32
    %83 = vector.broadcast %cst_31 : f32 to vector<32x1xf32>
    %84 = arith.divf %82, %83 : vector<32x1xf32>
    %85 = vector.broadcast %84 : vector<32x1xf32> to vector<32x32xf32>
    %86 = arith.subf %78, %85 : vector<32x32xf32>
    %87 = arith.mulf %86, %86 : vector<32x32xf32>
    %cst_32 = arith.constant dense<0.000000e+00> : vector<32xf32>
    %88 = vector.multi_reduction <add>, %87, %cst_32 [1] : vector<32x32xf32> to vector<32xf32>
    %89 = vector.shape_cast %88 : vector<32xf32> to vector<32x1xf32>
    %cst_33 = arith.constant 3.200000e+01 : f32
    %90 = vector.broadcast %cst_33 : f32 to vector<32x1xf32>
    %91 = arith.divf %89, %90 : vector<32x1xf32>
    %92 = vector.broadcast %84 : vector<32x1xf32> to vector<32x32xf32>
    %93 = arith.subf %78, %92 : vector<32x32xf32>
    %cst_34 = arith.constant 9.99999974E-6 : f32
    %94 = vector.broadcast %cst_34 : f32 to vector<32x1xf32>
    %95 = arith.addf %91, %94 : vector<32x1xf32>
    %96 = math.rsqrt %95 : vector<32x1xf32>
    %97 = vector.broadcast %96 : vector<32x1xf32> to vector<32x32xf32>
    %98 = arith.mulf %93, %97 : vector<32x32xf32>
    %99 = vector.broadcast %79 : vector<1x32xf32> to vector<32x32xf32>
    %100 = arith.mulf %98, %99 : vector<32x32xf32>
    %101 = vector.broadcast %80 : vector<1x32xf32> to vector<32x32xf32>
    %102 = arith.addf %100, %101 : vector<32x32xf32>
    %c0_35 = arith.constant 0 : index
    %c0_36 = arith.constant 0 : index
    %103 = vector.load %arg10[%c0_35, %c0_36] : memref<32x128xf32, #tpu.memory_space<vmem>>, vector<32x128xf32>
    %cst_37 = arith.constant dense<0.000000e+00> : vector<32x128xf32>
    %104 = tpu.matmul %102, %103, %cst_37 {dimension_numbers = #tpu.dot_dimension_numbers<[1], [0], [0], [1], [0, 0, 1, 1], [], []>} : vector<32x32xf32>, vector<32x128xf32>, vector<32x128xf32> -> vector<32x128xf32>
    %c0_38 = arith.constant 0 : index
    %c0_39 = arith.constant 0 : index
    %105 = vector.load %arg11[%c0_38, %c0_39] : memref<1x128xf32, #tpu.memory_space<vmem>>, vector<1x128xf32>
    %106 = vector.broadcast %105 : vector<1x128xf32> to vector<32x128xf32>
    %107 = arith.addf %104, %106 : vector<32x128xf32>
    %cst_40 = arith.constant 0.000000e+00 : f32
    %108 = vector.broadcast %cst_40 : f32 to vector<32x128xf32>
    %109 = arith.maximumf %107, %108 : vector<32x128xf32>
    %c0_41 = arith.constant 0 : index
    %c0_42 = arith.constant 0 : index
    %110 = vector.load %arg12[%c0_41, %c0_42] : memref<128x32xf32, #tpu.memory_space<vmem>>, vector<128x32xf32>
    %cst_43 = arith.constant dense<0.000000e+00> : vector<32x32xf32>
    %111 = tpu.matmul %109, %110, %cst_43 {dimension_numbers = #tpu.dot_dimension_numbers<[1], [0], [0], [1], [0, 0, 1, 1], [], []>} : vector<32x128xf32>, vector<128x32xf32>, vector<32x32xf32> -> vector<32x32xf32>
    %c0_44 = arith.constant 0 : index
    %c0_45 = arith.constant 0 : index
    %112 = vector.load %arg13[%c0_44, %c0_45] : memref<1x32xf32, #tpu.memory_space<vmem>>, vector<1x32xf32>
    %113 = vector.broadcast %112 : vector<1x32xf32> to vector<32x32xf32>
    %114 = arith.addf %111, %113 : vector<32x32xf32>
    %115 = arith.addf %78, %114 : vector<32x32xf32>
    %116 = vector.shape_cast %115 : vector<32x32xf32> to vector<2x16x32xf32>
    %c0_46 = arith.constant 0 : index
    %c0_47 = arith.constant 0 : index
    %c0_48 = arith.constant 0 : index
    %117 = vector.load %arg14[%c0_46, %c0_47, %c0_48] : memref<2x16x32xf32, #tpu.memory_space<vmem>>, vector<2x16x32xf32>
    tpu.vector_store %arg14[%c0_46, %c0_47, %c0_48], %116 {strides = array<i32>} : memref<2x16x32xf32, #tpu.memory_space<vmem>>, vector<2x16x32xf32>,
    return
  }
  func.func @transform_0(%arg0: i32) -> (i32, i32, i32) {
    %c0_i32 = arith.constant 0 : i32
    %c0_i32_0 = arith.constant 0 : i32
    %c0_i32_1 = arith.constant 0 : i32
    return %arg0, %c0_i32, %c0_i32_0 : i32, i32, i32
  }
  func.func @transform_1(%arg0: i32) -> (i32, i32, i32) {
    %c0_i32 = arith.constant 0 : i32
    %c0_i32_0 = arith.constant 0 : i32
    %c0_i32_1 = arith.constant 0 : i32
    %c0_i32_2 = arith.constant 0 : i32
    return %c0_i32, %c0_i32_0, %c0_i32_1 : i32, i32, i32
  }
  func.func @transform_2(%arg0: i32) -> (i32, i32) {
    %c0_i32 = arith.constant 0 : i32
    %c0_i32_0 = arith.constant 0 : i32
    %c0_i32_1 = arith.constant 0 : i32
    return %c0_i32, %c0_i32_0 : i32, i32
  }
  func.func @transform_3(%arg0: i32) -> (i32, i32) {
    %c0_i32 = arith.constant 0 : i32
    %c0_i32_0 = arith.constant 0 : i32
    %c0_i32_1 = arith.constant 0 : i32
    return %c0_i32, %c0_i32_0 : i32, i32
  }
  func.func @transform_4(%arg0: i32) -> (i32, i32) {
    %c0_i32 = arith.constant 0 : i32
    %c0_i32_0 = arith.constant 0 : i32
    %c0_i32_1 = arith.constant 0 : i32
    return %c0_i32, %c0_i32_0 : i32, i32
  }
  func.func @transform_5(%arg0: i32) -> (i32, i32) {
    %c0_i32 = arith.constant 0 : i32
    %c0_i32_0 = arith.constant 0 : i32
    %c0_i32_1 = arith.constant 0 : i32
    return %c0_i32, %c0_i32_0 : i32, i32
  }
  func.func @transform_6(%arg0: i32) -> (i32, i32) {
    %c0_i32 = arith.constant 0 : i32
    %c0_i32_0 = arith.constant 0 : i32
    %c0_i32_1 = arith.constant 0 : i32
    return %c0_i32, %c0_i32_0 : i32, i32
  }
  func.func @transform_7(%arg0: i32) -> (i32, i32) {
    %c0_i32 = arith.constant 0 : i32
    %c0_i32_0 = arith.constant 0 : i32
    %c0_i32_1 = arith.constant 0 : i32
    return %c0_i32, %c0_i32_0 : i32, i32
  }
  func.func @transform_8(%arg0: i32) -> (i32, i32) {
    %c0_i32 = arith.constant 0 : i32
    %c0_i32_0 = arith.constant 0 : i32
    %c0_i32_1 = arith.constant 0 : i32
    return %c0_i32, %c0_i32_0 : i32, i32
  }
  func.func @transform_9(%arg0: i32) -> (i32, i32) {
    %c0_i32 = arith.constant 0 : i32
    %c0_i32_0 = arith.constant 0 : i32
    %c0_i32_1 = arith.constant 0 : i32
    return %c0_i32, %c0_i32_0 : i32, i32
  }
  func.func @transform_10(%arg0: i32) -> (i32, i32) {
    %c0_i32 = arith.constant 0 : i32
    %c0_i32_0 = arith.constant 0 : i32
    %c0_i32_1 = arith.constant 0 : i32
    return %c0_i32, %c0_i32_0 : i32, i32
  }
  func.func @transform_11(%arg0: i32) -> (i32, i32) {
    %c0_i32 = arith.constant 0 : i32
    %c0_i32_0 = arith.constant 0 : i32
    %c0_i32_1 = arith.constant 0 : i32
    return %c0_i32, %c0_i32_0 : i32, i32
  }
  func.func @transform_12(%arg0: i32) -> (i32, i32) {
    %c0_i32 = arith.constant 0 : i32
    %c0_i32_0 = arith.constant 0 : i32
    %c0_i32_1 = arith.constant 0 : i32
    return %c0_i32, %c0_i32_0 : i32, i32
  }
  func.func @transform_13(%arg0: i32) -> (i32, i32, i32) {
    %c0_i32 = arith.constant 0 : i32
    %c0_i32_0 = arith.constant 0 : i32
    %c0_i32_1 = arith.constant 0 : i32
    return %arg0, %c0_i32, %c0_i32_0 : i32, i32, i32
  }
}

</mosaic_0001>

<bundles_post_ra>
// kernel: tpu_custom_call.1
= control target key start
LH: loop header
LB: loop body
LE: loop exit
PB: predicated region body
PF: predicated region fallthrough
CT: control target
= control target key end

     0   :  { %vm51_vm0 = vcmask 261120   ;;  %s2538_s0 = inlined_call_operand.vmem [shape: f32[2,16,32], index: 0, kind: input, shape index: {}]   ;;  %s2539_s1 = inlined_call_operand.vmem [shape: bf16[4,16,16], index: 1, kind: input, shape index: {}]   ;;  %s2540_s2 = inlined_call_operand.vmem [shape: f32[32,96], index: 2, kind: input, shape index: {}]   ;;  %s2541_s3 = inlined_call_operand.vmem [shape: f32[32,32], index: 3, kind: input, shape index: {}]   ;;  %s2542_s4 = inlined_call_operand.vmem [shape: f32[1,32], index: 4, kind: input, shape index: {}]   ;;  %s2543_s5 = inlined_call_operand.vmem [shape: f32[1,32], index: 5, kind: input, shape index: {}]   ;;  %s2544_s6 = inlined_call_operand.vmem [shape: f32[1,32], index: 6, kind: input, shape index: {}]   ;;  %s2545_s7 = inlined_call_operand.vmem [shape: f32[1,32], index: 7, kind: input, shape index: {}]   ;;  %s2546_s8 = inlined_call_operand.vmem [shape: f32[1,32], index: 8, kind: input, shape index: {}]   ;;  %s2547_s9 = inlined_call_operand.vmem [shape: f32[32,128], index: 9, kind: input, shape index: {}]   ;;  %s2548_s10 = inlined_call_operand.vmem [shape: f32[1,128], index: 10, kind: input, shape index: {}]   ;;  %s2549_s11 = inlined_call_operand.vmem [shape: f32[128,32], index: 11, kind: input, shape index: {}]   ;;  %s2550_s12 = inlined_call_operand.vmem [shape: f32[1,32], index: 12, kind: input, shape index: {}]   ;;  %s2551_s13 = inlined_call_operand.hbm [shape: f32[2,16,32], index: 13, kind: output, shape index: {}]  }
   0x1   :  { %v47_v0 = vld [vmem:[%s2538_s0 + $0x10] sm:$0xff]  ;;  %v46_v1 = vld [vmem:[%s2538_s0 + $0x8] sm:$0xff]  ;;  %v48_v4 = vld [vmem:[%s2538_s0 + $0x18] sm:$0xff] }
   0x2   :  { %v58_v2 = vsel %vm51_vm0, %v47_v0, 0.0  ;;  %v55_v3 = vsel %vm51_vm0, %v46_v1, 0.0  ;;  %v45_v5 = vld [vmem:[%s2538_s0] sm:$0xff] }
   0x3   :  { %59 = vadd.xlane.f32.xlu1 %v58_v2  ;;  %56 = vadd.xlane.f32.xlu0 %v55_v3 }
   0x4   :  { %18 = vsyncpa [#allocation3], 0  ;;  %v61_v6 = vsel %vm51_vm0, %v48_v4, 0.0  ;;  %v52_v7 = vsel %vm51_vm0, %v45_v5, 0.0  ;;  %v1827_v8 = vmov 32.0   ;;  %v164_v35 = vld [vmem:[%s2540_s2 + $0x18] sm:$0xff] }
   0x5   :  { %1715 = vrcp.f32 %v1827_v8  ;;  %1653 = vmatpush.msra.mxu1 %v164_v35  ;;  %189 = vmatpush.msra.mxu0 %v164_v35  ;;  %v163_v36 = vld [vmem:[%s2540_s2 + $0x10] sm:$0xff]  ;;  %v162_v37 = vld [vmem:[%s2540_s2 + $0x8] sm:$0xff]  ;;  %v161_v38 = vld [vmem:[%s2540_s2] sm:$0xff]  ;;  %s1830_s27 = smov 56   ;;  %s1831_s28 = smov 120   ;;  %vm238_vm14 = vcmask 64512  }
   0x6   :  { %s1832_s29 = smov 112   ;;  %vm547_vm15 = vcmask 130048   ;;  %s1834_s21 = smov 16  }
   0x7   :  { %1654 = vmatpush.msra.mxu1 %v163_v36  ;;  %190 = vmatpush.msra.mxu0 %v163_v36  ;;  %s1835_s22 = smov 24   ;;  %s1562_s15 = sshll.u32 %s2551_s13, 4  ;;  %s1563_s15 = int_to_ptr.hbm [resolvable:$true] %s1562_s15 }
   0x8   :  { %s1837_s17 = smov 128  }
   0x9   :  { %1655 = vmatpush.msra.mxu1 %v162_v37  ;;  %191 = vmatpush.msra.mxu0 %v162_v37 }
   0xb   :  { %62 = vadd.xlane.f32.xlu1 %v61_v6  ;;  %53 = vadd.xlane.f32.xlu0 %v52_v7  ;;  %v1716_v9 = vpop.eup %1715 }
   0xc   :  { %v65_v10 = vmul.f32 32.0, %v1716_v9  ;;  %vm69_vm1 = vweird.f32 %v1716_v9  ;;  %1656 = vmatpush.msra.mxu1 %v161_v38  ;;  %192 = vmatpush.msra.mxu0 %v161_v38 }
   0xe   :  { %v66_v11 = vsub.f32 1.0, %v65_v10 }
  0x10   :  { %v67_v12 = vmul.f32 %v1716_v9, %v66_v11 }
  0x12   :  { %v68_v13 = vadd.f32 %v1716_v9, %v67_v12 }
  0x14   :  { %v1924_v14 = vsel %vm69_vm1, %v1716_v9, %v68_v13  ;;  %v1709_v9 = vld [vmem:[%s2544_s6] ss:$0 sm:$0xff]  ;;  %s1829_s6 = smov 104  }
  0x76   :  { %v60_v15 = vpop.xlane.xlu1 %59  ;;  %v57_v16 = vpop.xlane.xlu0 %56 }
  0x77   :  { %v73_v17 = vmul.f32 %v1924_v14, %v60_v15  ;;  %v72_v18 = vmul.f32 %v1924_v14, %v57_v16 }
  0x79   :  { %v1928_v19 = vsub.f32 %v47_v0, %v73_v17  ;;  %v1930_v20 = vsub.f32 %v46_v1, %v72_v18 }
  0x7b   :  { %v80_v21 = vmul.f32 %v1930_v20, %v1930_v20  ;;  %v81_v22 = vmul.f32 %v1928_v19, %v1928_v19 }
  0x7d   :  { %v86_v23 = vsel %vm51_vm0, %v80_v21, 0.0  ;;  %v89_v24 = vsel %vm51_vm0, %v81_v22, 0.0 }
  0x7e   :  { %v63_v25 = vpop.xlane.xlu1 %62  ;;  %87 = vadd.xlane.f32.xlu2 %v86_v23  ;;  %90 = vadd.xlane.f32.xlu0 %v89_v24  ;;  %v54_v26 = vpop.xlane.xlu0 %53 }
  0x7f   :  { %v74_v27 = vmul.f32 %v1924_v14, %v63_v25  ;;  %v71_v28 = vmul.f32 %v1924_v14, %v54_v26 }
  0x81   :  { %v1940_v29 = vsub.f32 %v48_v4, %v74_v27  ;;  %v1942_v30 = vsub.f32 %v45_v5, %v71_v28  ;;  %v1708_v4 = vld [vmem:[%s2543_s5] ss:$0 sm:$0xff]  ;;  %s1828_s5 = smov 80  }
  0x83   :  { %v82_v31 = vmul.f32 %v1940_v29, %v1940_v29  ;;  %v79_v32 = vmul.f32 %v1942_v30, %v1942_v30 }
  0x85   :  { %v92_v33 = vsel %vm51_vm0, %v82_v31, 0.0  ;;  %v83_v34 = vsel %vm51_vm0, %v79_v32, 0.0 }
  0x86   :  { %93 = vadd.xlane.f32.xlu1 %v92_v33  ;;  %84 = vadd.xlane.f32.xlu2 %v83_v34 }
  0xf1   :  { %v88_v39 = vpop.xlane.xlu2 %87  ;;  %v91_v40 = vpop.xlane.xlu0 %90 }
  0xf2   :  { %v96_v41 = vmul.f32 %v88_v39, %v1924_v14  ;;  %v97_v42 = vmul.f32 %v91_v40, %v1924_v14 }
  0xf4   :  { %v100_v43 = vadd.f32 1e-05, %v96_v41  ;;  %v101_v44 = vadd.f32 1e-05, %v97_v42 }
  0xf6   :  { %1717 = vrsqrt.f32 %v100_v43  ;;  %vm129_vm3 = vweird.f32 %v101_v44  ;;  %vm119_vm5 = vweird.f32 %v100_v43 }
  0xf7   :  { %1719 = vrsqrt.f32 %v101_v44 }
  0xf9   :  { %v94_v45 = vpop.xlane.xlu1 %93  ;;  %v85_v46 = vpop.xlane.xlu2 %84 }
  0xfa   :  { %v98_v47 = vmul.f32 %v94_v45, %v1924_v14  ;;  %v95_v48 = vmul.f32 %v85_v46, %v1924_v14 }
  0xfc   :  { %v1718_v49 = vpop.eup %1717  ;;  %v102_v50 = vadd.f32 1e-05, %v98_v47  ;;  %v99_v51 = vadd.f32 1e-05, %v95_v48 }
  0xfd   :  { %v1720_v52 = vpop.eup %1719  ;;  %v114_v53 = vmul.f32 %v1718_v49, %v100_v43  ;;  %vm120_vm2 = vweird.f32 %v1718_v49 }
  0xfe   :  { %v124_v54 = vmul.f32 %v1720_v52, %v101_v44  ;;  %1721 = vrsqrt.f32 %v102_v50  ;;  %vm130_vm4 = vweird.f32 %v1720_v52  ;;  %vm121_vm6 = vmor %vm119_vm5, %vm120_vm2  ;;  %vm139_vm8 = vweird.f32 %v102_v50 }
  0xff   :  { %v115_v55 = vmul.f32 %v1718_v49, %v114_v53  ;;  %1723 = vrsqrt.f32 %v99_v51  ;;  %vm1966_vm7 = vmor %vm129_vm3, %vm130_vm4  ;;  %vm109_vm10 = vweird.f32 %v99_v51 }
 0x100   :  { %v125_v56 = vmul.f32 %v1720_v52, %v124_v54 }
 0x101   :  { %v116_v57 = vmul.f32 0.5, %v115_v55 }
 0x102   :  { %v126_v58 = vmul.f32 0.5, %v125_v56 }
 0x103   :  { %v117_v59 = vsub.f32 1.5, %v116_v57 }
 0x104   :  { %v1722_v60 = vpop.eup %1721  ;;  %v127_v61 = vsub.f32 1.5, %v126_v58 }
 0x105   :  { %v1724_v62 = vpop.eup %1723  ;;  %v118_v63 = vmul.f32 %v1718_v49, %v117_v59  ;;  %v134_v0 = vmul.f32 %v1722_v60, %v102_v50  ;;  %vm140_vm9 = vweird.f32 %v1722_v60 }
 0x106   :  { %v128_v1 = vmul.f32 %v1720_v52, %v127_v61  ;;  %v104_v3 = vmul.f32 %v1724_v62, %v99_v51  ;;  %vm110_vm11 = vweird.f32 %v1724_v62  ;;  %vm141_vm12 = vmor %vm139_vm8, %vm140_vm9 }
 0x107   :  { %v122_v5 = vsel %vm121_vm6, %v1718_v49, %v118_v63  ;;  %v135_v6 = vmul.f32 %v1722_v60, %v134_v0  ;;  %vm111_vm13 = vmor %vm109_vm10, %vm110_vm11 }
 0x108   :  { %v105_v7 = vmul.f32 %v1724_v62, %v104_v3  ;;  %v144_v8 = vmul.f32 %v122_v5, %v1930_v20  ;;  %v132_v10 = vsel %vm1966_vm7, %v1720_v52, %v128_v1 }
 0x109   :  { %v136_v11 = vmul.f32 0.5, %v135_v6  ;;  %v145_v18 = vmul.f32 %v132_v10, %v1928_v19 }
 0x10a   :  { %v106_v12 = vmul.f32 0.5, %v105_v7  ;;  %v151_v13 = vmul.f32 %v1708_v4, %v144_v8 }
 0x10b   :  { %v137_v15 = vsub.f32 1.5, %v136_v11  ;;  %v152_v23 = vmul.f32 %v1708_v4, %v145_v18  ;;  %v1635_v18 = vld [vmem:[%s2539_s1] sm:$0xff]  }
 0x10c   :  { %v107_v16 = vsub.f32 1.5, %v106_v12  ;;  %v158_v17 = vadd.f32 %v1709_v9, %v151_v13 }
 0x10d   :  { %v138_v20 = vmul.f32 %v1722_v60, %v137_v15  ;;  %v159_v27 = vadd.f32 %v1709_v9, %v152_v23 }
 0x10e   :  { %v108_v21 = vmul.f32 %v1724_v62, %v107_v16  ;;  %1575 = vmatmul.msk.f32.vlgmr.msra.gmra.mxu1 %vm51_vm0, %v158_v17 }
 0x10f   :  { %v142_v24 = vsel %vm141_vm12, %v1722_v60, %v138_v20  ;;  %v1636_v20 = vunpack.c.l.bf16 %v1635_v18 }
 0x110   :  { %v112_v22 = vsel %vm111_vm13, %v1724_v62, %v108_v21  ;;  %v146_v28 = vmul.f32 %v142_v24, %v1940_v29  ;;  %v1637_v21 = vunpack.c.h.bf16 %v1635_v18 }
 0x111   :  { %v143_v25 = vmul.f32 %v112_v22, %v1942_v30 }
 0x112   :  { %v153_v19 = vmul.f32 %v1708_v4, %v146_v28 }
 0x113   :  { %v150_v26 = vmul.f32 %v1708_v4, %v143_v25 }
 0x114   :  { %v160_v32 = vadd.f32 %v1709_v9, %v153_v19 }
 0x115   :  { %v157_v31 = vadd.f32 %v1709_v9, %v150_v26 }
 0x116   :  { %1576 = vmatmul.msk.f32.gmra.mxu1 %vm51_vm0, %v159_v27 }
 0x117   :  { %1574 = vmatmul.msk.f32.vlgmr.msra.gmra.mxu0 %vm51_vm0, %v157_v31 }
 0x11e   :  { %1577 = vmatmul.msk.f32.gmra.mxu1 %vm51_vm0, %v160_v32 }
 0x18b   :  { %v1986_v33 = vpop.f32.mrf.mxu1 }
 0x18c   :  { %220 = vrot.lane.b32.xlu1 %v1986_v33, %s1828_s5  ;;  %212 = vrot.lane.b32.xlu2 %v1986_v33, %s1829_s6 }
 0x193   :  { %v200_v30 = vpop.f32.mrf.mxu1 }
 0x194   :  { %v194_v34 = vpop.f32.mrf.mxu0  ;;  %222 = vrot.lane.b32.xlu1 %v200_v30, %s1828_s5 }
 0x195   :  { %218 = vrot.lane.b32.xlu2 %v194_v34, %s1828_s5  ;;  %210 = vrot.lane.b32.xlu0 %v194_v34, %s1829_s6  ;;  %v1668_v46 = vpack.i.bf16 %v194_v34, %v1986_v33 }
 0x19b   :  { %v203_v29 = vpop.f32.mrf.mxu1 }
 0x19c   :  { %224 = vrot.lane.b32.xlu1 %v203_v29, %s1828_s5 }
 0x19d   :  { %228 = vrot.lane.b32.xlu2 %v1986_v33, %s1830_s27  ;;  %214 = vrot.lane.b32.xlu0 %v200_v30, %s1829_s6 }
 0x1a4   :  { %232 = vrot.lane.b32.xlu1 %v203_v29, %s1830_s27 }
 0x1a5   :  { %226 = vrot.lane.b32.xlu2 %v194_v34, %s1830_s27  ;;  %216 = vrot.lane.b32.xlu0 %v203_v29, %s1829_s6 }
 0x1ac   :  { %230 = vrot.lane.b32.xlu1 %v200_v30, %s1830_s27 }
 0x1ad   :  { %270 = vrot.lane.b32.xlu2 %v200_v30, %s1831_s28  ;;  %272 = vrot.lane.b32.xlu0 %v203_v29, %s1831_s28 }
 0x1b5   :  { %236 = vrot.lane.b32.xlu0 %v1986_v33, %s1831_s28 }
 0x1bd   :  { %234 = vrot.lane.b32.xlu0 %v194_v34, %s1831_s28 }
 0x1e6   :  { %v213_v35 = vpop.permute.xlu2 %212 }
 0x1e7   :  { %307 = vrot.lane.b32.xlu2 %v213_v35, %s1831_s28 }
 0x1ef   :  { %v219_v36 = vpop.permute.xlu2 %218 }
 0x1f0   :  { %375 = vrot.lane.b32.xlu0 %v219_v36, %s1831_s28  ;;  %v1683_v53 = vpack.i.bf16 %v219_v36, %v200_v30 }
 0x1f7   :  { %v2002_v38 = vpop.permute.xlu2 %228 }
 0x1fe   :  { %v1998_v37 = vpop.permute.xlu1 %220 }
 0x1ff   :  { %377 = vrot.lane.b32.xlu1 %v1998_v37, %s1831_s28  ;;  %v227_v41 = vpop.permute.xlu2 %226  ;;  %v1678_v52 = vpack.i.bf16 %v1998_v37, %v203_v29 }
 0x206   :  { %v2004_v39 = vpop.permute.xlu1 %222 }
 0x207   :  { %v211_v40 = vpop.permute.xlu0 %210  ;;  %447 = vrot.lane.b32.xlu1 %v2002_v38, %s1831_s28  ;;  %v271_v49 = vpop.permute.xlu2 %270 }
 0x208   :  { %305 = vrot.lane.b32.xlu2 %v211_v40, %s1831_s28  ;;  %v1673_v50 = vpack.i.bf16 %v211_v40, %v213_v35 }
 0x20e   :  { %v2009_v42 = vpop.permute.xlu1 %224 }
 0x20f   :  { %v215_v43 = vpop.permute.xlu0 %214  ;;  %445 = vrot.lane.b32.xlu1 %v227_v41, %s1831_s28  ;;  %412 = vrot.lane.b32.xlu0 %v2009_v42, %s1831_s28 }
 0x210   :  { %v1693_v55 = vpack.i.bf16 %v227_v41, %v215_v43 }
 0x216   :  { %v2014_v44 = vpop.permute.xlu1 %232 }
 0x217   :  { %v2016_v45 = vpop.permute.xlu0 %216  ;;  %410 = vrot.lane.b32.xlu0 %v2004_v39, %s1831_s28 }
 0x218   :  { %342 = vrot.lane.b32.xlu2 %v2016_v45, %s1831_s28 }
 0x21e   :  { %v2023_v47 = vpop.permute.xlu1 %230 }
 0x21f   :  { %v273_v48 = vpop.permute.xlu0 %272  ;;  %480 = vrot.lane.b32.xlu1 %v2023_v47, %s1831_s28  ;;  %1669 = vrot.lane.b32.xlu0 %v1668_v46, %s1832_s29 }
 0x220   :  { %340 = vrot.lane.b32.xlu2 %v215_v43, %s1831_s28  ;;  %1582 = vmatpush.xpose.msk.msra.mxu2 %vm238_vm14, %v273_v48 }
 0x224   :  { %1583 = vmatpush.xpose.msk.msra.mxu2 %vm238_vm14, %v271_v49 }
 0x227   :  { %1584 = vmatmul.msk.f32.vlgmr.msra.gmra.mxu2 %vm238_vm14, %v200_v30  ;;  %v237_v51 = vpop.permute.xlu0 %236  ;;  %1674 = vrot.lane.b32.xlu1 %v1673_v50, %s1832_s29  ;;  %v1688_v30 = vpack.i.bf16 %v2002_v38, %v2016_v45 }
 0x228   :  { %482 = vrot.lane.b32.xlu2 %v2014_v44, %s1831_s28  ;;  %1578 = vmatpush.xpose.msk.msrb.mxu1 %vm238_vm14, %v237_v51 }
 0x22f   :  { %1585 = vmatmul.msk.f32.gmra.mxu2 %vm238_vm14, %v203_v29  ;;  %v235_v54 = vpop.permute.xlu0 %234  ;;  %1679 = vrot.lane.b32.xlu1 %v1678_v52, %s1832_s29 }
 0x230   :  { %1684 = vrot.lane.b32.xlu2 %v1683_v53, %s1832_s29  ;;  %1579 = vmatpush.xpose.msk.msrb.mxu1 %vm238_vm14, %v235_v54 }
 0x233   :  { %1580 = vmatmul.msk.f32.vlgmr.msrb.gmra.mxu1 %vm238_vm14, %v194_v34  ;;  %v1650_v34 = vld [vmem:[%s2539_s1 + $0x8] sm:$0xff]  }
 0x234   :  { %v1640_v29 = vunpack.c.l.bf16 %v1650_v34  ;;  %v1641_v48 = vunpack.c.h.bf16 %v1650_v34 }
 0x237   :  { %1694 = vrot.lane.b32.xlu1 %v1693_v55, %s1832_s29 }
 0x23b   :  { %1581 = vmatmul.msk.f32.gmra.mxu1 %vm238_vm14, %v1986_v33 }
 0x241   :  { %v308_v56 = vpop.permute.xlu2 %307 }
 0x242   :  { %1586 = vmatpush.xpose.msk.msra.mxu3 %vm238_vm14, %v308_v56 }
 0x262   :  { %v306_v57 = vpop.permute.xlu2 %305  ;;  %v376_v60 = vpop.permute.xlu0 %375 }
 0x263   :  { %1587 = vmatpush.xpose.msk.msra.mxu3 %vm238_vm14, %v306_v57 }
 0x266   :  { %1588 = vmatmul.msk.f32.vlgmr.msra.gmra.mxu3 %vm238_vm14, %v211_v40  ;;  %v1651_v40 = vld [vmem:[%s2539_s1 + $0x10] sm:$0xff]  }
 0x26e   :  { %1589 = vmatmul.msk.f32.gmra.mxu3 %vm238_vm14, %v213_v35 }
 0x271   :  { %v378_v58 = vpop.permute.xlu1 %377 }
 0x272   :  { %v343_v59 = vpop.permute.xlu2 %342  ;;  %1594 = vmatpush.xpose.msk.msrb.mxu2 %vm238_vm14, %v378_v58 }
 0x273   :  { %1590 = vmatpush.xpose.msk.msra.mxu1 %vm238_vm14, %v343_v59  ;;  %v1645_v59 = vunpack.c.h.bf16 %v1651_v40 }
 0x276   :  { %1595 = vmatpush.xpose.msk.msrb.mxu2 %vm238_vm14, %v376_v60 }
 0x279   :  { %v448_v61 = vpop.permute.xlu1 %447  ;;  %1596 = vmatmul.msk.f32.vlgmr.msrb.gmra.mxu2 %vm238_vm14, %v219_v36 }
 0x27a   :  { %v341_v62 = vpop.permute.xlu2 %340  ;;  %1602 = vmatpush.xpose.msk.msrb.mxu0 %vm238_vm14, %v448_v61 }
 0x27b   :  { %1591 = vmatpush.xpose.msk.msra.mxu1 %vm238_vm14, %v341_v62 }
 0x27e   :  { %1592 = vmatmul.msk.f32.vlgmr.msra.gmra.mxu1 %vm238_vm14, %v215_v43 }
 0x281   :  { %v446_v63 = vpop.permute.xlu1 %445  ;;  %1597 = vmatmul.msk.f32.gmra.mxu2 %vm238_vm14, %v1998_v37  ;;  %v413_v0 = vpop.permute.xlu0 %412 }
 0x282   :  { %v483_v1 = vpop.permute.xlu2 %482  ;;  %1598 = vmatpush.xpose.msk.msrb.mxu3 %vm238_vm14, %v413_v0  ;;  %1603 = vmatpush.xpose.msk.msrb.mxu0 %vm238_vm14, %v446_v63 }
 0x283   :  { %1606 = vmatpush.xpose.msk.msrb.mxu1 %vm238_vm14, %v483_v1 }
 0x285   :  { %1604 = vmatmul.msk.f32.vlgmr.msrb.gmra.mxu0 %vm238_vm14, %v227_v41  ;;  %v1644_v41 = vunpack.c.l.bf16 %v1651_v40 }
 0x286   :  { %1593 = vmatmul.msk.f32.gmra.mxu1 %vm238_vm14, %v2016_v45  ;;  %v1652_v45 = vld [vmem:[%s2539_s1 + $0x18] sm:$0xff]   ;;  %s1833_s1 = smov 8  }
 0x287   :  { %v1648_v50 = vunpack.c.l.bf16 %v1652_v45  ;;  %v1649_v61 = vunpack.c.h.bf16 %v1652_v45 }
 0x289   :  { %v411_v2 = vpop.permute.xlu0 %410 }
 0x28a   :  { %1599 = vmatpush.xpose.msk.msrb.mxu3 %vm238_vm14, %v411_v2  ;;  %v1685_v10 = vpop.permute.xlu2 %1684 }
 0x28b   :  { %v1687_v15 = vunpack.i.h.bf16 %v1685_v10  ;;  %v1686_v16 = vunpack.i.l.bf16 %v1685_v10 }
 0x28d   :  { %1600 = vmatmul.msk.f32.vlgmr.msrb.gmra.mxu3 %vm238_vm14, %v2004_v39  ;;  %1605 = vmatmul.msk.f32.gmra.mxu0 %vm238_vm14, %v2002_v38 }
 0x291   :  { %v481_v3 = vpop.permute.xlu1 %480  ;;  %v1670_v4 = vpop.permute.xlu0 %1669 }
 0x292   :  { %v1671_v5 = vunpack.i.l.bf16 %v1670_v4  ;;  %1607 = vmatpush.xpose.msk.msrb.mxu1 %vm238_vm14, %v481_v3  ;;  %v1672_v6 = vunpack.i.h.bf16 %v1670_v4 }
 0x294   :  { %958 = vmatpush.msra.mxu2 %v1671_v5 }
 0x295   :  { %1601 = vmatmul.msk.f32.gmra.mxu3 %vm238_vm14, %v2009_v42  ;;  %1608 = vmatmul.msk.f32.vlgmr.msrb.gmra.mxu1 %vm238_vm14, %v2023_v47 }
 0x296   :  { %959 = vmatpush.msra.mxu2 %v1672_v6 }
 0x299   :  { %v1675_v7 = vpop.permute.xlu1 %1674 }
 0x29a   :  { %v1676_v8 = vunpack.i.l.bf16 %v1675_v7  ;;  %v1677_v9 = vunpack.i.h.bf16 %v1675_v7 }
 0x29c   :  { %1028 = vmatpush.msra.mxu0 %v1676_v8 }
 0x29d   :  { %1609 = vmatmul.msk.f32.gmra.mxu1 %vm238_vm14, %v2014_v44 }
 0x29e   :  { %1029 = vmatpush.msra.mxu0 %v1677_v9 }
 0x2a1   :  { %v1680_v11 = vpop.permute.xlu1 %1679 }
 0x2a2   :  { %v1682_v12 = vunpack.i.h.bf16 %v1680_v11  ;;  %v1681_v13 = vunpack.i.l.bf16 %v1680_v11  ;;  %v1698_v11 = vpack.i.bf16 %v2004_v39, %v2009_v42 }
 0x2a4   :  { %993 = vmatpush.msra.mxu3 %v1681_v13  ;;  %1098 = vmatpush.msrb.mxu2 %v1682_v12 }
 0x2a6   :  { %994 = vmatpush.msra.mxu3 %v1686_v16  ;;  %1099 = vmatpush.msrb.mxu2 %v1687_v15  ;;  %v1703_v16 = vpack.i.bf16 %v2023_v47, %v2014_v44 }
 0x2aa   :  { %v299_v17 = vpop.f32.mrf.mxu2 }
 0x2ab   :  { %v2091_v32 = vadd.f32 %v1636_v20, %v299_v17  ;;  %v1695_v17 = vpop.permute.xlu1 %1694 }
 0x2ac   :  { %v1696_v40 = vunpack.i.l.bf16 %v1695_v17 }
 0x2ad   :  { %v554_v33 = vsel %vm547_vm15, %v2091_v32, -inf }
 0x2b0   :  { %v264_v22 = vpop.f32.mrf.mxu1 }
 0x2b1   :  { %v2079_v23 = vadd.f32 %v1636_v20, %v264_v22 }
 0x2b2   :  { %v302_v24 = vpop.f32.mrf.mxu2 }
 0x2b3   :  { %v2081_v25 = vadd.f32 %v1637_v21, %v302_v24  ;;  %v548_v26 = vsel %vm547_vm15, %v2079_v23, -inf }
 0x2b4   :  { %549 = vmax.xlane.f32.xlu0 %v548_v26 }
 0x2b5   :  { %v557_v27 = vsel %vm547_vm15, %v2081_v25, -inf }
 0x2b6   :  { %558 = vmax.xlane.f32.xlu2 %v557_v27 }
 0x2b8   :  { %v267_v28 = vpop.f32.mrf.mxu1 }
 0x2b9   :  { %v2087_v31 = vadd.f32 %v1637_v21, %v267_v28 }
 0x2bb   :  { %v551_v19 = vsel %vm547_vm15, %v2087_v31, -inf }
 0x2bc   :  { %552 = vmax.xlane.f32.xlu1 %v551_v19 }
 0x2c4   :  { %555 = vmax.xlane.f32.xlu1 %v554_v33 }
 0x2c8   :  { %1689 = vrot.lane.b32.xlu0 %v1688_v30, %s1832_s29 }
 0x2e9   :  { %v334_v35 = vpop.f32.mrf.mxu3 }
 0x2ea   :  { %v2101_v36 = vadd.f32 %v1640_v29, %v334_v35 }
 0x2ec   :  { %v560_v37 = vsel %vm547_vm15, %v2101_v36, -inf }
 0x2ed   :  { %561 = vmax.xlane.f32.xlu2 %v560_v37  ;;  %v1697_v37 = vunpack.i.h.bf16 %v1695_v17 }
 0x2f1   :  { %v337_v51 = vpop.f32.mrf.mxu3 }
 0x2f2   :  { %v2115_v53 = vadd.f32 %v1641_v48, %v337_v51 }
 0x2f4   :  { %v563_v60 = vsel %vm547_vm15, %v2115_v53, -inf }
 0x2fb   :  { %v369_v38 = vpop.f32.mrf.mxu1 }
 0x2fc   :  { %v404_v43 = vpop.f32.mrf.mxu2  ;;  %v2135_v5 = vadd.f32 %v1640_v29, %v369_v38 }
 0x2fd   :  { %v2111_v46 = vadd.f32 %v1644_v41, %v404_v43 }
 0x2fe   :  { %v566_v9 = vsel %vm547_vm15, %v2135_v5, -inf }
 0x2ff   :  { %v572_v49 = vsel %vm547_vm15, %v2111_v46, -inf }
 0x300   :  { %573 = vmax.xlane.f32.xlu2 %v572_v49 }
 0x302   :  { %v474_v52 = vpop.f32.mrf.mxu0 }
 0x303   :  { %v372_v54 = vpop.f32.mrf.mxu1  ;;  %v2117_v55 = vadd.f32 %v1648_v50, %v474_v52 }
 0x304   :  { %v2119_v56 = vadd.f32 %v1641_v48, %v372_v54  ;;  %v407_v62 = vpop.f32.mrf.mxu2 }
 0x305   :  { %v584_v57 = vsel %vm547_vm15, %v2117_v55, -inf  ;;  %v2127_v0 = vadd.f32 %v1645_v59, %v407_v62 }
 0x306   :  { %585 = vmax.xlane.f32.xlu0 %v584_v57  ;;  %v569_v58 = vsel %vm547_vm15, %v2119_v56, -inf }
 0x307   :  { %570 = vmax.xlane.f32.xlu1 %v569_v58  ;;  %v575_v3 = vsel %vm547_vm15, %v2127_v0, -inf }
 0x308   :  { %564 = vmax.xlane.f32.xlu2 %v563_v60 }
 0x30a   :  { %v477_v63 = vpop.f32.mrf.mxu0 }
 0x30b   :  { %v2129_v1 = vadd.f32 %v1649_v61, %v477_v63 }
 0x30d   :  { %v587_v2 = vsel %vm547_vm15, %v2129_v1, -inf }
 0x30e   :  { %588 = vmax.xlane.f32.xlu0 %v587_v2 }
 0x310   :  { %576 = vmax.xlane.f32.xlu2 %v575_v3  ;;  %v439_v8 = vpop.f32.mrf.mxu3 }
 0x311   :  { %v2143_v10 = vadd.f32 %v1644_v41, %v439_v8 }
 0x312   :  { %v509_v4 = vpop.f32.mrf.mxu1 }
 0x313   :  { %v2137_v6 = vadd.f32 %v1648_v50, %v509_v4  ;;  %v578_v12 = vsel %vm547_vm15, %v2143_v10, -inf }
 0x315   :  { %v590_v7 = vsel %vm547_vm15, %v2137_v6, -inf }
 0x316   :  { %591 = vmax.xlane.f32.xlu0 %v590_v7 }
 0x318   :  { %567 = vmax.xlane.f32.xlu2 %v566_v9  ;;  %v442_v13 = vpop.f32.mrf.mxu3 }
 0x319   :  { %v2150_v15 = vadd.f32 %v1645_v59, %v442_v13 }
 0x31a   :  { %v512_v21 = vpop.f32.mrf.mxu1 }
 0x31b   :  { %v581_v20 = vsel %vm547_vm15, %v2150_v15, -inf  ;;  %v2158_v22 = vadd.f32 %v1649_v61, %v512_v21 }
 0x31d   :  { %v593_v26 = vsel %vm547_vm15, %v2158_v22, -inf }
 0x320   :  { %1699 = vrot.lane.b32.xlu1 %v1698_v11, %s1832_s29  ;;  %579 = vmax.xlane.f32.xlu2 %v578_v12 }
 0x327   :  { %v550_v18 = vpop.xlane.xlu0 %549 }
 0x328   :  { %v596_v39 = vsub.f32 %v2079_v23, %v550_v18  ;;  %1704 = vrot.lane.b32.xlu1 %v1703_v16, %s1832_s29  ;;  %582 = vmax.xlane.f32.xlu2 %v581_v20 }
 0x329   :  { %v559_v19 = vpop.xlane.xlu2 %558 }
 0x32a   :  { %v612_v42 = vmul.f32 1.442695, %v596_v39 }
 0x32c   :  { %1725 = vpow2.f32 %v612_v42 }
 0x32f   :  { %v553_v24 = vpop.xlane.xlu1 %552 }
 0x330   :  { %v597_v44 = vsub.f32 %v2087_v31, %v553_v24  ;;  %594 = vmax.xlane.f32.xlu2 %v593_v26  ;;  %v599_v31 = vsub.f32 %v2081_v25, %v559_v19 }
 0x332   :  { %v2163_v47 = vpop.eup %1725  ;;  %v614_v27 = vmul.f32 1.442695, %v597_v44 }
 0x333   :  { %1610 = vmatmul.msk.f32.vlgmr.msra.gmra.mxu2 %vm547_vm15, %v2163_v47  ;;  %v644_v11 = vsel %vm547_vm15, %v2163_v47, 0.0 }
 0x334   :  { %1727 = vpow2.f32 %v614_v27 }
 0x337   :  { %v556_v23 = vpop.xlane.xlu1 %555 }
 0x338   :  { %v598_v28 = vsub.f32 %v2091_v32, %v556_v23  ;;  %v618_v32 = vmul.f32 1.442695, %v599_v31 }
 0x33a   :  { %v2168_v33 = vpop.eup %1727  ;;  %v616_v30 = vmul.f32 1.442695, %v598_v28  ;;  %v1690_v34 = vpop.permute.xlu0 %1689 }
 0x33b   :  { %v1692_v29 = vunpack.i.h.bf16 %v1690_v34  ;;  %v1691_v35 = vunpack.i.l.bf16 %v1690_v34  ;;  %1611 = vmatmul.msk.f32.gmra.mxu2 %vm547_vm15, %v2168_v33 }
 0x33c   :  { %1729 = vpow2.f32 %v616_v30 }
 0x33d   :  { %1063 = vmatpush.msra.mxu1 %v1691_v35  ;;  %1168 = vmatpush.msrb.mxu0 %v1692_v29  ;;  %1731 = vpow2.f32 %v618_v32 }
 0x33f   :  { %1064 = vmatpush.msra.mxu1 %v1696_v40  ;;  %1169 = vmatpush.msrb.mxu0 %v1697_v37 }
 0x342   :  { %v1730_v41 = vpop.eup %1729 }
 0x343   :  { %1612 = vmatmul.msk.f32.vlgmr.msra.gmra.mxu3 %vm547_vm15, %v1730_v41  ;;  %v2174_v38 = vpop.eup %1731  ;;  %v650_v52 = vsel %vm547_vm15, %v1730_v41, 0.0 }
 0x34b   :  { %1613 = vmatmul.msk.f32.gmra.mxu3 %vm547_vm15, %v2174_v38 }
 0x360   :  { %v562_v43 = vpop.xlane.xlu2 %561 }
 0x361   :  { %v600_v25 = vsub.f32 %v2101_v36, %v562_v43 }
 0x363   :  { %v620_v45 = vmul.f32 1.442695, %v600_v25 }
 0x365   :  { %1733 = vpow2.f32 %v620_v45 }
 0x36b   :  { %v1734_v48 = vpop.eup %1733 }
 0x36c   :  { %1614 = vmatmul.msk.f32.vlgmr.msra.gmra.mxu0 %vm547_vm15, %v1734_v48  ;;  %v656_v49 = vsel %vm547_vm15, %v1734_v48, 0.0 }
 0x36d   :  { %657 = vadd.xlane.f32.xlu2 %v656_v49 }
 0x373   :  { %v574_v50 = vpop.xlane.xlu2 %573 }
 0x374   :  { %v604_v51 = vsub.f32 %v2111_v46, %v574_v50 }
 0x375   :  { %651 = vadd.xlane.f32.xlu2 %v650_v52 }
 0x376   :  { %v628_v54 = vmul.f32 1.442695, %v604_v51 }
 0x378   :  { %1735 = vpow2.f32 %v628_v54 }
 0x379   :  { %v586_v57 = vpop.xlane.xlu0 %585 }
 0x37a   :  { %v608_v58 = vsub.f32 %v2117_v55, %v586_v57  ;;  %v571_v12 = vpop.xlane.xlu1 %570 }
 0x37b   :  { %v565_v36 = vpop.xlane.xlu2 %564  ;;  %v603_v21 = vsub.f32 %v2119_v56, %v571_v12 }
 0x37c   :  { %v636_v59 = vmul.f32 1.442695, %v608_v58  ;;  %v601_v60 = vsub.f32 %v2115_v53, %v565_v36 }
 0x37d   :  { %v626_v26 = vmul.f32 1.442695, %v603_v21 }
 0x37e   :  { %v1736_v61 = vpop.eup %1735  ;;  %1737 = vpow2.f32 %v636_v59  ;;  %v622_v62 = vmul.f32 1.442695, %v601_v60 }
 0x37f   :  { %1618 = vmatmul.msk.f32.vlgmr.msrb.gmra.mxu2 %vm547_vm15, %v1736_v61  ;;  %v668_v63 = vsel %vm547_vm15, %v1736_v61, 0.0 }
 0x380   :  { %1739 = vpow2.f32 %v622_v62  ;;  %669 = vadd.xlane.f32.xlu1 %v668_v63 }
 0x381   :  { %v589_v46 = vpop.xlane.xlu0 %588 }
 0x382   :  { %v609_v2 = vsub.f32 %v2129_v1, %v589_v46 }
 0x383   :  { %v577_v3 = vpop.xlane.xlu2 %576 }
 0x384   :  { %v1738_v4 = vpop.eup %1737  ;;  %v638_v7 = vmul.f32 1.442695, %v609_v2  ;;  %v605_v55 = vsub.f32 %v2127_v0, %v577_v3  ;;  %v647_v0 = vsel %vm547_vm15, %v2168_v33, 0.0 }
 0x385   :  { %v680_v8 = vsel %vm547_vm15, %v1738_v4, 0.0 }
 0x386   :  { %v1740_v53 = vpop.eup %1739  ;;  %1741 = vpow2.f32 %v638_v7  ;;  %v630_v9 = vmul.f32 1.442695, %v605_v55  ;;  %681 = vadd.xlane.f32.xlu0 %v680_v8 }
 0x387   :  { %1615 = vmatmul.msk.f32.gmra.mxu0 %vm547_vm15, %v1740_v53  ;;  %v659_v27 = vsel %vm547_vm15, %v1740_v53, 0.0 }
 0x388   :  { %1743 = vpow2.f32 %v630_v9  ;;  %645 = vadd.xlane.f32.xlu1 %v644_v11 }
 0x389   :  { %v592_v28 = vpop.xlane.xlu0 %591 }
 0x38a   :  { %v610_v56 = vsub.f32 %v2137_v6, %v592_v28 }
 0x38b   :  { %v568_v1 = vpop.xlane.xlu2 %567 }
 0x38c   :  { %v1742_v13 = vpop.eup %1741  ;;  %v602_v16 = vsub.f32 %v2135_v5, %v568_v1  ;;  %v640_v29 = vmul.f32 1.442695, %v610_v56 }
 0x38d   :  { %v683_v17 = vsel %vm547_vm15, %v1742_v13, 0.0 }
 0x38e   :  { %v1744_v18 = vpop.eup %1743  ;;  %v624_v20 = vmul.f32 1.442695, %v602_v16  ;;  %648 = vadd.xlane.f32.xlu0 %v647_v0  ;;  %684 = vadd.xlane.f32.xlu2 %v683_v17 }
 0x38f   :  { %1619 = vmatmul.msk.f32.gmra.mxu2 %vm547_vm15, %v1744_v18  ;;  %1622 = vmatmul.msk.f32.vlgmr.msrb.gmra.mxu0 %vm547_vm15, %v1738_v4  ;;  %v671_v47 = vsel %vm547_vm15, %v1744_v18, 0.0 }
 0x390   :  { %1745 = vpow2.f32 %v624_v20 }
 0x392   :  { %v1700_v39 = vpop.permute.xlu1 %1699 }
 0x393   :  { %v1701_v42 = vunpack.i.l.bf16 %v1700_v39  ;;  %v580_v24 = vpop.xlane.xlu2 %579  ;;  %v1702_v44 = vunpack.i.h.bf16 %v1700_v39 }
 0x394   :  { %v606_v5 = vsub.f32 %v2143_v10, %v580_v24 }
 0x395   :  { %1133 = vmatpush.msrb.mxu3 %v1701_v42 }
 0x396   :  { %v1746_v23 = vpop.eup %1745  ;;  %v632_v19 = vmul.f32 1.442695, %v606_v5  ;;  %672 = vadd.xlane.f32.xlu0 %v671_v47  ;;  %660 = vadd.xlane.f32.xlu2 %v659_v27 }
 0x397   :  { %1134 = vmatpush.msrb.mxu3 %v1702_v44  ;;  %1616 = vmatmul.msk.f32.vlgmr.msra.gmra.mxu1 %vm547_vm15, %v1746_v23  ;;  %v662_v31 = vsel %vm547_vm15, %v1746_v23, 0.0 }
 0x398   :  { %1747 = vpow2.f32 %v632_v19  ;;  %1623 = vmatmul.msk.f32.gmra.mxu0 %vm547_vm15, %v1742_v13 }
 0x399   :  { %1749 = vpow2.f32 %v626_v26 }
 0x39a   :  { %v1705_v10 = vpop.permute.xlu1 %1704 }
 0x39b   :  { %v1706_v33 = vunpack.i.l.bf16 %v1705_v10  ;;  %v583_v30 = vpop.xlane.xlu2 %582  ;;  %v1707_v35 = vunpack.i.h.bf16 %v1705_v10 }
 0x39c   :  { %v607_v34 = vsub.f32 %v2150_v15, %v583_v30 }
 0x39d   :  { %1203 = vmatpush.msrb.mxu1 %v1706_v33 }
 0x39e   :  { %v1748_v37 = vpop.eup %1747  ;;  %v634_v40 = vmul.f32 1.442695, %v607_v34  ;;  %663 = vadd.xlane.f32.xlu0 %v662_v31 }
 0x39f   :  { %v1750_v32 = vpop.eup %1749  ;;  %1204 = vmatpush.msrb.mxu1 %v1707_v35  ;;  %1620 = vmatmul.msk.f32.vlgmr.msrb.gmra.mxu3 %vm547_vm15, %v1748_v37  ;;  %v674_v41 = vsel %vm547_vm15, %v1748_v37, 0.0 }
 0x3a0   :  { %1751 = vpow2.f32 %v634_v40  ;;  %1617 = vmatmul.msk.f32.gmra.mxu1 %vm547_vm15, %v1750_v32  ;;  %675 = vadd.xlane.f32.xlu2 %v674_v41  ;;  %v665_v49 = vsel %vm547_vm15, %v1750_v32, 0.0 }
 0x3a1   :  { %1753 = vpow2.f32 %v640_v29 }
 0x3a3   :  { %v595_v6 = vpop.xlane.xlu2 %594 }
 0x3a4   :  { %v611_v15 = vsub.f32 %v2158_v22, %v595_v6 }
 0x3a6   :  { %v1752_v43 = vpop.eup %1751  ;;  %v642_v25 = vmul.f32 1.442695, %v611_v15 }
 0x3a7   :  { %v1754_v45 = vpop.eup %1753  ;;  %1621 = vmatmul.msk.f32.gmra.mxu3 %vm547_vm15, %v1752_v43  ;;  %v677_v48 = vsel %vm547_vm15, %v1752_v43, 0.0 }
 0x3a8   :  { %1755 = vpow2.f32 %v642_v25  ;;  %1624 = vmatmul.msk.f32.vlgmr.msrb.gmra.mxu1 %vm547_vm15, %v1754_v45  ;;  %678 = vadd.xlane.f32.xlu0 %v677_v48  ;;  %v686_v52 = vsel %vm547_vm15, %v1754_v45, 0.0 }
 0x3a9   :  { %666 = vadd.xlane.f32.xlu2 %v665_v49 }
 0x3ae   :  { %v1756_v50 = vpop.eup %1755 }
 0x3af   :  { %v689_v51 = vsel %vm547_vm15, %v1756_v50, 0.0 }
 0x3b0   :  { %1625 = vmatmul.msk.f32.gmra.mxu1 %vm547_vm15, %v1756_v50  ;;  %687 = vadd.xlane.f32.xlu0 %v686_v52 }
 0x3b1   :  { %690 = vadd.xlane.f32.xlu2 %v689_v51 }
 0x3b6   :  { %v2219_v53 = vpop.f32.mrf.mxu2 }
 0x3be   :  { %v2224_v24 = vpop.f32.mrf.mxu2 }
 0x3c6   :  { %v996_v21 = vpop.f32.mrf.mxu3 }
 0x3e0   :  { %v658_v22 = vpop.xlane.xlu2 %657 }
 0x3e1   :  { %1757 = vrcp.f32 %v658_v22  ;;  %v763_v59 = vand.u32 2147483648, %v658_v22  ;;  %v761_v61 = vand.u32 2147483647, %v658_v22  ;;  %vm757_vm2 = vweird.f32 %v658_v22 }
 0x3e3   :  { %v764_v46 = vor.u32 1.1754944e-38, %v763_v59  ;;  %vm762_vm4 = vcmp.eq.f32.partialorder %v761_v61, 8.507059e+37 }
 0x3e7   :  { %v1758_v54 = vpop.eup %1757 }
 0x3e8   :  { %v753_v57 = vmul.f32 %v1758_v54, %v658_v22  ;;  %v652_v58 = vpop.xlane.xlu2 %651  ;;  %vm758_vm1 = vweird.f32 %v1758_v54 }
 0x3e9   :  { %1759 = vrcp.f32 %v652_v58  ;;  %vm759_vm3 = vmor %vm757_vm2, %vm758_vm1  ;;  %v1031_v7 = vpop.f32.mrf.mxu0  ;;  %v733_v9 = vand.u32 2147483648, %v652_v58  ;;  %v731_v1 = vand.u32 2147483647, %v652_v58  ;;  %vm727_vm6 = vweird.f32 %v652_v58 }
 0x3ea   :  { %v754_v36 = vsub.f32 1.0, %v753_v57 }
 0x3eb   :  { %v734_v16 = vor.u32 1.1754944e-38, %v733_v9  ;;  %vm732_vm8 = vcmp.eq.f32.partialorder %v731_v1, 8.507059e+37 }
 0x3ec   :  { %v755_v60 = vmul.f32 %v1758_v54, %v754_v36 }
 0x3ee   :  { %v756_v62 = vadd.f32 %v1758_v54, %v755_v60 }
 0x3ef   :  { %v1760_v63 = vpop.eup %1759 }
 0x3f0   :  { %v723_v2 = vmul.f32 %v1760_v63, %v652_v58  ;;  %v760_v3 = vsel %vm759_vm3, %v1758_v54, %v756_v62  ;;  %vm728_vm5 = vweird.f32 %v1760_v63 }
 0x3f1   :  { %v765_v4 = vsel %vm762_vm4, %v764_v46, %v760_v3  ;;  %vm729_vm7 = vmor %vm727_vm6, %vm728_vm5 }
 0x3f2   :  { %v724_v55 = vsub.f32 1.0, %v723_v2  ;;  %v1216_v8 = vmul.f32 %v1031_v7, %v765_v4 }
 0x3f3   :  { %v670_v11 = vpop.xlane.xlu1 %669 }
 0x3f4   :  { %v725_v12 = vmul.f32 %v1760_v63, %v724_v55  ;;  %1761 = vrcp.f32 %v670_v11  ;;  %1232 = vrot.lane.b32.xlu1 %v1216_v8, %s1833_s1  ;;  %v823_v44 = vand.u32 2147483648, %v670_v11  ;;  %v821_v27 = vand.u32 2147483647, %v670_v11 }
 0x3f5   :  { %vm817_vm10 = vweird.f32 %v670_v11 }
 0x3f6   :  { %v726_v13 = vadd.f32 %v1760_v63, %v725_v12  ;;  %v824_v33 = vor.u32 1.1754944e-38, %v823_v44  ;;  %vm822_vm12 = vcmp.eq.f32.partialorder %v821_v27, 8.507059e+37 }
 0x3f8   :  { %v730_v0 = vsel %vm729_vm7, %v1760_v63, %v726_v13 }
 0x3f9   :  { %v682_v17 = vpop.xlane.xlu0 %681  ;;  %v735_v18 = vsel %vm732_vm8, %v734_v16, %v730_v0 }
 0x3fa   :  { %v1762_v20 = vpop.eup %1761  ;;  %1763 = vrcp.f32 %v682_v17  ;;  %v2222_v42 = vmul.f32 %v996_v21, %v735_v18  ;;  %v883_v40 = vand.u32 2147483648, %v682_v17  ;;  %vm877_vm1 = vweird.f32 %v682_v17 }
 0x3fb   :  { %v813_v39 = vmul.f32 %v1762_v20, %v670_v11  ;;  %vm818_vm9 = vweird.f32 %v1762_v20  ;;  %v881_v41 = vand.u32 2147483647, %v682_v17 }
 0x3fc   :  { %vm819_vm11 = vmor %vm817_vm10, %vm818_vm9  ;;  %v884_v48 = vor.u32 1.1754944e-38, %v883_v40 }
 0x3fd   :  { %v814_v5 = vsub.f32 1.0, %v813_v39  ;;  %vm882_vm3 = vcmp.eq.f32.partialorder %v881_v41, 8.507059e+37 }
 0x3ff   :  { %v815_v26 = vmul.f32 %v1762_v20, %v814_v5 }
 0x400   :  { %v1764_v47 = vpop.eup %1763 }
 0x401   :  { %v873_v23 = vmul.f32 %v1764_v47, %v682_v17  ;;  %v2226_v28 = vpop.xlane.xlu2 %684  ;;  %v649_v19 = vpop.xlane.xlu0 %648  ;;  %v816_v56 = vadd.f32 %v1762_v20, %v815_v26  ;;  %vm878_vm13 = vweird.f32 %v1764_v47 }
 0x402   :  { %1765 = vrcp.f32 %v649_v19  ;;  %v1101_v35 = vpop.f32.mrf.mxu2  ;;  %vm879_vm2 = vmor %vm877_vm1, %vm878_vm13  ;;  %v716_v58 = vand.u32 2147483647, %v649_v19  ;;  %v718_v36 = vand.u32 2147483648, %v649_v19  ;;  %vm712_vm4 = vweird.f32 %v649_v19 }
 0x403   :  { %v874_v10 = vsub.f32 1.0, %v873_v23  ;;  %v820_v30 = vsel %vm819_vm11, %v1762_v20, %v816_v56  ;;  %1767 = vrcp.f32 %v2226_v28  ;;  %v896_v8 = vand.u32 2147483647, %v2226_v28 }
 0x404   :  { %v2228_v34 = vpop.f32.mrf.mxu0  ;;  %v825_v29 = vsel %vm822_vm12, %v824_v33, %v820_v30  ;;  %vm2248_vm6 = vcmp.eq.f32.partialorder %v716_v58, 8.507059e+37  ;;  %v719_v4 = vor.u32 1.1754944e-38, %v718_v36  ;;  %vm892_vm8 = vweird.f32 %v2226_v28  ;;  %v2305_v58 = vpop.f32.mrf.mxu3 }
 0x405   :  { %v875_v31 = vmul.f32 %v1764_v47, %v874_v10  ;;  %v1220_v37 = vmul.f32 %v1101_v35, %v825_v29 }
 0x407   :  { %v876_v32 = vadd.f32 %v1764_v47, %v875_v31  ;;  %1248 = vrot.lane.b32.xlu0 %v1220_v37, %s1834_s21 }
 0x408   :  { %v1766_v6 = vpop.eup %1765 }
 0x409   :  { %v2232_v15 = vpop.xlane.xlu2 %660  ;;  %v2234_v43 = vpop.xlane.xlu0 %672  ;;  %v880_v25 = vsel %vm879_vm2, %v1764_v47, %v876_v32  ;;  %v708_v45 = vmul.f32 %v1766_v6, %v649_v19  ;;  %vm713_vm5 = vweird.f32 %v1766_v6 }
 0x40a   :  { %1769 = vrcp.f32 %v2232_v15  ;;  %v2237_v49 = vpop.eup %1767  ;;  %v885_v51 = vsel %vm882_vm3, %v884_v48, %v880_v25  ;;  %v778_v9 = vand.u32 2147483648, %v2232_v15  ;;  %v836_v12 = vand.u32 2147483647, %v2234_v43  ;;  %vm714_vm7 = vmor %vm712_vm4, %vm713_vm5 }
 0x40b   :  { %1771 = vrcp.f32 %v2234_v43  ;;  %v709_v50 = vsub.f32 1.0, %v708_v45  ;;  %v888_v54 = vmul.f32 %v2237_v49, %v2226_v28  ;;  %v838_v13 = vand.u32 2147483648, %v2234_v43 }
 0x40c   :  { %v1171_v52 = vpop.f32.mrf.mxu0  ;;  %v776_v16 = vand.u32 2147483647, %v2232_v15  ;;  %vm772_vm11 = vweird.f32 %v2232_v15  ;;  %vm893_vm12 = vweird.f32 %v2237_v49  ;;  %v779_v5 = vor.u32 1.1754944e-38, %v778_v9 }
 0x40d   :  { %v1224_v22 = vmul.f32 %v1171_v52, %v885_v51  ;;  %v710_v57 = vmul.f32 %v1766_v6, %v709_v50  ;;  %v889_v63 = vsub.f32 1.0, %v888_v54  ;;  %vm832_vm13 = vweird.f32 %v2234_v43 }
 0x40e   :  { %v839_v27 = vor.u32 1.1754944e-38, %v838_v13  ;;  %vm777_vm3 = vcmp.eq.f32.partialorder %v776_v16, 8.507059e+37  ;;  %vm837_vm4 = vcmp.eq.f32.partialorder %v836_v12, 8.507059e+37 }
 0x40f   :  { %1264 = vrot.lane.b32.xlu2 %v1224_v22, %s1835_s22  ;;  %v711_v46 = vadd.f32 %v1766_v6, %v710_v57  ;;  %v890_v17 = vmul.f32 %v2237_v49, %v889_v63 }
 0x410   :  { %v1770_v59 = vpop.eup %1769 }
 0x411   :  { %v1772_v60 = vpop.eup %1771  ;;  %v768_v61 = vmul.f32 %v1770_v59, %v2232_v15  ;;  %v2244_v62 = vpop.xlane.xlu0 %663  ;;  %vm773_vm9 = vweird.f32 %v1770_v59  ;;  %v715_v18 = vsel %vm714_vm7, %v1766_v6, %v711_v46  ;;  %v891_v10 = vadd.f32 %v2237_v49, %v890_v17 }
 0x412   :  { %v828_v2 = vmul.f32 %v1772_v60, %v2234_v43  ;;  %1773 = vrcp.f32 %v2244_v62  ;;  %vm833_vm10 = vweird.f32 %v1772_v60  ;;  %v720_v21 = vsel %vm2248_vm6, %v719_v4, %v715_v18  ;;  %vm774_vm1 = vmor %vm772_vm11, %vm773_vm9  ;;  %v1104_v35 = vpop.f32.mrf.mxu2 }
 0x413   :  { %v769_v7 = vsub.f32 1.0, %v768_v61  ;;  %v2252_v55 = vpop.xlane.xlu2 %675  ;;  %v2270_v44 = vmul.f32 %v2224_v24, %v720_v21  ;;  %vm834_vm2 = vmor %vm832_vm13, %vm833_vm10  ;;  %v791_v32 = vand.u32 2147483647, %v2244_v62  ;;  %v793_v41 = vand.u32 2147483648, %v2244_v62 }
 0x414   :  { %v829_v11 = vsub.f32 1.0, %v828_v2  ;;  %1775 = vrcp.f32 %v2252_v55  ;;  %v1066_v6 = vpop.f32.mrf.mxu1  ;;  %v898_v15 = vand.u32 2147483648, %v2226_v28  ;;  %vm2292_vm6 = vmor %vm892_vm8, %vm893_vm12  ;;  %vm787_vm7 = vweird.f32 %v2244_v62 }
 0x415   :  { %v770_v1 = vmul.f32 %v1770_v59, %v769_v7  ;;  %v895_v50 = vsel %vm2292_vm6, %v2237_v49, %v891_v10  ;;  %v794_v52 = vor.u32 1.1754944e-38, %v793_v41  ;;  %vm897_vm10 = vcmp.eq.f32.partialorder %v896_v8, 8.507059e+37  ;;  %v1174_v22 = vpop.f32.mrf.mxu0 }
 0x416   :  { %v830_v0 = vmul.f32 %v1772_v60, %v829_v11  ;;  %v899_v28 = vor.u32 1.1754944e-38, %v898_v15  ;;  %vm792_vm8 = vcmp.eq.f32.partialorder %v791_v32, 8.507059e+37  ;;  %vm847_vm12 = vweird.f32 %v2252_v55 }
 0x417   :  { %v771_v20 = vadd.f32 %v1770_v59, %v770_v1  ;;  %v851_v63 = vand.u32 2147483647, %v2252_v55 }
 0x418   :  { %v1774_v39 = vpop.eup %1773  ;;  %v831_v26 = vadd.f32 %v1772_v60, %v830_v0 }
 0x419   :  { %v783_v47 = vmul.f32 %v1774_v39, %v2244_v62  ;;  %v775_v23 = vsel %vm774_vm1, %v1770_v59, %v771_v20  ;;  %vm788_vm5 = vweird.f32 %v1774_v39  ;;  %v900_v59 = vsel %vm897_vm10, %v899_v28, %v895_v50 }
 0x41a   :  { %v2273_v19 = vpop.eup %1775  ;;  %v835_v56 = vsel %vm834_vm2, %v1772_v60, %v831_v26  ;;  %v780_v33 = vsel %vm777_vm3, %v779_v5, %v775_v23  ;;  %vm789_vm9 = vmor %vm787_vm7, %vm788_vm5  ;;  %v853_v60 = vand.u32 2147483648, %v2252_v55  ;;  %v1225_v62 = vmul.f32 %v1174_v22, %v900_v59 }
 0x41b   :  { %v784_v30 = vsub.f32 1.0, %v783_v47  ;;  %v840_v29 = vsel %vm837_vm4, %v839_v27, %v835_v56  ;;  %v843_v24 = vmul.f32 %v2273_v19, %v2252_v55  ;;  %v2278_v31 = vpop.xlane.xlu0 %678  ;;  %v1217_v37 = vmul.f32 %v2228_v34, %v780_v33 }
 0x41c   :  { %v1221_v40 = vmul.f32 %v1104_v35, %v840_v29  ;;  %v2284_v43 = vpop.xlane.xlu2 %666  ;;  %vm848_vm11 = vweird.f32 %v2273_v19  ;;  %v854_v11 = vor.u32 1.1754944e-38, %v853_v60  ;;  %vm852_vm1 = vcmp.eq.f32.partialorder %v851_v63, 8.507059e+37  ;;  %v1290_v63 = vld [vmem:[%s2541_s3 + $0x8] sm:$0xff] }
 0x41d   :  { %v844_v25 = vsub.f32 1.0, %v843_v24  ;;  %v785_v45 = vmul.f32 %v1774_v39, %v784_v30  ;;  %1777 = vrcp.f32 %v2284_v43  ;;  %1234 = vrot.lane.b32.xlu1 %v1217_v37, %s1833_s1  ;;  %vm849_vm13 = vmor %vm847_vm12, %vm848_vm11  ;;  %v1069_v9 = vpop.f32.mrf.mxu1  ;;  %v806_v0 = vand.u32 2147483647, %v2284_v43 }
 0x41e   :  { %1779 = vrcp.f32 %v2278_v31  ;;  %1250 = vrot.lane.b32.xlu2 %v1221_v40, %s1834_s21  ;;  %v808_v17 = vand.u32 2147483648, %v2284_v43  ;;  %vm802_vm3 = vweird.f32 %v2284_v43  ;;  %v653_v37 = vsel %vm547_vm15, %v2174_v38, 0.0 }
 0x41f   :  { %v786_v48 = vadd.f32 %v1774_v39, %v785_v45  ;;  %v845_v51 = vmul.f32 %v2273_v19, %v844_v25  ;;  %vm807_vm5 = vcmp.eq.f32.partialorder %v806_v0, 8.507059e+37  ;;  %v868_v38 = vand.u32 2147483648, %v2278_v31 }
 0x420   :  { %v809_v23 = vor.u32 1.1754944e-38, %v808_v17  ;;  %v866_v50 = vand.u32 2147483647, %v2278_v31 }
 0x421   :  { %v790_v54 = vsel %vm789_vm9, %v1774_v39, %v786_v48  ;;  %v846_v57 = vadd.f32 %v2273_v19, %v845_v51  ;;  %v869_v22 = vor.u32 1.1754944e-38, %v868_v38 }
 0x422   :  { %v795_v36 = vsel %vm792_vm8, %v794_v52, %v790_v54  ;;  %v1136_v18 = vpop.f32.mrf.mxu3 }
 0x423   :  { %v1778_v49 = vpop.eup %1777  ;;  %v1218_v61 = vmul.f32 %v1066_v6, %v795_v36  ;;  %v688_v46 = vpop.xlane.xlu0 %687  ;;  %v850_v7 = vsel %vm849_vm13, %v2273_v19, %v846_v57 }
 0x424   :  { %v2310_v2 = vpop.eup %1779  ;;  %v798_v3 = vmul.f32 %v1778_v49, %v2284_v43  ;;  %v2313_v4 = vpop.xlane.xlu2 %690  ;;  %1781 = vrcp.f32 %v688_v46  ;;  %v855_v1 = vsel %vm852_vm1, %v854_v11, %v850_v7  ;;  %vm803_vm2 = vweird.f32 %v1778_v49 }
 0x425   :  { %1783 = vrcp.f32 %v2313_v4  ;;  %1266 = vrot.lane.b32.xlu1 %v1225_v62, %s1835_s22  ;;  %v858_v55 = vmul.f32 %v2310_v2, %v2278_v31  ;;  %v1222_v39 = vmul.f32 %v1136_v18, %v855_v1  ;;  %vm804_vm4 = vmor %vm802_vm3, %vm803_vm2  ;;  %v913_v56 = vand.u32 2147483648, %v688_v46  ;;  %v1206_v35 = vpop.f32.mrf.mxu1  ;;  %v646_v62 = vpop.xlane.xlu1 %645 }
 0x426   :  { %v799_v8 = vsub.f32 1.0, %v798_v3  ;;  %1236 = vrot.lane.b32.xlu2 %v1218_v61, %s1833_s1  ;;  %v911_v33 = vand.u32 2147483647, %v688_v46  ;;  %vm863_vm7 = vweird.f32 %v2310_v2  ;;  %vm907_vm9 = vweird.f32 %v688_v46  ;;  %v1291_v61 = vld [vmem:[%s2541_s3 + $0x10] sm:$0xff] }
 0x427   :  { %v859_v21 = vsub.f32 1.0, %v858_v55  ;;  %vm922_vm10 = vweird.f32 %v2313_v4  ;;  %v914_v32 = vor.u32 1.1754944e-38, %v913_v56  ;;  %v926_v6 = vand.u32 2147483647, %v2313_v4 }
 0x428   :  { %v800_v12 = vmul.f32 %v1778_v49, %v799_v8  ;;  %v928_v15 = vand.u32 2147483648, %v2313_v4  ;;  %vm912_vm12 = vcmp.eq.f32.partialorder %v911_v33, 8.507059e+37  ;;  %vm862_vm1 = vweird.f32 %v2278_v31 }
 0x429   :  { %v860_v30 = vmul.f32 %v2310_v2, %v859_v21  ;;  %vm864_vm2 = vmor %vm862_vm1, %vm863_vm7  ;;  %vm927_vm3 = vcmp.eq.f32.partialorder %v926_v6, 8.507059e+37  ;;  %1785 = vrcp.f32 %v646_v62  ;;  %v701_v11 = vand.u32 2147483647, %v646_v62 }
 0x42a   :  { %v1782_v13 = vpop.eup %1781  ;;  %v801_v16 = vadd.f32 %v1778_v49, %v800_v12  ;;  %v929_v52 = vor.u32 1.1754944e-38, %v928_v15  ;;  %v1139_v60 = vpop.f32.mrf.mxu3 }
 0x42b   :  { %v1784_v20 = vpop.eup %1783  ;;  %v903_v5 = vmul.f32 %v1782_v13, %v688_v46  ;;  %vm908_vm6 = vweird.f32 %v1782_v13  ;;  %v861_v45 = vadd.f32 %v2310_v2, %v860_v30  ;;  %v1289_v46 = vld [vmem:[%s2541_s3] sm:$0xff] }
 0x42c   :  { %v918_v26 = vmul.f32 %v1784_v20, %v2313_v4  ;;  %v805_v47 = vsel %vm804_vm4, %v1778_v49, %v801_v16  ;;  %vm923_vm8 = vweird.f32 %v1784_v20  ;;  %vm909_vm11 = vmor %vm907_vm9, %vm908_vm6  ;;  %vm867_vm4 = vcmp.eq.f32.partialorder %v866_v50, 8.507059e+37  ;;  %v1292_v49 = vld [vmem:[%s2541_s3 + $0x18] sm:$0xff] }
 0x42d   :  { %v904_v27 = vsub.f32 1.0, %v903_v5  ;;  %1252 = vrot.lane.b32.xlu1 %v1222_v39, %s1834_s21  ;;  %v810_v29 = vsel %vm807_vm5, %v809_v23, %v805_v47  ;;  %vm924_vm13 = vmor %vm922_vm10, %vm923_vm8  ;;  %v865_v28 = vsel %vm864_vm2, %v2310_v2, %v861_v45  ;;  %v1209_v36 = vpop.f32.mrf.mxu1  ;;  %1321 = vmatpush.msra.mxu2 %v1292_v49  ;;  %vm697_vm6 = vweird.f32 %v646_v62 }
 0x42e   :  { %v919_v19 = vsub.f32 1.0, %v918_v26  ;;  %v1219_v43 = vmul.f32 %v1069_v9, %v810_v29  ;;  %v870_v57 = vsel %vm867_vm4, %v869_v22, %v865_v28  ;;  %v703_v9 = vand.u32 2147483648, %v646_v62 }
 0x42f   :  { %v905_v10 = vmul.f32 %v1782_v13, %v904_v27  ;;  %v1223_v31 = vmul.f32 %v1139_v60, %v870_v57  ;;  %1322 = vmatpush.msra.mxu2 %v1291_v61  ;;  %v1786_v2 = vpop.eup %1785  ;;  %vm702_vm9 = vcmp.eq.f32.partialorder %v701_v11, 8.507059e+37  ;;  %vm1284_vm10 = vcmask 195584  }
 0x430   :  { %v920_v24 = vmul.f32 %v1784_v20, %v919_v19  ;;  %v693_v3 = vmul.f32 %v1786_v2, %v646_v62  ;;  %vm698_vm5 = vweird.f32 %v1786_v2  ;;  %v704_v12 = vor.u32 1.1754944e-38, %v703_v9  ;;  %v1799_v62 = vld [vmem:[%s2538_s0 + $0x10] sm:$0xff] }
 0x431   :  { %v906_v40 = vadd.f32 %v1782_v13, %v905_v10  ;;  %654 = vadd.xlane.f32.xlu0 %v653_v37  ;;  %1323 = vmatpush.msra.mxu2 %v1290_v63  ;;  %vm699_vm7 = vmor %vm697_vm6, %vm698_vm5 }
 0x432   :  { %v921_v41 = vadd.f32 %v1784_v20, %v920_v24  ;;  %v694_v4 = vsub.f32 1.0, %v693_v3 }
 0x433   :  { %v910_v25 = vsel %vm909_vm11, %v1782_v13, %v906_v40  ;;  %1324 = vmatpush.msra.mxu2 %v1289_v46 }
 0x434   :  { %v915_v34 = vsel %vm912_vm12, %v914_v32, %v910_v25  ;;  %v925_v51 = vsel %vm924_vm13, %v1784_v20, %v921_v41  ;;  %v695_v7 = vmul.f32 %v1786_v2, %v694_v4  ;;  %v1800_v4 = vld [vmem:[%s2538_s0 + $0x18] sm:$0xff] }
 0x435   :  { %v1226_v48 = vmul.f32 %v1206_v35, %v915_v34  ;;  %1238 = vrot.lane.b32.xlu1 %v1219_v43, %s1833_s1  ;;  %v930_v54 = vsel %vm927_vm3, %v929_v52, %v925_v51  ;;  %v1710_v51 = vld [vmem:[%s2542_s4] ss:$0 sm:$0xff]  ;;  %s1836_s4 = smov [#allocation2]  }
 0x436   :  { %v1227_v59 = vmul.f32 %v1209_v36, %v930_v54  ;;  %v696_v8 = vadd.f32 %v1786_v2, %v695_v7  ;;  %s1560_s16 = sshll.u32 %s1836_s4, 4  ;;  %s1561_s16 = int_to_ptr.vmem [resolvable:$true] %s1560_s16 }
 0x437   :  { %1268 = vrot.lane.b32.xlu2 %v1226_v48, %s1835_s22 }
 0x438   :  { %v700_v55 = vsel %vm699_vm7, %v1786_v2, %v696_v8 }
 0x439   :  { %v705_v1 = vsel %vm702_vm9, %v704_v12, %v700_v55 }
 0x43a   :  { %v1212_v16 = vmul.f32 %v2219_v53, %v705_v1 }
 0x43d   :  { %1270 = vrot.lane.b32.xlu1 %v1227_v59, %s1835_s22  ;;  %v1798_v59 = vld [vmem:[%s2538_s0 + $0x8] sm:$0xff] }
 0x43f   :  { %1254 = vrot.lane.b32.xlu2 %v1223_v31, %s1834_s21 }
 0x466   :  { %v1233_v13 = vpop.permute.xlu1 %1232 }
 0x467   :  { %v1276_v0 = vsel %vm238_vm14, %v1212_v16, %v1233_v13 }
 0x469   :  { %v1265_v18 = vpop.permute.xlu2 %1264 }
 0x478   :  { %v1251_v39 = vpop.permute.xlu2 %1250 }
 0x479   :  { %v1249_v17 = vpop.permute.xlu0 %1248 }
 0x47a   :  { %v1280_v20 = vsel %vm547_vm15, %v1276_v0, %v1249_v17 }
 0x47b   :  { %v1285_v21 = vsel %vm1284_vm10, %v1280_v20, %v1265_v18 }
 0x47c   :  { %1626 = vmatmul.msk.f32.vlgmr.msra.gmra.mxu2 %vm51_vm0, %v1285_v21 }
 0x480   :  { %v1237_v53 = vpop.permute.xlu2 %1236 }
 0x481   :  { %v1278_v19 = vsel %vm238_vm14, %v2222_v42, %v1237_v53 }
 0x48f   :  { %v1235_v5 = vpop.permute.xlu1 %1234 }
 0x490   :  { %v1277_v26 = vsel %vm238_vm14, %v2270_v44, %v1235_v5 }
 0x491   :  { %v1281_v27 = vsel %vm547_vm15, %v1277_v26, %v1251_v39  ;;  %v1269_v10 = vpop.permute.xlu2 %1268 }
 0x497   :  { %v1267_v47 = vpop.permute.xlu1 %1266 }
 0x498   :  { %v1286_v23 = vsel %vm1284_vm10, %v1281_v27, %v1267_v47 }
 0x499   :  { %1627 = vmatmul.msk.f32.gmra.mxu2 %vm51_vm0, %v1286_v23  ;;  %v1255_v45 = vpop.permute.xlu2 %1254 }
 0x49f   :  { %v1253_v56 = vpop.permute.xlu1 %1252 }
 0x4a0   :  { %v1282_v33 = vsel %vm547_vm15, %v1278_v19, %v1253_v56  ;;  %v1449_v56 = vld [vmem:[%s2547_s9 + $0x18] sm:$0xff] }
 0x4a1   :  { %v1287_v30 = vsel %vm1284_vm10, %v1282_v33, %v1269_v10  ;;  %v1448_v10 = vld [vmem:[%s2547_s9 + $0x10] sm:$0xff]  ;;  %1478 = vmatpush.msra.mxu3 %v1449_v56  ;;  %v1447_v33 = vld [vmem:[%s2547_s9 + $0x8] sm:$0xff] }
 0x4a2   :  { %1628 = vmatmul.msk.f32.gmra.mxu2 %vm51_vm0, %v1287_v30  ;;  %v1446_v30 = vld [vmem:[%s2547_s9] sm:$0xff]  ;;  %v1505_v56 = vld [vmem:[%s2549_s11 + $0x30] sm:$0xff] }
 0x4a3   :  { %1479 = vmatpush.msra.mxu3 %v1448_v10 }
 0x4a4   :  { %v655_v44 = vpop.xlane.xlu0 %654 }
 0x4a5   :  { %1787 = vrcp.f32 %v655_v44  ;;  %v748_v37 = vand.u32 2147483648, %v655_v44  ;;  %v746_v41 = vand.u32 2147483647, %v655_v44  ;;  %vm742_vm11 = vweird.f32 %v655_v44  ;;  %1480 = vmatpush.msra.mxu3 %v1447_v33  ;;  %v1504_v33 = vld [vmem:[%s2549_s11 + $0x28] sm:$0xff] }
 0x4a7   :  { %v1239_v40 = vpop.permute.xlu1 %1238  ;;  %v749_v42 = vor.u32 1.1754944e-38, %v748_v37  ;;  %vm747_vm13 = vcmp.eq.f32.partialorder %v746_v41, 8.507059e+37  ;;  %1481 = vmatpush.msra.mxu3 %v1446_v30 }
 0x4ab   :  { %v1788_v29 = vpop.eup %1787 }
 0x4ac   :  { %v738_v35 = vmul.f32 %v1788_v29, %v655_v44  ;;  %vm743_vm8 = vweird.f32 %v1788_v29 }
 0x4ad   :  { %vm744_vm12 = vmor %vm742_vm11, %vm743_vm8 }
 0x4ae   :  { %v739_v24 = vsub.f32 1.0, %v738_v35 }
 0x4af   :  { %v1271_v38 = vpop.permute.xlu1 %1270 }
 0x4b0   :  { %v740_v32 = vmul.f32 %v1788_v29, %v739_v24 }
 0x4b2   :  { %v741_v6 = vadd.f32 %v1788_v29, %v740_v32 }
 0x4b4   :  { %v745_v15 = vsel %vm744_vm12, %v1788_v29, %v741_v6 }
 0x4b5   :  { %v750_v43 = vsel %vm747_vm13, %v749_v42, %v745_v15  ;;  %v2447_v42 = vld [vmem:[%s2545_s7] ss:$0 sm:$0xff] }
 0x4b6   :  { %v1215_v25 = vmul.f32 %v2305_v58, %v750_v43  ;;  %v1797_v58 = vld [vmem:[%s2538_s0] sm:$0xff] }
 0x4b8   :  { %v1279_v34 = vsel %vm238_vm14, %v1215_v25, %v1239_v40  ;;  %v2452_v25 = vld [vmem:[%s2546_s8] ss:$0 sm:$0xff] }
 0x4b9   :  { %v1283_v48 = vsel %vm547_vm15, %v1279_v34, %v1255_v45 }
 0x4ba   :  { %v1288_v50 = vsel %vm1284_vm10, %v1283_v48, %v1271_v38 }
 0x4bb   :  { %1629 = vmatmul.msk.f32.gmra.mxu2 %vm51_vm0, %v1288_v50 }
 0x4ff   :  { %v1326_v52 = vpop.f32.mrf.mxu2 }
 0x500   :  { %v1327_v28 = vadd.f32 %v1710_v51, %v1326_v52 }
 0x502   :  { %v2382_v22 = vadd.f32 %v1797_v58, %v1327_v28 }
 0x504   :  { %v1344_v54 = vsel %vm51_vm0, %v2382_v22, 0.0 }
 0x505   :  { %1345 = vadd.xlane.f32.xlu2 %v1344_v54 }
 0x51c   :  { %v1329_v57 = vpop.f32.mrf.mxu2 }
 0x51d   :  { %v1330_v36 = vadd.f32 %v1710_v51, %v1329_v57 }
 0x51f   :  { %v2389_v60 = vadd.f32 %v1798_v59, %v1330_v36 }
 0x521   :  { %v1347_v31 = vsel %vm51_vm0, %v2389_v60, 0.0 }
 0x522   :  { %1348 = vadd.xlane.f32.xlu0 %v1347_v31 }
 0x525   :  { %v1332_v49 = vpop.f32.mrf.mxu2 }
 0x526   :  { %v1333_v61 = vadd.f32 %v1710_v51, %v1332_v49 }
 0x528   :  { %v2396_v63 = vadd.f32 %v1799_v62, %v1333_v61 }
 0x52a   :  { %v1350_v46 = vsel %vm51_vm0, %v2396_v63, 0.0 }
 0x52b   :  { %1351 = vadd.xlane.f32.xlu1 %v1350_v46 }
 0x53e   :  { %v1335_v2 = vpop.f32.mrf.mxu2 }
 0x53f   :  { %v1336_v3 = vadd.f32 %v1710_v51, %v1335_v2 }
 0x541   :  { %v2403_v7 = vadd.f32 %v1800_v4, %v1336_v3 }
 0x543   :  { %v1353_v8 = vsel %vm51_vm0, %v2403_v7, 0.0 }
 0x544   :  { %1354 = vadd.xlane.f32.xlu0 %v1353_v8 }
 0x578   :  { %v1346_v9 = vpop.xlane.xlu2 %1345 }
 0x579   :  { %v1356_v11 = vmul.f32 %v1346_v9, %v1924_v14 }
 0x57b   :  { %v1360_v55 = vsub.f32 %v2382_v22, %v1356_v11 }
 0x57d   :  { %v1364_v12 = vmul.f32 %v1360_v55, %v1360_v55 }
 0x57f   :  { %v1368_v1 = vsel %vm51_vm0, %v1364_v12, 0.0 }
 0x580   :  { %1369 = vadd.xlane.f32.xlu0 %v1368_v1  ;;  %v1514_v1 = vld [vmem:[%s2549_s11 + $0x78] sm:$0xff] }
 0x581   :  { %1519 = vmatpush.msra.mxu0 %v1514_v1 }
 0x595   :  { %v1349_v13 = vpop.xlane.xlu0 %1348 }
 0x596   :  { %v1357_v16 = vmul.f32 %v1349_v13, %v1924_v14  ;;  %v1513_v13 = vld [vmem:[%s2549_s11 + $0x70] sm:$0xff] }
 0x597   :  { %1520 = vmatpush.msra.mxu0 %v1513_v13 }
 0x598   :  { %v2412_v0 = vsub.f32 %v2389_v60, %v1357_v16 }
 0x59a   :  { %v1365_v17 = vmul.f32 %v2412_v0, %v2412_v0 }
 0x59c   :  { %v1371_v18 = vsel %vm51_vm0, %v1365_v17, 0.0 }
 0x59d   :  { %1372 = vadd.xlane.f32.xlu0 %v1371_v18 }
 0x59e   :  { %v1352_v20 = vpop.xlane.xlu1 %1351 }
 0x59f   :  { %v1358_v21 = vmul.f32 %v1352_v20, %v1924_v14 }
 0x5a1   :  { %v2419_v39 = vsub.f32 %v2396_v63, %v1358_v21  ;;  %v1511_v21 = vld [vmem:[%s2549_s11 + $0x60] sm:$0xff] }
 0x5a3   :  { %v1366_v5 = vmul.f32 %v2419_v39, %v2419_v39 }
 0x5a5   :  { %v1374_v26 = vsel %vm51_vm0, %v1366_v5, 0.0  ;;  %v1510_v5 = vld [vmem:[%s2549_s11 + $0x58] sm:$0xff] }
 0x5a6   :  { %1375 = vadd.xlane.f32.xlu0 %v1374_v26  ;;  %v1508_v26 = vld [vmem:[%s2549_s11 + $0x48] sm:$0xff] }
 0x5b7   :  { %v1355_v47 = vpop.xlane.xlu0 %1354 }
 0x5b8   :  { %v1359_v27 = vmul.f32 %v1355_v47, %v1924_v14  ;;  %v1507_v47 = vld [vmem:[%s2549_s11 + $0x40] sm:$0xff] }
 0x5ba   :  { %v2426_v53 = vsub.f32 %v2403_v7, %v1359_v27 }
 0x5bc   :  { %v1367_v23 = vmul.f32 %v2426_v53, %v2426_v53 }
 0x5be   :  { %v1377_v19 = vsel %vm51_vm0, %v1367_v23, 0.0  ;;  %v1506_v23 = vld [vmem:[%s2549_s11 + $0x38] sm:$0xff] }
 0x5bf   :  { %1378 = vadd.xlane.f32.xlu2 %v1377_v19 }
 0x5f3   :  { %v1370_v44 = vpop.xlane.xlu0 %1369 }
 0x5f4   :  { %v1380_v29 = vmul.f32 %v1370_v44, %v1924_v14  ;;  %v1503_v44 = vld [vmem:[%s2549_s11 + $0x20] sm:$0xff] }
 0x5f6   :  { %v1384_v35 = vadd.f32 1e-05, %v1380_v29 }
 0x5f8   :  { %1789 = vrsqrt.f32 %v1384_v35  ;;  %vm1394_vm15 = vweird.f32 %v1384_v35 }
 0x5fe   :  { %v1790_v24 = vpop.eup %1789 }
 0x5ff   :  { %v1389_v37 = vmul.f32 %v1790_v24, %v1384_v35  ;;  %vm1395_vm14 = vweird.f32 %v1790_v24  ;;  %v1502_v35 = vld [vmem:[%s2549_s11 + $0x18] sm:$0xff] }
 0x600   :  { %vm1396_vm1 = vmor %vm1394_vm15, %vm1395_vm14 }
 0x601   :  { %v1390_v40 = vmul.f32 %v1790_v24, %v1389_v37 }
 0x603   :  { %v1391_v32 = vmul.f32 0.5, %v1390_v40 }
 0x605   :  { %v1392_v41 = vsub.f32 1.5, %v1391_v32 }
 0x607   :  { %v1393_v6 = vmul.f32 %v1790_v24, %v1392_v41 }
 0x609   :  { %v1397_v15 = vsel %vm1396_vm1, %v1790_v24, %v1393_v6  ;;  %v1501_v6 = vld [vmem:[%s2549_s11 + $0x10] sm:$0xff] }
 0x60a   :  { %v1428_v43 = vmul.f32 %v1397_v15, %v1360_v55  ;;  %v1500_v15 = vld [vmem:[%s2549_s11 + $0x8] sm:$0xff] }
 0x60c   :  { %v1435_v45 = vmul.f32 %v2447_v42, %v1428_v43  ;;  %v1499_v43 = vld [vmem:[%s2549_s11] sm:$0xff] }
 0x60e   :  { %v1442_v34 = vadd.f32 %v2452_v25, %v1435_v45 }
 0x610   :  { %v1373_v38 = vpop.xlane.xlu0 %1372  ;;  %1630 = vmatmul.msk.f32.vlgmr.msra.gmra.mxu3 %vm51_vm0, %v1442_v34 }
 0x611   :  { %v1381_v48 = vmul.f32 %v1373_v38, %v1924_v14 }
 0x613   :  { %v1385_v50 = vadd.f32 1e-05, %v1381_v48 }
 0x615   :  { %1791 = vrsqrt.f32 %v1385_v50  ;;  %vm1404_vm3 = vweird.f32 %v1385_v50 }
 0x619   :  { %v1376_v51 = vpop.xlane.xlu0 %1375 }
 0x61a   :  { %v1382_v52 = vmul.f32 %v1376_v51, %v1924_v14 }
 0x61b   :  { %v1792_v28 = vpop.eup %1791 }
 0x61c   :  { %v1399_v58 = vmul.f32 %v1792_v28, %v1385_v50  ;;  %v1386_v54 = vadd.f32 1e-05, %v1382_v52  ;;  %vm1405_vm2 = vweird.f32 %v1792_v28 }
 0x61d   :  { %vm1406_vm4 = vmor %vm1404_vm3, %vm1405_vm2 }
 0x61e   :  { %v1400_v57 = vmul.f32 %v1792_v28, %v1399_v58  ;;  %1793 = vrsqrt.f32 %v1386_v54  ;;  %vm1414_vm6 = vweird.f32 %v1386_v54 }
 0x620   :  { %v1401_v36 = vmul.f32 0.5, %v1400_v57  ;;  %v1714_v57 = vld [vmem:[%s2550_s12] ss:$0 sm:$0xff] }
 0x622   :  { %v1402_v59 = vsub.f32 1.5, %v1401_v36 }
 0x624   :  { %v1794_v31 = vpop.eup %1793  ;;  %v1403_v49 = vmul.f32 %v1792_v28, %v1402_v59 }
 0x625   :  { %v1409_v61 = vmul.f32 %v1794_v31, %v1386_v54  ;;  %vm1415_vm5 = vweird.f32 %v1794_v31 }
 0x626   :  { %v1407_v62 = vsel %vm1406_vm4, %v1792_v28, %v1403_v49  ;;  %vm1416_vm7 = vmor %vm1414_vm6, %vm1415_vm5 }
 0x627   :  { %v1410_v46 = vmul.f32 %v1794_v31, %v1409_v61  ;;  %v1429_v2 = vmul.f32 %v1407_v62, %v2412_v0  ;;  %v1512_v0 = vld [vmem:[%s2549_s11 + $0x68] sm:$0xff] }
 0x628   :  { %1521 = vmatpush.msra.mxu0 %v1512_v0 }
 0x629   :  { %v1411_v3 = vmul.f32 0.5, %v1410_v46  ;;  %v1436_v4 = vmul.f32 %v2447_v42, %v1429_v2 }
 0x62a   :  { %1522 = vmatpush.msra.mxu0 %v1511_v21 }
 0x62b   :  { %v1412_v8 = vsub.f32 1.5, %v1411_v3  ;;  %v1443_v9 = vadd.f32 %v2452_v25, %v1436_v4 }
 0x62c   :  { %1523 = vmatpush.msra.mxu0 %v1510_v5 }
 0x62d   :  { %v1413_v11 = vmul.f32 %v1794_v31, %v1412_v8  ;;  %1631 = vmatmul.msk.f32.gmra.mxu3 %vm51_vm0, %v1443_v9 }
 0x62f   :  { %v1417_v55 = vsel %vm1416_vm7, %v1794_v31, %v1413_v11 }
 0x630   :  { %v1430_v12 = vmul.f32 %v1417_v55, %v2419_v39 }
 0x632   :  { %v1437_v16 = vmul.f32 %v2447_v42, %v1430_v12  ;;  %v1379_v17 = vpop.xlane.xlu2 %1378 }
 0x633   :  { %v1383_v18 = vmul.f32 %v1379_v17, %v1924_v14  ;;  %v1509_v14 = vld [vmem:[%s2549_s11 + $0x50] sm:$0xff] }
 0x634   :  { %v1444_v20 = vadd.f32 %v2452_v25, %v1437_v16  ;;  %1524 = vmatpush.msra.mxu0 %v1509_v14 }
 0x635   :  { %v1387_v39 = vadd.f32 1e-05, %v1383_v18 }
 0x636   :  { %1632 = vmatmul.msk.f32.gmra.mxu3 %vm51_vm0, %v1444_v20  ;;  %1525 = vmatpush.msra.mxu0 %v1508_v26 }
 0x637   :  { %1795 = vrsqrt.f32 %v1387_v39  ;;  %vm1424_vm10 = vweird.f32 %v1387_v39 }
 0x638   :  { %1526 = vmatpush.msra.mxu0 %v1507_v47 }
 0x63a   :  { %1527 = vmatpush.msra.mxu0 %v1506_v23 }
 0x63c   :  { %1528 = vmatpush.msra.mxu0 %v1505_v56 }
 0x63d   :  { %v1796_v27 = vpop.eup %1795 }
 0x63e   :  { %v1419_v19 = vmul.f32 %v1796_v27, %v1387_v39  ;;  %vm1425_vm9 = vweird.f32 %v1796_v27  ;;  %1529 = vmatpush.msra.mxu0 %v1504_v33 }
 0x63f   :  { %vm1426_vm8 = vmor %vm1424_vm10, %vm1425_vm9 }
 0x640   :  { %v1420_v10 = vmul.f32 %v1796_v27, %v1419_v19  ;;  %1530 = vmatpush.msra.mxu0 %v1503_v44 }
 0x642   :  { %v1421_v30 = vmul.f32 0.5, %v1420_v10  ;;  %1531 = vmatpush.msra.mxu0 %v1502_v35 }
 0x644   :  { %v1422_v29 = vsub.f32 1.5, %v1421_v30  ;;  %1532 = vmatpush.msra.mxu0 %v1501_v6 }
 0x646   :  { %v1423_v24 = vmul.f32 %v1796_v27, %v1422_v29  ;;  %1533 = vmatpush.msra.mxu0 %v1500_v15 }
 0x648   :  { %v1427_v37 = vsel %vm1426_vm8, %v1796_v27, %v1423_v24  ;;  %1534 = vmatpush.msra.mxu0 %v1499_v43 }
 0x649   :  { %v1431_v40 = vmul.f32 %v1427_v37, %v2426_v53  ;;  %v1713_v53 = vld [vmem:[%s2548_s10] ss:$0 sm:$0xff] }
 0x64b   :  { %v1438_v32 = vmul.f32 %v2447_v42, %v1431_v40 }
 0x64d   :  { %v1445_v41 = vadd.f32 %v2452_v25, %v1438_v32 }
 0x64f   :  { %1633 = vmatmul.msk.f32.gmra.mxu3 %vm51_vm0, %v1445_v41 }
 0x693   :  { %v1483_v42 = vpop.f32.mrf.mxu3 }
 0x694   :  { %v1484_v25 = vadd.f32 %v1713_v53, %v1483_v42 }
 0x696   :  { %v1495_v45 = vmax.f32 %v1484_v25, 0.0 }
 0x698   :  { %1535 = vmatmul.f32.vlgmr.msra.gmra.mxu0 %v1495_v45 }
 0x6b0   :  { %v1486_v34 = vpop.f32.mrf.mxu3 }
 0x6b1   :  { %v1487_v38 = vadd.f32 %v1713_v53, %v1486_v34 }
 0x6b3   :  { %v1496_v48 = vmax.f32 %v1487_v38, 0.0 }
 0x6b5   :  { %1538 = vmatmul.f32.gmra.mxu0 %v1496_v48 }
 0x6b9   :  { %v1489_v50 = vpop.f32.mrf.mxu3 }
 0x6ba   :  { %v1490_v51 = vadd.f32 %v1713_v53, %v1489_v50 }
 0x6bc   :  { %v1497_v52 = vmax.f32 %v1490_v51, 0.0 }
 0x6be   :  { %1541 = vmatmul.f32.gmra.mxu0 %v1497_v52 }
 0x6d2   :  { %v1492_v28 = vpop.f32.mrf.mxu3 }
 0x6d3   :  { %v1493_v58 = vadd.f32 %v1713_v53, %v1492_v28 }
 0x6d5   :  { %v1498_v54 = vmax.f32 %v1493_v58, 0.0 }
 0x6d7   :  { %1544 = vmatmul.f32.gmra.mxu0 %v1498_v54 }
 0x715   :  { %v1536_v36 = vpop.f32.mrf.mxu0 }
 0x716   :  { %v1537_v59 = vadd.f32 %v1714_v57, %v1536_v36 }
 0x718   :  { %v1548_v31 = vadd.f32 %v1537_v59, %v2382_v22 }
 0x71a   :  { %1552 = vst.msk [vmem:[#allocation2] sm:$0xff] %vm51_vm0, %v1548_v31 }
 0x732   :  { %v1539_v49 = vpop.f32.mrf.mxu0 }
 0x733   :  { %v1540_v61 = vadd.f32 %v1714_v57, %v1539_v49 }
 0x735   :  { %v1549_v62 = vadd.f32 %v1540_v61, %v2389_v60 }
 0x737   :  { %1553 = vst.msk [vmem:[#allocation2 + $0x8] sm:$0xff] %vm51_vm0, %v1549_v62 }
 0x73b   :  { %v1542_v46 = vpop.f32.mrf.mxu0 }
 0x73c   :  { %v1543_v2 = vadd.f32 %v1714_v57, %v1542_v46 }
 0x73e   :  { %v1550_v3 = vadd.f32 %v1543_v2, %v2396_v63 }
 0x740   :  { %1554 = vst.msk [vmem:[#allocation2 + $0x10] sm:$0xff] %vm51_vm0, %v1550_v3 }
 0x754   :  { %v1545_v4 = vpop.f32.mrf.mxu0 }
 0x755   :  { %v1546_v22 = vadd.f32 %v1714_v57, %v1545_v4 }
 0x757   :  { %v1551_v8 = vadd.f32 %v1546_v22, %v2403_v7 }
 0x759   :  { %1555 = vst.msk [vmem:[#allocation2 + $0x18] sm:$0xff] %vm51_vm0, %v1551_v8 }
 0x75a   :  { %1568 = dma.vmem_to_hbm [thread:$0]  %s1561_s16, 512, %s1563_s15, [#allocation3], %s1837_s17, %s1837_s17, %s1833_s1  }
 0x75b   :  { %1825 = dma.done.wait [#allocation3], 512  }
 0x75c   :  { %1826 = vsyncadd [#allocation3], 4294966784 }
 0x75d   :  { %1573 = vsyncpa [#allocation3], 1 }

// kernel: tpu_custom_call.1
= control target key start
LH: loop header
LB: loop body
LE: loop exit
PB: predicated region body
PF: predicated region fallthrough
CT: control target
= control target key end

     0   :  { %vm51_vm0 = vcmask 261120   ;;  %s2538_s0 = inlined_call_operand.vmem [shape: f32[2,16,32], index: 0, kind: input, shape index: {}]   ;;  %s2539_s1 = inlined_call_operand.vmem [shape: bf16[4,16,16], index: 1, kind: input, shape index: {}]   ;;  %s2540_s2 = inlined_call_operand.vmem [shape: f32[32,96], index: 2, kind: input, shape index: {}]   ;;  %s2541_s3 = inlined_call_operand.vmem [shape: f32[32,32], index: 3, kind: input, shape index: {}]   ;;  %s2542_s4 = inlined_call_operand.vmem [shape: f32[1,32], index: 4, kind: input, shape index: {}]   ;;  %s2543_s5 = inlined_call_operand.vmem [shape: f32[1,32], index: 5, kind: input, shape index: {}]   ;;  %s2544_s6 = inlined_call_operand.vmem [shape: f32[1,32], index: 6, kind: input, shape index: {}]   ;;  %s2545_s7 = inlined_call_operand.vmem [shape: f32[1,32], index: 7, kind: input, shape index: {}]   ;;  %s2546_s8 = inlined_call_operand.vmem [shape: f32[1,32], index: 8, kind: input, shape index: {}]   ;;  %s2547_s9 = inlined_call_operand.vmem [shape: f32[32,128], index: 9, kind: input, shape index: {}]   ;;  %s2548_s10 = inlined_call_operand.vmem [shape: f32[1,128], index: 10, kind: input, shape index: {}]   ;;  %s2549_s11 = inlined_call_operand.vmem [shape: f32[128,32], index: 11, kind: input, shape index: {}]   ;;  %s2550_s12 = inlined_call_operand.vmem [shape: f32[1,32], index: 12, kind: input, shape index: {}]   ;;  %s2551_s13 = inlined_call_operand.hbm [shape: f32[2,16,32], index: 13, kind: output, shape index: {}]  }
   0x1   :  { %v47_v0 = vld [vmem:[%s2538_s0 + $0x10] sm:$0xff]  ;;  %v46_v1 = vld [vmem:[%s2538_s0 + $0x8] sm:$0xff]  ;;  %v48_v4 = vld [vmem:[%s2538_s0 + $0x18] sm:$0xff] }
   0x2   :  { %v58_v2 = vsel %vm51_vm0, %v47_v0, 0.0  ;;  %v55_v3 = vsel %vm51_vm0, %v46_v1, 0.0  ;;  %v45_v5 = vld [vmem:[%s2538_s0] sm:$0xff] }
   0x3   :  { %59 = vadd.xlane.f32.xlu1 %v58_v2  ;;  %56 = vadd.xlane.f32.xlu0 %v55_v3 }
   0x4   :  { %18 = vsyncpa [#allocation3], 0  ;;  %v61_v6 = vsel %vm51_vm0, %v48_v4, 0.0  ;;  %v52_v7 = vsel %vm51_vm0, %v45_v5, 0.0  ;;  %v1827_v8 = vmov 32.0   ;;  %v164_v35 = vld [vmem:[%s2540_s2 + $0x18] sm:$0xff] }
   0x5   :  { %1715 = vrcp.f32 %v1827_v8  ;;  %1653 = vmatpush.msra.mxu1 %v164_v35  ;;  %189 = vmatpush.msra.mxu0 %v164_v35  ;;  %v163_v36 = vld [vmem:[%s2540_s2 + $0x10] sm:$0xff]  ;;  %v162_v37 = vld [vmem:[%s2540_s2 + $0x8] sm:$0xff]  ;;  %v161_v38 = vld [vmem:[%s2540_s2] sm:$0xff]  ;;  %s1830_s27 = smov 56   ;;  %s1831_s28 = smov 120   ;;  %vm238_vm14 = vcmask 64512  }
   0x6   :  { %s1832_s29 = smov 112   ;;  %vm547_vm15 = vcmask 130048   ;;  %s1834_s21 = smov 16  }
   0x7   :  { %1654 = vmatpush.msra.mxu1 %v163_v36  ;;  %190 = vmatpush.msra.mxu0 %v163_v36  ;;  %s1835_s22 = smov 24   ;;  %s1562_s15 = sshll.u32 %s2551_s13, 4  ;;  %s1563_s15 = int_to_ptr.hbm [resolvable:$true] %s1562_s15 }
   0x8   :  { %s1837_s17 = smov 128  }
   0x9   :  { %1655 = vmatpush.msra.mxu1 %v162_v37  ;;  %191 = vmatpush.msra.mxu0 %v162_v37 }
   0xb   :  { %62 = vadd.xlane.f32.xlu1 %v61_v6  ;;  %53 = vadd.xlane.f32.xlu0 %v52_v7  ;;  %v1716_v9 = vpop.eup %1715 }
   0xc   :  { %v65_v10 = vmul.f32 32.0, %v1716_v9  ;;  %vm69_vm1 = vweird.f32 %v1716_v9  ;;  %1656 = vmatpush.msra.mxu1 %v161_v38  ;;  %192 = vmatpush.msra.mxu0 %v161_v38 }
   0xe   :  { %v66_v11 = vsub.f32 1.0, %v65_v10 }
  0x10   :  { %v67_v12 = vmul.f32 %v1716_v9, %v66_v11 }
  0x12   :  { %v68_v13 = vadd.f32 %v1716_v9, %v67_v12 }
  0x14   :  { %v1924_v14 = vsel %vm69_vm1, %v1716_v9, %v68_v13  ;;  %v1709_v9 = vld [vmem:[%s2544_s6] ss:$0 sm:$0xff]  ;;  %s1829_s6 = smov 104  }
  0x76   :  { %v60_v15 = vpop.xlane.xlu1 %59  ;;  %v57_v16 = vpop.xlane.xlu0 %56 }
  0x77   :  { %v73_v17 = vmul.f32 %v1924_v14, %v60_v15  ;;  %v72_v18 = vmul.f32 %v1924_v14, %v57_v16 }
  0x79   :  { %v1928_v19 = vsub.f32 %v47_v0, %v73_v17  ;;  %v1930_v20 = vsub.f32 %v46_v1, %v72_v18 }
  0x7b   :  { %v80_v21 = vmul.f32 %v1930_v20, %v1930_v20  ;;  %v81_v22 = vmul.f32 %v1928_v19, %v1928_v19 }
  0x7d   :  { %v86_v23 = vsel %vm51_vm0, %v80_v21, 0.0  ;;  %v89_v24 = vsel %vm51_vm0, %v81_v22, 0.0 }
  0x7e   :  { %v63_v25 = vpop.xlane.xlu1 %62  ;;  %87 = vadd.xlane.f32.xlu2 %v86_v23  ;;  %90 = vadd.xlane.f32.xlu0 %v89_v24  ;;  %v54_v26 = vpop.xlane.xlu0 %53 }
  0x7f   :  { %v74_v27 = vmul.f32 %v1924_v14, %v63_v25  ;;  %v71_v28 = vmul.f32 %v1924_v14, %v54_v26 }
  0x81   :  { %v1940_v29 = vsub.f32 %v48_v4, %v74_v27  ;;  %v1942_v30 = vsub.f32 %v45_v5, %v71_v28  ;;  %v1708_v4 = vld [vmem:[%s2543_s5] ss:$0 sm:$0xff]  ;;  %s1828_s5 = smov 80  }
  0x83   :  { %v82_v31 = vmul.f32 %v1940_v29, %v1940_v29  ;;  %v79_v32 = vmul.f32 %v1942_v30, %v1942_v30 }
  0x85   :  { %v92_v33 = vsel %vm51_vm0, %v82_v31, 0.0  ;;  %v83_v34 = vsel %vm51_vm0, %v79_v32, 0.0 }
  0x86   :  { %93 = vadd.xlane.f32.xlu1 %v92_v33  ;;  %84 = vadd.xlane.f32.xlu2 %v83_v34 }
  0xf1   :  { %v88_v39 = vpop.xlane.xlu2 %87  ;;  %v91_v40 = vpop.xlane.xlu0 %90 }
  0xf2   :  { %v96_v41 = vmul.f32 %v88_v39, %v1924_v14  ;;  %v97_v42 = vmul.f32 %v91_v40, %v1924_v14 }
  0xf4   :  { %v100_v43 = vadd.f32 1e-05, %v96_v41  ;;  %v101_v44 = vadd.f32 1e-05, %v97_v42 }
  0xf6   :  { %1717 = vrsqrt.f32 %v100_v43  ;;  %vm129_vm3 = vweird.f32 %v101_v44  ;;  %vm119_vm5 = vweird.f32 %v100_v43 }
  0xf7   :  { %1719 = vrsqrt.f32 %v101_v44 }
  0xf9   :  { %v94_v45 = vpop.xlane.xlu1 %93  ;;  %v85_v46 = vpop.xlane.xlu2 %84 }
  0xfa   :  { %v98_v47 = vmul.f32 %v94_v45, %v1924_v14  ;;  %v95_v48 = vmul.f32 %v85_v46, %v1924_v14 }
  0xfc   :  { %v1718_v49 = vpop.eup %1717  ;;  %v102_v50 = vadd.f32 1e-05, %v98_v47  ;;  %v99_v51 = vadd.f32 1e-05, %v95_v48 }
  0xfd   :  { %v1720_v52 = vpop.eup %1719  ;;  %v114_v53 = vmul.f32 %v1718_v49, %v100_v43  ;;  %vm120_vm2 = vweird.f32 %v1718_v49 }
  0xfe   :  { %v124_v54 = vmul.f32 %v1720_v52, %v101_v44  ;;  %1721 = vrsqrt.f32 %v102_v50  ;;  %vm130_vm4 = vweird.f32 %v1720_v52  ;;  %vm121_vm6 = vmor %vm119_vm5, %vm120_vm2  ;;  %vm139_vm8 = vweird.f32 %v102_v50 }
  0xff   :  { %v115_v55 = vmul.f32 %v1718_v49, %v114_v53  ;;  %1723 = vrsqrt.f32 %v99_v51  ;;  %vm1966_vm7 = vmor %vm129_vm3, %vm130_vm4  ;;  %vm109_vm10 = vweird.f32 %v99_v51 }
 0x100   :  { %v125_v56 = vmul.f32 %v1720_v52, %v124_v54 }
 0x101   :  { %v116_v57 = vmul.f32 0.5, %v115_v55 }
 0x102   :  { %v126_v58 = vmul.f32 0.5, %v125_v56 }
 0x103   :  { %v117_v59 = vsub.f32 1.5, %v116_v57 }
 0x104   :  { %v1722_v60 = vpop.eup %1721  ;;  %v127_v61 = vsub.f32 1.5, %v126_v58 }
 0x105   :  { %v1724_v62 = vpop.eup %1723  ;;  %v118_v63 = vmul.f32 %v1718_v49, %v117_v59  ;;  %v134_v0 = vmul.f32 %v1722_v60, %v102_v50  ;;  %vm140_vm9 = vweird.f32 %v1722_v60 }
 0x106   :  { %v128_v1 = vmul.f32 %v1720_v52, %v127_v61  ;;  %v104_v3 = vmul.f32 %v1724_v62, %v99_v51  ;;  %vm110_vm11 = vweird.f32 %v1724_v62  ;;  %vm141_vm12 = vmor %vm139_vm8, %vm140_vm9 }
 0x107   :  { %v122_v5 = vsel %vm121_vm6, %v1718_v49, %v118_v63  ;;  %v135_v6 = vmul.f32 %v1722_v60, %v134_v0  ;;  %vm111_vm13 = vmor %vm109_vm10, %vm110_vm11 }
 0x108   :  { %v105_v7 = vmul.f32 %v1724_v62, %v104_v3  ;;  %v144_v8 = vmul.f32 %v122_v5, %v1930_v20  ;;  %v132_v10 = vsel %vm1966_vm7, %v1720_v52, %v128_v1 }
 0x109   :  { %v136_v11 = vmul.f32 0.5, %v135_v6  ;;  %v145_v18 = vmul.f32 %v132_v10, %v1928_v19 }
 0x10a   :  { %v106_v12 = vmul.f32 0.5, %v105_v7  ;;  %v151_v13 = vmul.f32 %v1708_v4, %v144_v8 }
 0x10b   :  { %v137_v15 = vsub.f32 1.5, %v136_v11  ;;  %v152_v23 = vmul.f32 %v1708_v4, %v145_v18  ;;  %v1635_v18 = vld [vmem:[%s2539_s1] sm:$0xff]  }
 0x10c   :  { %v107_v16 = vsub.f32 1.5, %v106_v12  ;;  %v158_v17 = vadd.f32 %v1709_v9, %v151_v13 }
 0x10d   :  { %v138_v20 = vmul.f32 %v1722_v60, %v137_v15  ;;  %v159_v27 = vadd.f32 %v1709_v9, %v152_v23 }
 0x10e   :  { %v108_v21 = vmul.f32 %v1724_v62, %v107_v16  ;;  %1575 = vmatmul.msk.f32.vlgmr.msra.gmra.mxu1 %vm51_vm0, %v158_v17 }
 0x10f   :  { %v142_v24 = vsel %vm141_vm12, %v1722_v60, %v138_v20  ;;  %v1636_v20 = vunpack.c.l.bf16 %v1635_v18 }
 0x110   :  { %v112_v22 = vsel %vm111_vm13, %v1724_v62, %v108_v21  ;;  %v146_v28 = vmul.f32 %v142_v24, %v1940_v29  ;;  %v1637_v21 = vunpack.c.h.bf16 %v1635_v18 }
 0x111   :  { %v143_v25 = vmul.f32 %v112_v22, %v1942_v30 }
 0x112   :  { %v153_v19 = vmul.f32 %v1708_v4, %v146_v28 }
 0x113   :  { %v150_v26 = vmul.f32 %v1708_v4, %v143_v25 }
 0x114   :  { %v160_v32 = vadd.f32 %v1709_v9, %v153_v19 }
 0x115   :  { %v157_v31 = vadd.f32 %v1709_v9, %v150_v26 }
 0x116   :  { %1576 = vmatmul.msk.f32.gmra.mxu1 %vm51_vm0, %v159_v27 }
 0x117   :  { %1574 = vmatmul.msk.f32.vlgmr.msra.gmra.mxu0 %vm51_vm0, %v157_v31 }
 0x11e   :  { %1577 = vmatmul.msk.f32.gmra.mxu1 %vm51_vm0, %v160_v32 }
 0x18b   :  { %v1986_v33 = vpop.f32.mrf.mxu1 }
 0x18c   :  { %220 = vrot.lane.b32.xlu1 %v1986_v33, %s1828_s5  ;;  %212 = vrot.lane.b32.xlu2 %v1986_v33, %s1829_s6 }
 0x193   :  { %v200_v30 = vpop.f32.mrf.mxu1 }
 0x194   :  { %v194_v34 = vpop.f32.mrf.mxu0  ;;  %222 = vrot.lane.b32.xlu1 %v200_v30, %s1828_s5 }
 0x195   :  { %218 = vrot.lane.b32.xlu2 %v194_v34, %s1828_s5  ;;  %210 = vrot.lane.b32.xlu0 %v194_v34, %s1829_s6  ;;  %v1668_v46 = vpack.i.bf16 %v194_v34, %v1986_v33 }
 0x19b   :  { %v203_v29 = vpop.f32.mrf.mxu1 }
 0x19c   :  { %224 = vrot.lane.b32.xlu1 %v203_v29, %s1828_s5 }
 0x19d   :  { %228 = vrot.lane.b32.xlu2 %v1986_v33, %s1830_s27  ;;  %214 = vrot.lane.b32.xlu0 %v200_v30, %s1829_s6 }
 0x1a4   :  { %232 = vrot.lane.b32.xlu1 %v203_v29, %s1830_s27 }
 0x1a5   :  { %226 = vrot.lane.b32.xlu2 %v194_v34, %s1830_s27  ;;  %216 = vrot.lane.b32.xlu0 %v203_v29, %s1829_s6 }
 0x1ac   :  { %230 = vrot.lane.b32.xlu1 %v200_v30, %s1830_s27 }
 0x1ad   :  { %270 = vrot.lane.b32.xlu2 %v200_v30, %s1831_s28  ;;  %272 = vrot.lane.b32.xlu0 %v203_v29, %s1831_s28 }
 0x1b5   :  { %236 = vrot.lane.b32.xlu0 %v1986_v33, %s1831_s28 }
 0x1bd   :  { %234 = vrot.lane.b32.xlu0 %v194_v34, %s1831_s28 }
 0x1e6   :  { %v213_v35 = vpop.permute.xlu2 %212 }
 0x1e7   :  { %307 = vrot.lane.b32.xlu2 %v213_v35, %s1831_s28 }
 0x1ef   :  { %v219_v36 = vpop.permute.xlu2 %218 }
 0x1f0   :  { %375 = vrot.lane.b32.xlu0 %v219_v36, %s1831_s28  ;;  %v1683_v53 = vpack.i.bf16 %v219_v36, %v200_v30 }
 0x1f7   :  { %v2002_v38 = vpop.permute.xlu2 %228 }
 0x1fe   :  { %v1998_v37 = vpop.permute.xlu1 %220 }
 0x1ff   :  { %377 = vrot.lane.b32.xlu1 %v1998_v37, %s1831_s28  ;;  %v227_v41 = vpop.permute.xlu2 %226  ;;  %v1678_v52 = vpack.i.bf16 %v1998_v37, %v203_v29 }
 0x206   :  { %v2004_v39 = vpop.permute.xlu1 %222 }
 0x207   :  { %v211_v40 = vpop.permute.xlu0 %210  ;;  %447 = vrot.lane.b32.xlu1 %v2002_v38, %s1831_s28  ;;  %v271_v49 = vpop.permute.xlu2 %270 }
 0x208   :  { %305 = vrot.lane.b32.xlu2 %v211_v40, %s1831_s28  ;;  %v1673_v50 = vpack.i.bf16 %v211_v40, %v213_v35 }
 0x20e   :  { %v2009_v42 = vpop.permute.xlu1 %224 }
 0x20f   :  { %v215_v43 = vpop.permute.xlu0 %214  ;;  %445 = vrot.lane.b32.xlu1 %v227_v41, %s1831_s28  ;;  %412 = vrot.lane.b32.xlu0 %v2009_v42, %s1831_s28 }
 0x210   :  { %v1693_v55 = vpack.i.bf16 %v227_v41, %v215_v43 }
 0x216   :  { %v2014_v44 = vpop.permute.xlu1 %232 }
 0x217   :  { %v2016_v45 = vpop.permute.xlu0 %216  ;;  %410 = vrot.lane.b32.xlu0 %v2004_v39, %s1831_s28 }
 0x218   :  { %342 = vrot.lane.b32.xlu2 %v2016_v45, %s1831_s28 }
 0x21e   :  { %v2023_v47 = vpop.permute.xlu1 %230 }
 0x21f   :  { %v273_v48 = vpop.permute.xlu0 %272  ;;  %480 = vrot.lane.b32.xlu1 %v2023_v47, %s1831_s28  ;;  %1669 = vrot.lane.b32.xlu0 %v1668_v46, %s1832_s29 }
 0x220   :  { %340 = vrot.lane.b32.xlu2 %v215_v43, %s1831_s28  ;;  %1582 = vmatpush.xpose.msk.msra.mxu2 %vm238_vm14, %v273_v48 }
 0x224   :  { %1583 = vmatpush.xpose.msk.msra.mxu2 %vm238_vm14, %v271_v49 }
 0x227   :  { %1584 = vmatmul.msk.f32.vlgmr.msra.gmra.mxu2 %vm238_vm14, %v200_v30  ;;  %v237_v51 = vpop.permute.xlu0 %236  ;;  %1674 = vrot.lane.b32.xlu1 %v1673_v50, %s1832_s29  ;;  %v1688_v30 = vpack.i.bf16 %v2002_v38, %v2016_v45 }
 0x228   :  { %482 = vrot.lane.b32.xlu2 %v2014_v44, %s1831_s28  ;;  %1578 = vmatpush.xpose.msk.msrb.mxu1 %vm238_vm14, %v237_v51 }
 0x22f   :  { %1585 = vmatmul.msk.f32.gmra.mxu2 %vm238_vm14, %v203_v29  ;;  %v235_v54 = vpop.permute.xlu0 %234  ;;  %1679 = vrot.lane.b32.xlu1 %v1678_v52, %s1832_s29 }
 0x230   :  { %1684 = vrot.lane.b32.xlu2 %v1683_v53, %s1832_s29  ;;  %1579 = vmatpush.xpose.msk.msrb.mxu1 %vm238_vm14, %v235_v54 }
 0x233   :  { %1580 = vmatmul.msk.f32.vlgmr.msrb.gmra.mxu1 %vm238_vm14, %v194_v34  ;;  %v1650_v34 = vld [vmem:[%s2539_s1 + $0x8] sm:$0xff]  }
 0x234   :  { %v1640_v29 = vunpack.c.l.bf16 %v1650_v34  ;;  %v1641_v48 = vunpack.c.h.bf16 %v1650_v34 }
 0x237   :  { %1694 = vrot.lane.b32.xlu1 %v1693_v55, %s1832_s29 }
 0x23b   :  { %1581 = vmatmul.msk.f32.gmra.mxu1 %vm238_vm14, %v1986_v33 }
 0x241   :  { %v308_v56 = vpop.permute.xlu2 %307 }
 0x242   :  { %1586 = vmatpush.xpose.msk.msra.mxu3 %vm238_vm14, %v308_v56 }
 0x262   :  { %v306_v57 = vpop.permute.xlu2 %305  ;;  %v376_v60 = vpop.permute.xlu0 %375 }
 0x263   :  { %1587 = vmatpush.xpose.msk.msra.mxu3 %vm238_vm14, %v306_v57 }
 0x266   :  { %1588 = vmatmul.msk.f32.vlgmr.msra.gmra.mxu3 %vm238_vm14, %v211_v40  ;;  %v1651_v40 = vld [vmem:[%s2539_s1 + $0x10] sm:$0xff]  }
 0x26e   :  { %1589 = vmatmul.msk.f32.gmra.mxu3 %vm238_vm14, %v213_v35 }
 0x271   :  { %v378_v58 = vpop.permute.xlu1 %377 }
 0x272   :  { %v343_v59 = vpop.permute.xlu2 %342  ;;  %1594 = vmatpush.xpose.msk.msrb.mxu2 %vm238_vm14, %v378_v58 }
 0x273   :  { %1590 = vmatpush.xpose.msk.msra.mxu1 %vm238_vm14, %v343_v59  ;;  %v1645_v59 = vunpack.c.h.bf16 %v1651_v40 }
 0x276   :  { %1595 = vmatpush.xpose.msk.msrb.mxu2 %vm238_vm14, %v376_v60 }
 0x279   :  { %v448_v61 = vpop.permute.xlu1 %447  ;;  %1596 = vmatmul.msk.f32.vlgmr.msrb.gmra.mxu2 %vm238_vm14, %v219_v36 }
 0x27a   :  { %v341_v62 = vpop.permute.xlu2 %340  ;;  %1602 = vmatpush.xpose.msk.msrb.mxu0 %vm238_vm14, %v448_v61 }
 0x27b   :  { %1591 = vmatpush.xpose.msk.msra.mxu1 %vm238_vm14, %v341_v62 }
 0x27e   :  { %1592 = vmatmul.msk.f32.vlgmr.msra.gmra.mxu1 %vm238_vm14, %v215_v43 }
 0x281   :  { %v446_v63 = vpop.permute.xlu1 %445  ;;  %1597 = vmatmul.msk.f32.gmra.mxu2 %vm238_vm14, %v1998_v37  ;;  %v413_v0 = vpop.permute.xlu0 %412 }
 0x282   :  { %v483_v1 = vpop.permute.xlu2 %482  ;;  %1598 = vmatpush.xpose.msk.msrb.mxu3 %vm238_vm14, %v413_v0  ;;  %1603 = vmatpush.xpose.msk.msrb.mxu0 %vm238_vm14, %v446_v63 }
 0x283   :  { %1606 = vmatpush.xpose.msk.msrb.mxu1 %vm238_vm14, %v483_v1 }
 0x285   :  { %1604 = vmatmul.msk.f32.vlgmr.msrb.gmra.mxu0 %vm238_vm14, %v227_v41  ;;  %v1644_v41 = vunpack.c.l.bf16 %v1651_v40 }
 0x286   :  { %1593 = vmatmul.msk.f32.gmra.mxu1 %vm238_vm14, %v2016_v45  ;;  %v1652_v45 = vld [vmem:[%s2539_s1 + $0x18] sm:$0xff]   ;;  %s1833_s1 = smov 8  }
 0x287   :  { %v1648_v50 = vunpack.c.l.bf16 %v1652_v45  ;;  %v1649_v61 = vunpack.c.h.bf16 %v1652_v45 }
 0x289   :  { %v411_v2 = vpop.permute.xlu0 %410 }
 0x28a   :  { %1599 = vmatpush.xpose.msk.msrb.mxu3 %vm238_vm14, %v411_v2  ;;  %v1685_v10 = vpop.permute.xlu2 %1684 }
 0x28b   :  { %v1687_v15 = vunpack.i.h.bf16 %v1685_v10  ;;  %v1686_v16 = vunpack.i.l.bf16 %v1685_v10 }
 0x28d   :  { %1600 = vmatmul.msk.f32.vlgmr.msrb.gmra.mxu3 %vm238_vm14, %v2004_v39  ;;  %1605 = vmatmul.msk.f32.gmra.mxu0 %vm238_vm14, %v2002_v38 }
 0x291   :  { %v481_v3 = vpop.permute.xlu1 %480  ;;  %v1670_v4 = vpop.permute.xlu0 %1669 }
 0x292   :  { %v1671_v5 = vunpack.i.l.bf16 %v1670_v4  ;;  %1607 = vmatpush.xpose.msk.msrb.mxu1 %vm238_vm14, %v481_v3  ;;  %v1672_v6 = vunpack.i.h.bf16 %v1670_v4 }
 0x294   :  { %958 = vmatpush.msra.mxu2 %v1671_v5 }
 0x295   :  { %1601 = vmatmul.msk.f32.gmra.mxu3 %vm238_vm14, %v2009_v42  ;;  %1608 = vmatmul.msk.f32.vlgmr.msrb.gmra.mxu1 %vm238_vm14, %v2023_v47 }
 0x296   :  { %959 = vmatpush.msra.mxu2 %v1672_v6 }
 0x299   :  { %v1675_v7 = vpop.permute.xlu1 %1674 }
 0x29a   :  { %v1676_v8 = vunpack.i.l.bf16 %v1675_v7  ;;  %v1677_v9 = vunpack.i.h.bf16 %v1675_v7 }
 0x29c   :  { %1028 = vmatpush.msra.mxu0 %v1676_v8 }
 0x29d   :  { %1609 = vmatmul.msk.f32.gmra.mxu1 %vm238_vm14, %v2014_v44 }
 0x29e   :  { %1029 = vmatpush.msra.mxu0 %v1677_v9 }
 0x2a1   :  { %v1680_v11 = vpop.permute.xlu1 %1679 }
 0x2a2   :  { %v1682_v12 = vunpack.i.h.bf16 %v1680_v11  ;;  %v1681_v13 = vunpack.i.l.bf16 %v1680_v11  ;;  %v1698_v11 = vpack.i.bf16 %v2004_v39, %v2009_v42 }
 0x2a4   :  { %993 = vmatpush.msra.mxu3 %v1681_v13  ;;  %1098 = vmatpush.msrb.mxu2 %v1682_v12 }
 0x2a6   :  { %994 = vmatpush.msra.mxu3 %v1686_v16  ;;  %1099 = vmatpush.msrb.mxu2 %v1687_v15  ;;  %v1703_v16 = vpack.i.bf16 %v2023_v47, %v2014_v44 }
 0x2aa   :  { %v299_v17 = vpop.f32.mrf.mxu2 }
 0x2ab   :  { %v2091_v32 = vadd.f32 %v1636_v20, %v299_v17  ;;  %v1695_v17 = vpop.permute.xlu1 %1694 }
 0x2ac   :  { %v1696_v40 = vunpack.i.l.bf16 %v1695_v17 }
 0x2ad   :  { %v554_v33 = vsel %vm547_vm15, %v2091_v32, -inf }
 0x2b0   :  { %v264_v22 = vpop.f32.mrf.mxu1 }
 0x2b1   :  { %v2079_v23 = vadd.f32 %v1636_v20, %v264_v22 }
 0x2b2   :  { %v302_v24 = vpop.f32.mrf.mxu2 }
 0x2b3   :  { %v2081_v25 = vadd.f32 %v1637_v21, %v302_v24  ;;  %v548_v26 = vsel %vm547_vm15, %v2079_v23, -inf }
 0x2b4   :  { %549 = vmax.xlane.f32.xlu0 %v548_v26 }
 0x2b5   :  { %v557_v27 = vsel %vm547_vm15, %v2081_v25, -inf }
 0x2b6   :  { %558 = vmax.xlane.f32.xlu2 %v557_v27 }
 0x2b8   :  { %v267_v28 = vpop.f32.mrf.mxu1 }
 0x2b9   :  { %v2087_v31 = vadd.f32 %v1637_v21, %v267_v28 }
 0x2bb   :  { %v551_v19 = vsel %vm547_vm15, %v2087_v31, -inf }
 0x2bc   :  { %552 = vmax.xlane.f32.xlu1 %v551_v19 }
 0x2c4   :  { %555 = vmax.xlane.f32.xlu1 %v554_v33 }
 0x2c8   :  { %1689 = vrot.lane.b32.xlu0 %v1688_v30, %s1832_s29 }
 0x2e9   :  { %v334_v35 = vpop.f32.mrf.mxu3 }
 0x2ea   :  { %v2101_v36 = vadd.f32 %v1640_v29, %v334_v35 }
 0x2ec   :  { %v560_v37 = vsel %vm547_vm15, %v2101_v36, -inf }
 0x2ed   :  { %561 = vmax.xlane.f32.xlu2 %v560_v37  ;;  %v1697_v37 = vunpack.i.h.bf16 %v1695_v17 }
 0x2f1   :  { %v337_v51 = vpop.f32.mrf.mxu3 }
 0x2f2   :  { %v2115_v53 = vadd.f32 %v1641_v48, %v337_v51 }
 0x2f4   :  { %v563_v60 = vsel %vm547_vm15, %v2115_v53, -inf }
 0x2fb   :  { %v369_v38 = vpop.f32.mrf.mxu1 }
 0x2fc   :  { %v404_v43 = vpop.f32.mrf.mxu2  ;;  %v2135_v5 = vadd.f32 %v1640_v29, %v369_v38 }
 0x2fd   :  { %v2111_v46 = vadd.f32 %v1644_v41, %v404_v43 }
 0x2fe   :  { %v566_v9 = vsel %vm547_vm15, %v2135_v5, -inf }
 0x2ff   :  { %v572_v49 = vsel %vm547_vm15, %v2111_v46, -inf }
 0x300   :  { %573 = vmax.xlane.f32.xlu2 %v572_v49 }
 0x302   :  { %v474_v52 = vpop.f32.mrf.mxu0 }
 0x303   :  { %v372_v54 = vpop.f32.mrf.mxu1  ;;  %v2117_v55 = vadd.f32 %v1648_v50, %v474_v52 }
 0x304   :  { %v2119_v56 = vadd.f32 %v1641_v48, %v372_v54  ;;  %v407_v62 = vpop.f32.mrf.mxu2 }
 0x305   :  { %v584_v57 = vsel %vm547_vm15, %v2117_v55, -inf  ;;  %v2127_v0 = vadd.f32 %v1645_v59, %v407_v62 }
 0x306   :  { %585 = vmax.xlane.f32.xlu0 %v584_v57  ;;  %v569_v58 = vsel %vm547_vm15, %v2119_v56, -inf }
 0x307   :  { %570 = vmax.xlane.f32.xlu1 %v569_v58  ;;  %v575_v3 = vsel %vm547_vm15, %v2127_v0, -inf }
 0x308   :  { %564 = vmax.xlane.f32.xlu2 %v563_v60 }
 0x30a   :  { %v477_v63 = vpop.f32.mrf.mxu0 }
 0x30b   :  { %v2129_v1 = vadd.f32 %v1649_v61, %v477_v63 }
 0x30d   :  { %v587_v2 = vsel %vm547_vm15, %v2129_v1, -inf }
 0x30e   :  { %588 = vmax.xlane.f32.xlu0 %v587_v2 }
 0x310   :  { %576 = vmax.xlane.f32.xlu2 %v575_v3  ;;  %v439_v8 = vpop.f32.mrf.mxu3 }
 0x311   :  { %v2143_v10 = vadd.f32 %v1644_v41, %v439_v8 }
 0x312   :  { %v509_v4 = vpop.f32.mrf.mxu1 }
 0x313   :  { %v2137_v6 = vadd.f32 %v1648_v50, %v509_v4  ;;  %v578_v12 = vsel %vm547_vm15, %v2143_v10, -inf }
 0x315   :  { %v590_v7 = vsel %vm547_vm15, %v2137_v6, -inf }
 0x316   :  { %591 = vmax.xlane.f32.xlu0 %v590_v7 }
 0x318   :  { %567 = vmax.xlane.f32.xlu2 %v566_v9  ;;  %v442_v13 = vpop.f32.mrf.mxu3 }
 0x319   :  { %v2150_v15 = vadd.f32 %v1645_v59, %v442_v13 }
 0x31a   :  { %v512_v21 = vpop.f32.mrf.mxu1 }
 0x31b   :  { %v581_v20 = vsel %vm547_vm15, %v2150_v15, -inf  ;;  %v2158_v22 = vadd.f32 %v1649_v61, %v512_v21 }
 0x31d   :  { %v593_v26 = vsel %vm547_vm15, %v2158_v22, -inf }
 0x320   :  { %1699 = vrot.lane.b32.xlu1 %v1698_v11, %s1832_s29  ;;  %579 = vmax.xlane.f32.xlu2 %v578_v12 }
 0x327   :  { %v550_v18 = vpop.xlane.xlu0 %549 }
 0x328   :  { %v596_v39 = vsub.f32 %v2079_v23, %v550_v18  ;;  %1704 = vrot.lane.b32.xlu1 %v1703_v16, %s1832_s29  ;;  %582 = vmax.xlane.f32.xlu2 %v581_v20 }
 0x329   :  { %v559_v19 = vpop.xlane.xlu2 %558 }
 0x32a   :  { %v612_v42 = vmul.f32 1.442695, %v596_v39 }
 0x32c   :  { %1725 = vpow2.f32 %v612_v42 }
 0x32f   :  { %v553_v24 = vpop.xlane.xlu1 %552 }
 0x330   :  { %v597_v44 = vsub.f32 %v2087_v31, %v553_v24  ;;  %594 = vmax.xlane.f32.xlu2 %v593_v26  ;;  %v599_v31 = vsub.f32 %v2081_v25, %v559_v19 }
 0x332   :  { %v2163_v47 = vpop.eup %1725  ;;  %v614_v27 = vmul.f32 1.442695, %v597_v44 }
 0x333   :  { %1610 = vmatmul.msk.f32.vlgmr.msra.gmra.mxu2 %vm547_vm15, %v2163_v47  ;;  %v644_v11 = vsel %vm547_vm15, %v2163_v47, 0.0 }
 0x334   :  { %1727 = vpow2.f32 %v614_v27 }
 0x337   :  { %v556_v23 = vpop.xlane.xlu1 %555 }
 0x338   :  { %v598_v28 = vsub.f32 %v2091_v32, %v556_v23  ;;  %v618_v32 = vmul.f32 1.442695, %v599_v31 }
 0x33a   :  { %v2168_v33 = vpop.eup %1727  ;;  %v616_v30 = vmul.f32 1.442695, %v598_v28  ;;  %v1690_v34 = vpop.permute.xlu0 %1689 }
 0x33b   :  { %v1692_v29 = vunpack.i.h.bf16 %v1690_v34  ;;  %v1691_v35 = vunpack.i.l.bf16 %v1690_v34  ;;  %1611 = vmatmul.msk.f32.gmra.mxu2 %vm547_vm15, %v2168_v33 }
 0x33c   :  { %1729 = vpow2.f32 %v616_v30 }
 0x33d   :  { %1063 = vmatpush.msra.mxu1 %v1691_v35  ;;  %1168 = vmatpush.msrb.mxu0 %v1692_v29  ;;  %1731 = vpow2.f32 %v618_v32 }
 0x33f   :  { %1064 = vmatpush.msra.mxu1 %v1696_v40  ;;  %1169 = vmatpush.msrb.mxu0 %v1697_v37 }
 0x342   :  { %v1730_v41 = vpop.eup %1729 }
 0x343   :  { %1612 = vmatmul.msk.f32.vlgmr.msra.gmra.mxu3 %vm547_vm15, %v1730_v41  ;;  %v2174_v38 = vpop.eup %1731  ;;  %v650_v52 = vsel %vm547_vm15, %v1730_v41, 0.0 }
 0x34b   :  { %1613 = vmatmul.msk.f32.gmra.mxu3 %vm547_vm15, %v2174_v38 }
 0x360   :  { %v562_v43 = vpop.xlane.xlu2 %561 }
 0x361   :  { %v600_v25 = vsub.f32 %v2101_v36, %v562_v43 }
 0x363   :  { %v620_v45 = vmul.f32 1.442695, %v600_v25 }
 0x365   :  { %1733 = vpow2.f32 %v620_v45 }
 0x36b   :  { %v1734_v48 = vpop.eup %1733 }
 0x36c   :  { %1614 = vmatmul.msk.f32.vlgmr.msra.gmra.mxu0 %vm547_vm15, %v1734_v48  ;;  %v656_v49 = vsel %vm547_vm15, %v1734_v48, 0.0 }
 0x36d   :  { %657 = vadd.xlane.f32.xlu2 %v656_v49 }
 0x373   :  { %v574_v50 = vpop.xlane.xlu2 %573 }
 0x374   :  { %v604_v51 = vsub.f32 %v2111_v46, %v574_v50 }
 0x375   :  { %651 = vadd.xlane.f32.xlu2 %v650_v52 }
 0x376   :  { %v628_v54 = vmul.f32 1.442695, %v604_v51 }
 0x378   :  { %1735 = vpow2.f32 %v628_v54 }
 0x379   :  { %v586_v57 = vpop.xlane.xlu0 %585 }
 0x37a   :  { %v608_v58 = vsub.f32 %v2117_v55, %v586_v57  ;;  %v571_v12 = vpop.xlane.xlu1 %570 }
 0x37b   :  { %v565_v36 = vpop.xlane.xlu2 %564  ;;  %v603_v21 = vsub.f32 %v2119_v56, %v571_v12 }
 0x37c   :  { %v636_v59 = vmul.f32 1.442695, %v608_v58  ;;  %v601_v60 = vsub.f32 %v2115_v53, %v565_v36 }
 0x37d   :  { %v626_v26 = vmul.f32 1.442695, %v603_v21 }
 0x37e   :  { %v1736_v61 = vpop.eup %1735  ;;  %1737 = vpow2.f32 %v636_v59  ;;  %v622_v62 = vmul.f32 1.442695, %v601_v60 }
 0x37f   :  { %1618 = vmatmul.msk.f32.vlgmr.msrb.gmra.mxu2 %vm547_vm15, %v1736_v61  ;;  %v668_v63 = vsel %vm547_vm15, %v1736_v61, 0.0 }
 0x380   :  { %1739 = vpow2.f32 %v622_v62  ;;  %669 = vadd.xlane.f32.xlu1 %v668_v63 }
 0x381   :  { %v589_v46 = vpop.xlane.xlu0 %588 }
 0x382   :  { %v609_v2 = vsub.f32 %v2129_v1, %v589_v46 }
 0x383   :  { %v577_v3 = vpop.xlane.xlu2 %576 }
 0x384   :  { %v1738_v4 = vpop.eup %1737  ;;  %v638_v7 = vmul.f32 1.442695, %v609_v2  ;;  %v605_v55 = vsub.f32 %v2127_v0, %v577_v3  ;;  %v647_v0 = vsel %vm547_vm15, %v2168_v33, 0.0 }
 0x385   :  { %v680_v8 = vsel %vm547_vm15, %v1738_v4, 0.0 }
 0x386   :  { %v1740_v53 = vpop.eup %1739  ;;  %1741 = vpow2.f32 %v638_v7  ;;  %v630_v9 = vmul.f32 1.442695, %v605_v55  ;;  %681 = vadd.xlane.f32.xlu0 %v680_v8 }
 0x387   :  { %1615 = vmatmul.msk.f32.gmra.mxu0 %vm547_vm15, %v1740_v53  ;;  %v659_v27 = vsel %vm547_vm15, %v1740_v53, 0.0 }
 0x388   :  { %1743 = vpow2.f32 %v630_v9  ;;  %645 = vadd.xlane.f32.xlu1 %v644_v11 }
 0x389   :  { %v592_v28 = vpop.xlane.xlu0 %591 }
 0x38a   :  { %v610_v56 = vsub.f32 %v2137_v6, %v592_v28 }
 0x38b   :  { %v568_v1 = vpop.xlane.xlu2 %567 }
 0x38c   :  { %v1742_v13 = vpop.eup %1741  ;;  %v602_v16 = vsub.f32 %v2135_v5, %v568_v1  ;;  %v640_v29 = vmul.f32 1.442695, %v610_v56 }
 0x38d   :  { %v683_v17 = vsel %vm547_vm15, %v1742_v13, 0.0 }
 0x38e   :  { %v1744_v18 = vpop.eup %1743  ;;  %v624_v20 = vmul.f32 1.442695, %v602_v16  ;;  %648 = vadd.xlane.f32.xlu0 %v647_v0  ;;  %684 = vadd.xlane.f32.xlu2 %v683_v17 }
 0x38f   :  { %1619 = vmatmul.msk.f32.gmra.mxu2 %vm547_vm15, %v1744_v18  ;;  %1622 = vmatmul.msk.f32.vlgmr.msrb.gmra.mxu0 %vm547_vm15, %v1738_v4  ;;  %v671_v47 = vsel %vm547_vm15, %v1744_v18, 0.0 }
 0x390   :  { %1745 = vpow2.f32 %v624_v20 }
 0x392   :  { %v1700_v39 = vpop.permute.xlu1 %1699 }
 0x393   :  { %v1701_v42 = vunpack.i.l.bf16 %v1700_v39  ;;  %v580_v24 = vpop.xlane.xlu2 %579  ;;  %v1702_v44 = vunpack.i.h.bf16 %v1700_v39 }
 0x394   :  { %v606_v5 = vsub.f32 %v2143_v10, %v580_v24 }
 0x395   :  { %1133 = vmatpush.msrb.mxu3 %v1701_v42 }
 0x396   :  { %v1746_v23 = vpop.eup %1745  ;;  %v632_v19 = vmul.f32 1.442695, %v606_v5  ;;  %672 = vadd.xlane.f32.xlu0 %v671_v47  ;;  %660 = vadd.xlane.f32.xlu2 %v659_v27 }
 0x397   :  { %1134 = vmatpush.msrb.mxu3 %v1702_v44  ;;  %1616 = vmatmul.msk.f32.vlgmr.msra.gmra.mxu1 %vm547_vm15, %v1746_v23  ;;  %v662_v31 = vsel %vm547_vm15, %v1746_v23, 0.0 }
 0x398   :  { %1747 = vpow2.f32 %v632_v19  ;;  %1623 = vmatmul.msk.f32.gmra.mxu0 %vm547_vm15, %v1742_v13 }
 0x399   :  { %1749 = vpow2.f32 %v626_v26 }
 0x39a   :  { %v1705_v10 = vpop.permute.xlu1 %1704 }
 0x39b   :  { %v1706_v33 = vunpack.i.l.bf16 %v1705_v10  ;;  %v583_v30 = vpop.xlane.xlu2 %582  ;;  %v1707_v35 = vunpack.i.h.bf16 %v1705_v10 }
 0x39c   :  { %v607_v34 = vsub.f32 %v2150_v15, %v583_v30 }
 0x39d   :  { %1203 = vmatpush.msrb.mxu1 %v1706_v33 }
 0x39e   :  { %v1748_v37 = vpop.eup %1747  ;;  %v634_v40 = vmul.f32 1.442695, %v607_v34  ;;  %663 = vadd.xlane.f32.xlu0 %v662_v31 }
 0x39f   :  { %v1750_v32 = vpop.eup %1749  ;;  %1204 = vmatpush.msrb.mxu1 %v1707_v35  ;;  %1620 = vmatmul.msk.f32.vlgmr.msrb.gmra.mxu3 %vm547_vm15, %v1748_v37  ;;  %v674_v41 = vsel %vm547_vm15, %v1748_v37, 0.0 }
 0x3a0   :  { %1751 = vpow2.f32 %v634_v40  ;;  %1617 = vmatmul.msk.f32.gmra.mxu1 %vm547_vm15, %v1750_v32  ;;  %675 = vadd.xlane.f32.xlu2 %v674_v41  ;;  %v665_v49 = vsel %vm547_vm15, %v1750_v32, 0.0 }
 0x3a1   :  { %1753 = vpow2.f32 %v640_v29 }
 0x3a3   :  { %v595_v6 = vpop.xlane.xlu2 %594 }
 0x3a4   :  { %v611_v15 = vsub.f32 %v2158_v22, %v595_v6 }
 0x3a6   :  { %v1752_v43 = vpop.eup %1751  ;;  %v642_v25 = vmul.f32 1.442695, %v611_v15 }
 0x3a7   :  { %v1754_v45 = vpop.eup %1753  ;;  %1621 = vmatmul.msk.f32.gmra.mxu3 %vm547_vm15, %v1752_v43  ;;  %v677_v48 = vsel %vm547_vm15, %v1752_v43, 0.0 }
 0x3a8   :  { %1755 = vpow2.f32 %v642_v25  ;;  %1624 = vmatmul.msk.f32.vlgmr.msrb.gmra.mxu1 %vm547_vm15, %v1754_v45  ;;  %678 = vadd.xlane.f32.xlu0 %v677_v48  ;;  %v686_v52 = vsel %vm547_vm15, %v1754_v45, 0.0 }
 0x3a9   :  { %666 = vadd.xlane.f32.xlu2 %v665_v49 }
 0x3ae   :  { %v1756_v50 = vpop.eup %1755 }
 0x3af   :  { %v689_v51 = vsel %vm547_vm15, %v1756_v50, 0.0 }
 0x3b0   :  { %1625 = vmatmul.msk.f32.gmra.mxu1 %vm547_vm15, %v1756_v50  ;;  %687 = vadd.xlane.f32.xlu0 %v686_v52 }
 0x3b1   :  { %690 = vadd.xlane.f32.xlu2 %v689_v51 }
 0x3b6   :  { %v2219_v53 = vpop.f32.mrf.mxu2 }
 0x3be   :  { %v2224_v24 = vpop.f32.mrf.mxu2 }
 0x3c6   :  { %v996_v21 = vpop.f32.mrf.mxu3 }
 0x3e0   :  { %v658_v22 = vpop.xlane.xlu2 %657 }
 0x3e1   :  { %1757 = vrcp.f32 %v658_v22  ;;  %v763_v59 = vand.u32 2147483648, %v658_v22  ;;  %v761_v61 = vand.u32 2147483647, %v658_v22  ;;  %vm757_vm2 = vweird.f32 %v658_v22 }
 0x3e3   :  { %v764_v46 = vor.u32 1.1754944e-38, %v763_v59  ;;  %vm762_vm4 = vcmp.eq.f32.partialorder %v761_v61, 8.507059e+37 }
 0x3e7   :  { %v1758_v54 = vpop.eup %1757 }
 0x3e8   :  { %v753_v57 = vmul.f32 %v1758_v54, %v658_v22  ;;  %v652_v58 = vpop.xlane.xlu2 %651  ;;  %vm758_vm1 = vweird.f32 %v1758_v54 }
 0x3e9   :  { %1759 = vrcp.f32 %v652_v58  ;;  %vm759_vm3 = vmor %vm757_vm2, %vm758_vm1  ;;  %v1031_v7 = vpop.f32.mrf.mxu0  ;;  %v733_v9 = vand.u32 2147483648, %v652_v58  ;;  %v731_v1 = vand.u32 2147483647, %v652_v58  ;;  %vm727_vm6 = vweird.f32 %v652_v58 }
 0x3ea   :  { %v754_v36 = vsub.f32 1.0, %v753_v57 }
 0x3eb   :  { %v734_v16 = vor.u32 1.1754944e-38, %v733_v9  ;;  %vm732_vm8 = vcmp.eq.f32.partialorder %v731_v1, 8.507059e+37 }
 0x3ec   :  { %v755_v60 = vmul.f32 %v1758_v54, %v754_v36 }
 0x3ee   :  { %v756_v62 = vadd.f32 %v1758_v54, %v755_v60 }
 0x3ef   :  { %v1760_v63 = vpop.eup %1759 }
 0x3f0   :  { %v723_v2 = vmul.f32 %v1760_v63, %v652_v58  ;;  %v760_v3 = vsel %vm759_vm3, %v1758_v54, %v756_v62  ;;  %vm728_vm5 = vweird.f32 %v1760_v63 }
 0x3f1   :  { %v765_v4 = vsel %vm762_vm4, %v764_v46, %v760_v3  ;;  %vm729_vm7 = vmor %vm727_vm6, %vm728_vm5 }
 0x3f2   :  { %v724_v55 = vsub.f32 1.0, %v723_v2  ;;  %v1216_v8 = vmul.f32 %v1031_v7, %v765_v4 }
 0x3f3   :  { %v670_v11 = vpop.xlane.xlu1 %669 }
 0x3f4   :  { %v725_v12 = vmul.f32 %v1760_v63, %v724_v55  ;;  %1761 = vrcp.f32 %v670_v11  ;;  %1232 = vrot.lane.b32.xlu1 %v1216_v8, %s1833_s1  ;;  %v823_v44 = vand.u32 2147483648, %v670_v11  ;;  %v821_v27 = vand.u32 2147483647, %v670_v11 }
 0x3f5   :  { %vm817_vm10 = vweird.f32 %v670_v11 }
 0x3f6   :  { %v726_v13 = vadd.f32 %v1760_v63, %v725_v12  ;;  %v824_v33 = vor.u32 1.1754944e-38, %v823_v44  ;;  %vm822_vm12 = vcmp.eq.f32.partialorder %v821_v27, 8.507059e+37 }
 0x3f8   :  { %v730_v0 = vsel %vm729_vm7, %v1760_v63, %v726_v13 }
 0x3f9   :  { %v682_v17 = vpop.xlane.xlu0 %681  ;;  %v735_v18 = vsel %vm732_vm8, %v734_v16, %v730_v0 }
 0x3fa   :  { %v1762_v20 = vpop.eup %1761  ;;  %1763 = vrcp.f32 %v682_v17  ;;  %v2222_v42 = vmul.f32 %v996_v21, %v735_v18  ;;  %v883_v40 = vand.u32 2147483648, %v682_v17  ;;  %vm877_vm1 = vweird.f32 %v682_v17 }
 0x3fb   :  { %v813_v39 = vmul.f32 %v1762_v20, %v670_v11  ;;  %vm818_vm9 = vweird.f32 %v1762_v20  ;;  %v881_v41 = vand.u32 2147483647, %v682_v17 }
 0x3fc   :  { %vm819_vm11 = vmor %vm817_vm10, %vm818_vm9  ;;  %v884_v48 = vor.u32 1.1754944e-38, %v883_v40 }
 0x3fd   :  { %v814_v5 = vsub.f32 1.0, %v813_v39  ;;  %vm882_vm3 = vcmp.eq.f32.partialorder %v881_v41, 8.507059e+37 }
 0x3ff   :  { %v815_v26 = vmul.f32 %v1762_v20, %v814_v5 }
 0x400   :  { %v1764_v47 = vpop.eup %1763 }
 0x401   :  { %v873_v23 = vmul.f32 %v1764_v47, %v682_v17  ;;  %v2226_v28 = vpop.xlane.xlu2 %684  ;;  %v649_v19 = vpop.xlane.xlu0 %648  ;;  %v816_v56 = vadd.f32 %v1762_v20, %v815_v26  ;;  %vm878_vm13 = vweird.f32 %v1764_v47 }
 0x402   :  { %1765 = vrcp.f32 %v649_v19  ;;  %v1101_v35 = vpop.f32.mrf.mxu2  ;;  %vm879_vm2 = vmor %vm877_vm1, %vm878_vm13  ;;  %v716_v58 = vand.u32 2147483647, %v649_v19  ;;  %v718_v36 = vand.u32 2147483648, %v649_v19  ;;  %vm712_vm4 = vweird.f32 %v649_v19 }
 0x403   :  { %v874_v10 = vsub.f32 1.0, %v873_v23  ;;  %v820_v30 = vsel %vm819_vm11, %v1762_v20, %v816_v56  ;;  %1767 = vrcp.f32 %v2226_v28  ;;  %v896_v8 = vand.u32 2147483647, %v2226_v28 }
 0x404   :  { %v2228_v34 = vpop.f32.mrf.mxu0  ;;  %v825_v29 = vsel %vm822_vm12, %v824_v33, %v820_v30  ;;  %vm2248_vm6 = vcmp.eq.f32.partialorder %v716_v58, 8.507059e+37  ;;  %v719_v4 = vor.u32 1.1754944e-38, %v718_v36  ;;  %vm892_vm8 = vweird.f32 %v2226_v28  ;;  %v2305_v58 = vpop.f32.mrf.mxu3 }
 0x405   :  { %v875_v31 = vmul.f32 %v1764_v47, %v874_v10  ;;  %v1220_v37 = vmul.f32 %v1101_v35, %v825_v29 }
 0x407   :  { %v876_v32 = vadd.f32 %v1764_v47, %v875_v31  ;;  %1248 = vrot.lane.b32.xlu0 %v1220_v37, %s1834_s21 }
 0x408   :  { %v1766_v6 = vpop.eup %1765 }
 0x409   :  { %v2232_v15 = vpop.xlane.xlu2 %660  ;;  %v2234_v43 = vpop.xlane.xlu0 %672  ;;  %v880_v25 = vsel %vm879_vm2, %v1764_v47, %v876_v32  ;;  %v708_v45 = vmul.f32 %v1766_v6, %v649_v19  ;;  %vm713_vm5 = vweird.f32 %v1766_v6 }
 0x40a   :  { %1769 = vrcp.f32 %v2232_v15  ;;  %v2237_v49 = vpop.eup %1767  ;;  %v885_v51 = vsel %vm882_vm3, %v884_v48, %v880_v25  ;;  %v778_v9 = vand.u32 2147483648, %v2232_v15  ;;  %v836_v12 = vand.u32 2147483647, %v2234_v43  ;;  %vm714_vm7 = vmor %vm712_vm4, %vm713_vm5 }
 0x40b   :  { %1771 = vrcp.f32 %v2234_v43  ;;  %v709_v50 = vsub.f32 1.0, %v708_v45  ;;  %v888_v54 = vmul.f32 %v2237_v49, %v2226_v28  ;;  %v838_v13 = vand.u32 2147483648, %v2234_v43 }
 0x40c   :  { %v1171_v52 = vpop.f32.mrf.mxu0  ;;  %v776_v16 = vand.u32 2147483647, %v2232_v15  ;;  %vm772_vm11 = vweird.f32 %v2232_v15  ;;  %vm893_vm12 = vweird.f32 %v2237_v49  ;;  %v779_v5 = vor.u32 1.1754944e-38, %v778_v9 }
 0x40d   :  { %v1224_v22 = vmul.f32 %v1171_v52, %v885_v51  ;;  %v710_v57 = vmul.f32 %v1766_v6, %v709_v50  ;;  %v889_v63 = vsub.f32 1.0, %v888_v54  ;;  %vm832_vm13 = vweird.f32 %v2234_v43 }
 0x40e   :  { %v839_v27 = vor.u32 1.1754944e-38, %v838_v13  ;;  %vm777_vm3 = vcmp.eq.f32.partialorder %v776_v16, 8.507059e+37  ;;  %vm837_vm4 = vcmp.eq.f32.partialorder %v836_v12, 8.507059e+37 }
 0x40f   :  { %1264 = vrot.lane.b32.xlu2 %v1224_v22, %s1835_s22  ;;  %v711_v46 = vadd.f32 %v1766_v6, %v710_v57  ;;  %v890_v17 = vmul.f32 %v2237_v49, %v889_v63 }
 0x410   :  { %v1770_v59 = vpop.eup %1769 }
 0x411   :  { %v1772_v60 = vpop.eup %1771  ;;  %v768_v61 = vmul.f32 %v1770_v59, %v2232_v15  ;;  %v2244_v62 = vpop.xlane.xlu0 %663  ;;  %vm773_vm9 = vweird.f32 %v1770_v59  ;;  %v715_v18 = vsel %vm714_vm7, %v1766_v6, %v711_v46  ;;  %v891_v10 = vadd.f32 %v2237_v49, %v890_v17 }
 0x412   :  { %v828_v2 = vmul.f32 %v1772_v60, %v2234_v43  ;;  %1773 = vrcp.f32 %v2244_v62  ;;  %vm833_vm10 = vweird.f32 %v1772_v60  ;;  %v720_v21 = vsel %vm2248_vm6, %v719_v4, %v715_v18  ;;  %vm774_vm1 = vmor %vm772_vm11, %vm773_vm9  ;;  %v1104_v35 = vpop.f32.mrf.mxu2 }
 0x413   :  { %v769_v7 = vsub.f32 1.0, %v768_v61  ;;  %v2252_v55 = vpop.xlane.xlu2 %675  ;;  %v2270_v44 = vmul.f32 %v2224_v24, %v720_v21  ;;  %vm834_vm2 = vmor %vm832_vm13, %vm833_vm10  ;;  %v791_v32 = vand.u32 2147483647, %v2244_v62  ;;  %v793_v41 = vand.u32 2147483648, %v2244_v62 }
 0x414   :  { %v829_v11 = vsub.f32 1.0, %v828_v2  ;;  %1775 = vrcp.f32 %v2252_v55  ;;  %v1066_v6 = vpop.f32.mrf.mxu1  ;;  %v898_v15 = vand.u32 2147483648, %v2226_v28  ;;  %vm2292_vm6 = vmor %vm892_vm8, %vm893_vm12  ;;  %vm787_vm7 = vweird.f32 %v2244_v62 }
 0x415   :  { %v770_v1 = vmul.f32 %v1770_v59, %v769_v7  ;;  %v895_v50 = vsel %vm2292_vm6, %v2237_v49, %v891_v10  ;;  %v794_v52 = vor.u32 1.1754944e-38, %v793_v41  ;;  %vm897_vm10 = vcmp.eq.f32.partialorder %v896_v8, 8.507059e+37  ;;  %v1174_v22 = vpop.f32.mrf.mxu0 }
 0x416   :  { %v830_v0 = vmul.f32 %v1772_v60, %v829_v11  ;;  %v899_v28 = vor.u32 1.1754944e-38, %v898_v15  ;;  %vm792_vm8 = vcmp.eq.f32.partialorder %v791_v32, 8.507059e+37  ;;  %vm847_vm12 = vweird.f32 %v2252_v55 }
 0x417   :  { %v771_v20 = vadd.f32 %v1770_v59, %v770_v1  ;;  %v851_v63 = vand.u32 2147483647, %v2252_v55 }
 0x418   :  { %v1774_v39 = vpop.eup %1773  ;;  %v831_v26 = vadd.f32 %v1772_v60, %v830_v0 }
 0x419   :  { %v783_v47 = vmul.f32 %v1774_v39, %v2244_v62  ;;  %v775_v23 = vsel %vm774_vm1, %v1770_v59, %v771_v20  ;;  %vm788_vm5 = vweird.f32 %v1774_v39  ;;  %v900_v59 = vsel %vm897_vm10, %v899_v28, %v895_v50 }
 0x41a   :  { %v2273_v19 = vpop.eup %1775  ;;  %v835_v56 = vsel %vm834_vm2, %v1772_v60, %v831_v26  ;;  %v780_v33 = vsel %vm777_vm3, %v779_v5, %v775_v23  ;;  %vm789_vm9 = vmor %vm787_vm7, %vm788_vm5  ;;  %v853_v60 = vand.u32 2147483648, %v2252_v55  ;;  %v1225_v62 = vmul.f32 %v1174_v22, %v900_v59 }
 0x41b   :  { %v784_v30 = vsub.f32 1.0, %v783_v47  ;;  %v840_v29 = vsel %vm837_vm4, %v839_v27, %v835_v56  ;;  %v843_v24 = vmul.f32 %v2273_v19, %v2252_v55  ;;  %v2278_v31 = vpop.xlane.xlu0 %678  ;;  %v1217_v37 = vmul.f32 %v2228_v34, %v780_v33 }
 0x41c   :  { %v1221_v40 = vmul.f32 %v1104_v35, %v840_v29  ;;  %v2284_v43 = vpop.xlane.xlu2 %666  ;;  %vm848_vm11 = vweird.f32 %v2273_v19  ;;  %v854_v11 = vor.u32 1.1754944e-38, %v853_v60  ;;  %vm852_vm1 = vcmp.eq.f32.partialorder %v851_v63, 8.507059e+37  ;;  %v1290_v63 = vld [vmem:[%s2541_s3 + $0x8] sm:$0xff] }
 0x41d   :  { %v844_v25 = vsub.f32 1.0, %v843_v24  ;;  %v785_v45 = vmul.f32 %v1774_v39, %v784_v30  ;;  %1777 = vrcp.f32 %v2284_v43  ;;  %1234 = vrot.lane.b32.xlu1 %v1217_v37, %s1833_s1  ;;  %vm849_vm13 = vmor %vm847_vm12, %vm848_vm11  ;;  %v1069_v9 = vpop.f32.mrf.mxu1  ;;  %v806_v0 = vand.u32 2147483647, %v2284_v43 }
 0x41e   :  { %1779 = vrcp.f32 %v2278_v31  ;;  %1250 = vrot.lane.b32.xlu2 %v1221_v40, %s1834_s21  ;;  %v808_v17 = vand.u32 2147483648, %v2284_v43  ;;  %vm802_vm3 = vweird.f32 %v2284_v43  ;;  %v653_v37 = vsel %vm547_vm15, %v2174_v38, 0.0 }
 0x41f   :  { %v786_v48 = vadd.f32 %v1774_v39, %v785_v45  ;;  %v845_v51 = vmul.f32 %v2273_v19, %v844_v25  ;;  %vm807_vm5 = vcmp.eq.f32.partialorder %v806_v0, 8.507059e+37  ;;  %v868_v38 = vand.u32 2147483648, %v2278_v31 }
 0x420   :  { %v809_v23 = vor.u32 1.1754944e-38, %v808_v17  ;;  %v866_v50 = vand.u32 2147483647, %v2278_v31 }
 0x421   :  { %v790_v54 = vsel %vm789_vm9, %v1774_v39, %v786_v48  ;;  %v846_v57 = vadd.f32 %v2273_v19, %v845_v51  ;;  %v869_v22 = vor.u32 1.1754944e-38, %v868_v38 }
 0x422   :  { %v795_v36 = vsel %vm792_vm8, %v794_v52, %v790_v54  ;;  %v1136_v18 = vpop.f32.mrf.mxu3 }
 0x423   :  { %v1778_v49 = vpop.eup %1777  ;;  %v1218_v61 = vmul.f32 %v1066_v6, %v795_v36  ;;  %v688_v46 = vpop.xlane.xlu0 %687  ;;  %v850_v7 = vsel %vm849_vm13, %v2273_v19, %v846_v57 }
 0x424   :  { %v2310_v2 = vpop.eup %1779  ;;  %v798_v3 = vmul.f32 %v1778_v49, %v2284_v43  ;;  %v2313_v4 = vpop.xlane.xlu2 %690  ;;  %1781 = vrcp.f32 %v688_v46  ;;  %v855_v1 = vsel %vm852_vm1, %v854_v11, %v850_v7  ;;  %vm803_vm2 = vweird.f32 %v1778_v49 }
 0x425   :  { %1783 = vrcp.f32 %v2313_v4  ;;  %1266 = vrot.lane.b32.xlu1 %v1225_v62, %s1835_s22  ;;  %v858_v55 = vmul.f32 %v2310_v2, %v2278_v31  ;;  %v1222_v39 = vmul.f32 %v1136_v18, %v855_v1  ;;  %vm804_vm4 = vmor %vm802_vm3, %vm803_vm2  ;;  %v913_v56 = vand.u32 2147483648, %v688_v46  ;;  %v1206_v35 = vpop.f32.mrf.mxu1  ;;  %v646_v62 = vpop.xlane.xlu1 %645 }
 0x426   :  { %v799_v8 = vsub.f32 1.0, %v798_v3  ;;  %1236 = vrot.lane.b32.xlu2 %v1218_v61, %s1833_s1  ;;  %v911_v33 = vand.u32 2147483647, %v688_v46  ;;  %vm863_vm7 = vweird.f32 %v2310_v2  ;;  %vm907_vm9 = vweird.f32 %v688_v46  ;;  %v1291_v61 = vld [vmem:[%s2541_s3 + $0x10] sm:$0xff] }
 0x427   :  { %v859_v21 = vsub.f32 1.0, %v858_v55  ;;  %vm922_vm10 = vweird.f32 %v2313_v4  ;;  %v914_v32 = vor.u32 1.1754944e-38, %v913_v56  ;;  %v926_v6 = vand.u32 2147483647, %v2313_v4 }
 0x428   :  { %v800_v12 = vmul.f32 %v1778_v49, %v799_v8  ;;  %v928_v15 = vand.u32 2147483648, %v2313_v4  ;;  %vm912_vm12 = vcmp.eq.f32.partialorder %v911_v33, 8.507059e+37  ;;  %vm862_vm1 = vweird.f32 %v2278_v31 }
 0x429   :  { %v860_v30 = vmul.f32 %v2310_v2, %v859_v21  ;;  %vm864_vm2 = vmor %vm862_vm1, %vm863_vm7  ;;  %vm927_vm3 = vcmp.eq.f32.partialorder %v926_v6, 8.507059e+37  ;;  %1785 = vrcp.f32 %v646_v62  ;;  %v701_v11 = vand.u32 2147483647, %v646_v62 }
 0x42a   :  { %v1782_v13 = vpop.eup %1781  ;;  %v801_v16 = vadd.f32 %v1778_v49, %v800_v12  ;;  %v929_v52 = vor.u32 1.1754944e-38, %v928_v15  ;;  %v1139_v60 = vpop.f32.mrf.mxu3 }
 0x42b   :  { %v1784_v20 = vpop.eup %1783  ;;  %v903_v5 = vmul.f32 %v1782_v13, %v688_v46  ;;  %vm908_vm6 = vweird.f32 %v1782_v13  ;;  %v861_v45 = vadd.f32 %v2310_v2, %v860_v30  ;;  %v1289_v46 = vld [vmem:[%s2541_s3] sm:$0xff] }
 0x42c   :  { %v918_v26 = vmul.f32 %v1784_v20, %v2313_v4  ;;  %v805_v47 = vsel %vm804_vm4, %v1778_v49, %v801_v16  ;;  %vm923_vm8 = vweird.f32 %v1784_v20  ;;  %vm909_vm11 = vmor %vm907_vm9, %vm908_vm6  ;;  %vm867_vm4 = vcmp.eq.f32.partialorder %v866_v50, 8.507059e+37  ;;  %v1292_v49 = vld [vmem:[%s2541_s3 + $0x18] sm:$0xff] }
 0x42d   :  { %v904_v27 = vsub.f32 1.0, %v903_v5  ;;  %1252 = vrot.lane.b32.xlu1 %v1222_v39, %s1834_s21  ;;  %v810_v29 = vsel %vm807_vm5, %v809_v23, %v805_v47  ;;  %vm924_vm13 = vmor %vm922_vm10, %vm923_vm8  ;;  %v865_v28 = vsel %vm864_vm2, %v2310_v2, %v861_v45  ;;  %v1209_v36 = vpop.f32.mrf.mxu1  ;;  %1321 = vmatpush.msra.mxu2 %v1292_v49  ;;  %vm697_vm6 = vweird.f32 %v646_v62 }
 0x42e   :  { %v919_v19 = vsub.f32 1.0, %v918_v26  ;;  %v1219_v43 = vmul.f32 %v1069_v9, %v810_v29  ;;  %v870_v57 = vsel %vm867_vm4, %v869_v22, %v865_v28  ;;  %v703_v9 = vand.u32 2147483648, %v646_v62 }
 0x42f   :  { %v905_v10 = vmul.f32 %v1782_v13, %v904_v27  ;;  %v1223_v31 = vmul.f32 %v1139_v60, %v870_v57  ;;  %1322 = vmatpush.msra.mxu2 %v1291_v61  ;;  %v1786_v2 = vpop.eup %1785  ;;  %vm702_vm9 = vcmp.eq.f32.partialorder %v701_v11, 8.507059e+37  ;;  %vm1284_vm10 = vcmask 195584  }
 0x430   :  { %v920_v24 = vmul.f32 %v1784_v20, %v919_v19  ;;  %v693_v3 = vmul.f32 %v1786_v2, %v646_v62  ;;  %vm698_vm5 = vweird.f32 %v1786_v2  ;;  %v704_v12 = vor.u32 1.1754944e-38, %v703_v9  ;;  %v1799_v62 = vld [vmem:[%s2538_s0 + $0x10] sm:$0xff] }
 0x431   :  { %v906_v40 = vadd.f32 %v1782_v13, %v905_v10  ;;  %654 = vadd.xlane.f32.xlu0 %v653_v37  ;;  %1323 = vmatpush.msra.mxu2 %v1290_v63  ;;  %vm699_vm7 = vmor %vm697_vm6, %vm698_vm5 }
 0x432   :  { %v921_v41 = vadd.f32 %v1784_v20, %v920_v24  ;;  %v694_v4 = vsub.f32 1.0, %v693_v3 }
 0x433   :  { %v910_v25 = vsel %vm909_vm11, %v1782_v13, %v906_v40  ;;  %1324 = vmatpush.msra.mxu2 %v1289_v46 }
 0x434   :  { %v915_v34 = vsel %vm912_vm12, %v914_v32, %v910_v25  ;;  %v925_v51 = vsel %vm924_vm13, %v1784_v20, %v921_v41  ;;  %v695_v7 = vmul.f32 %v1786_v2, %v694_v4  ;;  %v1800_v4 = vld [vmem:[%s2538_s0 + $0x18] sm:$0xff] }
 0x435   :  { %v1226_v48 = vmul.f32 %v1206_v35, %v915_v34  ;;  %1238 = vrot.lane.b32.xlu1 %v1219_v43, %s1833_s1  ;;  %v930_v54 = vsel %vm927_vm3, %v929_v52, %v925_v51  ;;  %v1710_v51 = vld [vmem:[%s2542_s4] ss:$0 sm:$0xff]  ;;  %s1836_s4 = smov [#allocation2]  }
 0x436   :  { %v1227_v59 = vmul.f32 %v1209_v36, %v930_v54  ;;  %v696_v8 = vadd.f32 %v1786_v2, %v695_v7  ;;  %s1560_s16 = sshll.u32 %s1836_s4, 4  ;;  %s1561_s16 = int_to_ptr.vmem [resolvable:$true] %s1560_s16 }
 0x437   :  { %1268 = vrot.lane.b32.xlu2 %v1226_v48, %s1835_s22 }
 0x438   :  { %v700_v55 = vsel %vm699_vm7, %v1786_v2, %v696_v8 }
 0x439   :  { %v705_v1 = vsel %vm702_vm9, %v704_v12, %v700_v55 }
 0x43a   :  { %v1212_v16 = vmul.f32 %v2219_v53, %v705_v1 }
 0x43d   :  { %1270 = vrot.lane.b32.xlu1 %v1227_v59, %s1835_s22  ;;  %v1798_v59 = vld [vmem:[%s2538_s0 + $0x8] sm:$0xff] }
 0x43f   :  { %1254 = vrot.lane.b32.xlu2 %v1223_v31, %s1834_s21 }
 0x466   :  { %v1233_v13 = vpop.permute.xlu1 %1232 }
 0x467   :  { %v1276_v0 = vsel %vm238_vm14, %v1212_v16, %v1233_v13 }
 0x469   :  { %v1265_v18 = vpop.permute.xlu2 %1264 }
 0x478   :  { %v1251_v39 = vpop.permute.xlu2 %1250 }
 0x479   :  { %v1249_v17 = vpop.permute.xlu0 %1248 }
 0x47a   :  { %v1280_v20 = vsel %vm547_vm15, %v1276_v0, %v1249_v17 }
 0x47b   :  { %v1285_v21 = vsel %vm1284_vm10, %v1280_v20, %v1265_v18 }
 0x47c   :  { %1626 = vmatmul.msk.f32.vlgmr.msra.gmra.mxu2 %vm51_vm0, %v1285_v21 }
 0x480   :  { %v1237_v53 = vpop.permute.xlu2 %1236 }
 0x481   :  { %v1278_v19 = vsel %vm238_vm14, %v2222_v42, %v1237_v53 }
 0x48f   :  { %v1235_v5 = vpop.permute.xlu1 %1234 }
 0x490   :  { %v1277_v26 = vsel %vm238_vm14, %v2270_v44, %v1235_v5 }
 0x491   :  { %v1281_v27 = vsel %vm547_vm15, %v1277_v26, %v1251_v39  ;;  %v1269_v10 = vpop.permute.xlu2 %1268 }
 0x497   :  { %v1267_v47 = vpop.permute.xlu1 %1266 }
 0x498   :  { %v1286_v23 = vsel %vm1284_vm10, %v1281_v27, %v1267_v47 }
 0x499   :  { %1627 = vmatmul.msk.f32.gmra.mxu2 %vm51_vm0, %v1286_v23  ;;  %v1255_v45 = vpop.permute.xlu2 %1254 }
 0x49f   :  { %v1253_v56 = vpop.permute.xlu1 %1252 }
 0x4a0   :  { %v1282_v33 = vsel %vm547_vm15, %v1278_v19, %v1253_v56  ;;  %v1449_v56 = vld [vmem:[%s2547_s9 + $0x18] sm:$0xff] }
 0x4a1   :  { %v1287_v30 = vsel %vm1284_vm10, %v1282_v33, %v1269_v10  ;;  %v1448_v10 = vld [vmem:[%s2547_s9 + $0x10] sm:$0xff]  ;;  %1478 = vmatpush.msra.mxu3 %v1449_v56  ;;  %v1447_v33 = vld [vmem:[%s2547_s9 + $0x8] sm:$0xff] }
 0x4a2   :  { %1628 = vmatmul.msk.f32.gmra.mxu2 %vm51_vm0, %v1287_v30  ;;  %v1446_v30 = vld [vmem:[%s2547_s9] sm:$0xff]  ;;  %v1505_v56 = vld [vmem:[%s2549_s11 + $0x30] sm:$0xff] }
 0x4a3   :  { %1479 = vmatpush.msra.mxu3 %v1448_v10 }
 0x4a4   :  { %v655_v44 = vpop.xlane.xlu0 %654 }
 0x4a5   :  { %1787 = vrcp.f32 %v655_v44  ;;  %v748_v37 = vand.u32 2147483648, %v655_v44  ;;  %v746_v41 = vand.u32 2147483647, %v655_v44  ;;  %vm742_vm11 = vweird.f32 %v655_v44  ;;  %1480 = vmatpush.msra.mxu3 %v1447_v33  ;;  %v1504_v33 = vld [vmem:[%s2549_s11 + $0x28] sm:$0xff] }
 0x4a7   :  { %v1239_v40 = vpop.permute.xlu1 %1238  ;;  %v749_v42 = vor.u32 1.1754944e-38, %v748_v37  ;;  %vm747_vm13 = vcmp.eq.f32.partialorder %v746_v41, 8.507059e+37  ;;  %1481 = vmatpush.msra.mxu3 %v1446_v30 }
 0x4ab   :  { %v1788_v29 = vpop.eup %1787 }
 0x4ac   :  { %v738_v35 = vmul.f32 %v1788_v29, %v655_v44  ;;  %vm743_vm8 = vweird.f32 %v1788_v29 }
 0x4ad   :  { %vm744_vm12 = vmor %vm742_vm11, %vm743_vm8 }
 0x4ae   :  { %v739_v24 = vsub.f32 1.0, %v738_v35 }
 0x4af   :  { %v1271_v38 = vpop.permute.xlu1 %1270 }
 0x4b0   :  { %v740_v32 = vmul.f32 %v1788_v29, %v739_v24 }
 0x4b2   :  { %v741_v6 = vadd.f32 %v1788_v29, %v740_v32 }
 0x4b4   :  { %v745_v15 = vsel %vm744_vm12, %v1788_v29, %v741_v6 }
 0x4b5   :  { %v750_v43 = vsel %vm747_vm13, %v749_v42, %v745_v15  ;;  %v2447_v42 = vld [vmem:[%s2545_s7] ss:$0 sm:$0xff] }
 0x4b6   :  { %v1215_v25 = vmul.f32 %v2305_v58, %v750_v43  ;;  %v1797_v58 = vld [vmem:[%s2538_s0] sm:$0xff] }
 0x4b8   :  { %v1279_v34 = vsel %vm238_vm14, %v1215_v25, %v1239_v40  ;;  %v2452_v25 = vld [vmem:[%s2546_s8] ss:$0 sm:$0xff] }
 0x4b9   :  { %v1283_v48 = vsel %vm547_vm15, %v1279_v34, %v1255_v45 }
 0x4ba   :  { %v1288_v50 = vsel %vm1284_vm10, %v1283_v48, %v1271_v38 }
 0x4bb   :  { %1629 = vmatmul.msk.f32.gmra.mxu2 %vm51_vm0, %v1288_v50 }
 0x4ff   :  { %v1326_v52 = vpop.f32.mrf.mxu2 }
 0x500   :  { %v1327_v28 = vadd.f32 %v1710_v51, %v1326_v52 }
 0x502   :  { %v2382_v22 = vadd.f32 %v1797_v58, %v1327_v28 }
 0x504   :  { %v1344_v54 = vsel %vm51_vm0, %v2382_v22, 0.0 }
 0x505   :  { %1345 = vadd.xlane.f32.xlu2 %v1344_v54 }
 0x51c   :  { %v1329_v57 = vpop.f32.mrf.mxu2 }
 0x51d   :  { %v1330_v36 = vadd.f32 %v1710_v51, %v1329_v57 }
 0x51f   :  { %v2389_v60 = vadd.f32 %v1798_v59, %v1330_v36 }
 0x521   :  { %v1347_v31 = vsel %vm51_vm0, %v2389_v60, 0.0 }
 0x522   :  { %1348 = vadd.xlane.f32.xlu0 %v1347_v31 }
 0x525   :  { %v1332_v49 = vpop.f32.mrf.mxu2 }
 0x526   :  { %v1333_v61 = vadd.f32 %v1710_v51, %v1332_v49 }
 0x528   :  { %v2396_v63 = vadd.f32 %v1799_v62, %v1333_v61 }
 0x52a   :  { %v1350_v46 = vsel %vm51_vm0, %v2396_v63, 0.0 }
 0x52b   :  { %1351 = vadd.xlane.f32.xlu1 %v1350_v46 }
 0x53e   :  { %v1335_v2 = vpop.f32.mrf.mxu2 }
 0x53f   :  { %v1336_v3 = vadd.f32 %v1710_v51, %v1335_v2 }
 0x541   :  { %v2403_v7 = vadd.f32 %v1800_v4, %v1336_v3 }
 0x543   :  { %v1353_v8 = vsel %vm51_vm0, %v2403_v7, 0.0 }
 0x544   :  { %1354 = vadd.xlane.f32.xlu0 %v1353_v8 }
 0x578   :  { %v1346_v9 = vpop.xlane.xlu2 %1345 }
 0x579   :  { %v1356_v11 = vmul.f32 %v1346_v9, %v1924_v14 }
 0x57b   :  { %v1360_v55 = vsub.f32 %v2382_v22, %v1356_v11 }
 0x57d   :  { %v1364_v12 = vmul.f32 %v1360_v55, %v1360_v55 }
 0x57f   :  { %v1368_v1 = vsel %vm51_vm0, %v1364_v12, 0.0 }
 0x580   :  { %1369 = vadd.xlane.f32.xlu0 %v1368_v1  ;;  %v1514_v1 = vld [vmem:[%s2549_s11 + $0x78] sm:$0xff] }
 0x581   :  { %1519 = vmatpush.msra.mxu0 %v1514_v1 }
 0x595   :  { %v1349_v13 = vpop.xlane.xlu0 %1348 }
 0x596   :  { %v1357_v16 = vmul.f32 %v1349_v13, %v1924_v14  ;;  %v1513_v13 = vld [vmem:[%s2549_s11 + $0x70] sm:$0xff] }
 0x597   :  { %1520 = vmatpush.msra.mxu0 %v1513_v13 }
 0x598   :  { %v2412_v0 = vsub.f32 %v2389_v60, %v1357_v16 }
 0x59a   :  { %v1365_v17 = vmul.f32 %v2412_v0, %v2412_v0 }
 0x59c   :  { %v1371_v18 = vsel %vm51_vm0, %v1365_v17, 0.0 }
 0x59d   :  { %1372 = vadd.xlane.f32.xlu0 %v1371_v18 }
 0x59e   :  { %v1352_v20 = vpop.xlane.xlu1 %1351 }
 0x59f   :  { %v1358_v21 = vmul.f32 %v1352_v20, %v1924_v14 }
 0x5a1   :  { %v2419_v39 = vsub.f32 %v2396_v63, %v1358_v21  ;;  %v1511_v21 = vld [vmem:[%s2549_s11 + $0x60] sm:$0xff] }
 0x5a3   :  { %v1366_v5 = vmul.f32 %v2419_v39, %v2419_v39 }
 0x5a5   :  { %v1374_v26 = vsel %vm51_vm0, %v1366_v5, 0.0  ;;  %v1510_v5 = vld [vmem:[%s2549_s11 + $0x58] sm:$0xff] }
 0x5a6   :  { %1375 = vadd.xlane.f32.xlu0 %v1374_v26  ;;  %v1508_v26 = vld [vmem:[%s2549_s11 + $0x48] sm:$0xff] }
 0x5b7   :  { %v1355_v47 = vpop.xlane.xlu0 %1354 }
 0x5b8   :  { %v1359_v27 = vmul.f32 %v1355_v47, %v1924_v14  ;;  %v1507_v47 = vld [vmem:[%s2549_s11 + $0x40] sm:$0xff] }
 0x5ba   :  { %v2426_v53 = vsub.f32 %v2403_v7, %v1359_v27 }
 0x5bc   :  { %v1367_v23 = vmul.f32 %v2426_v53, %v2426_v53 }
 0x5be   :  { %v1377_v19 = vsel %vm51_vm0, %v1367_v23, 0.0  ;;  %v1506_v23 = vld [vmem:[%s2549_s11 + $0x38] sm:$0xff] }
 0x5bf   :  { %1378 = vadd.xlane.f32.xlu2 %v1377_v19 }
 0x5f3   :  { %v1370_v44 = vpop.xlane.xlu0 %1369 }
 0x5f4   :  { %v1380_v29 = vmul.f32 %v1370_v44, %v1924_v14  ;;  %v1503_v44 = vld [vmem:[%s2549_s11 + $0x20] sm:$0xff] }
 0x5f6   :  { %v1384_v35 = vadd.f32 1e-05, %v1380_v29 }
 0x5f8   :  { %1789 = vrsqrt.f32 %v1384_v35  ;;  %vm1394_vm15 = vweird.f32 %v1384_v35 }
 0x5fe   :  { %v1790_v24 = vpop.eup %1789 }
 0x5ff   :  { %v1389_v37 = vmul.f32 %v1790_v24, %v1384_v35  ;;  %vm1395_vm14 = vweird.f32 %v1790_v24  ;;  %v1502_v35 = vld [vmem:[%s2549_s11 + $0x18] sm:$0xff] }
 0x600   :  { %vm1396_vm1 = vmor %vm1394_vm15, %vm1395_vm14 }
 0x601   :  { %v1390_v40 = vmul.f32 %v1790_v24, %v1389_v37 }
 0x603   :  { %v1391_v32 = vmul.f32 0.5, %v1390_v40 }
 0x605   :  { %v1392_v41 = vsub.f32 1.5, %v1391_v32 }
 0x607   :  { %v1393_v6 = vmul.f32 %v1790_v24, %v1392_v41 }
 0x609   :  { %v1397_v15 = vsel %vm1396_vm1, %v1790_v24, %v1393_v6  ;;  %v1501_v6 = vld [vmem:[%s2549_s11 + $0x10] sm:$0xff] }
 0x60a   :  { %v1428_v43 = vmul.f32 %v1397_v15, %v1360_v55  ;;  %v1500_v15 = vld [vmem:[%s2549_s11 + $0x8] sm:$0xff] }
 0x60c   :  { %v1435_v45 = vmul.f32 %v2447_v42, %v1428_v43  ;;  %v1499_v43 = vld [vmem:[%s2549_s11] sm:$0xff] }
 0x60e   :  { %v1442_v34 = vadd.f32 %v2452_v25, %v1435_v45 }
 0x610   :  { %v1373_v38 = vpop.xlane.xlu0 %1372  ;;  %1630 = vmatmul.msk.f32.vlgmr.msra.gmra.mxu3 %vm51_vm0, %v1442_v34 }
 0x611   :  { %v1381_v48 = vmul.f32 %v1373_v38, %v1924_v14 }
 0x613   :  { %v1385_v50 = vadd.f32 1e-05, %v1381_v48 }
 0x615   :  { %1791 = vrsqrt.f32 %v1385_v50  ;;  %vm1404_vm3 = vweird.f32 %v1385_v50 }
 0x619   :  { %v1376_v51 = vpop.xlane.xlu0 %1375 }
 0x61a   :  { %v1382_v52 = vmul.f32 %v1376_v51, %v1924_v14 }
 0x61b   :  { %v1792_v28 = vpop.eup %1791 }
 0x61c   :  { %v1399_v58 = vmul.f32 %v1792_v28, %v1385_v50  ;;  %v1386_v54 = vadd.f32 1e-05, %v1382_v52  ;;  %vm1405_vm2 = vweird.f32 %v1792_v28 }
 0x61d   :  { %vm1406_vm4 = vmor %vm1404_vm3, %vm1405_vm2 }
 0x61e   :  { %v1400_v57 = vmul.f32 %v1792_v28, %v1399_v58  ;;  %1793 = vrsqrt.f32 %v1386_v54  ;;  %vm1414_vm6 = vweird.f32 %v1386_v54 }
 0x620   :  { %v1401_v36 = vmul.f32 0.5, %v1400_v57  ;;  %v1714_v57 = vld [vmem:[%s2550_s12] ss:$0 sm:$0xff] }
 0x622   :  { %v1402_v59 = vsub.f32 1.5, %v1401_v36 }
 0x624   :  { %v1794_v31 = vpop.eup %1793  ;;  %v1403_v49 = vmul.f32 %v1792_v28, %v1402_v59 }
 0x625   :  { %v1409_v61 = vmul.f32 %v1794_v31, %v1386_v54  ;;  %vm1415_vm5 = vweird.f32 %v1794_v31 }
 0x626   :  { %v1407_v62 = vsel %vm1406_vm4, %v1792_v28, %v1403_v49  ;;  %vm1416_vm7 = vmor %vm1414_vm6, %vm1415_vm5 }
 0x627   :  { %v1410_v46 = vmul.f32 %v1794_v31, %v1409_v61  ;;  %v1429_v2 = vmul.f32 %v1407_v62, %v2412_v0  ;;  %v1512_v0 = vld [vmem:[%s2549_s11 + $0x68] sm:$0xff] }
 0x628   :  { %1521 = vmatpush.msra.mxu0 %v1512_v0 }
 0x629   :  { %v1411_v3 = vmul.f32 0.5, %v1410_v46  ;;  %v1436_v4 = vmul.f32 %v2447_v42, %v1429_v2 }
 0x62a   :  { %1522 = vmatpush.msra.mxu0 %v1511_v21 }
 0x62b   :  { %v1412_v8 = vsub.f32 1.5, %v1411_v3  ;;  %v1443_v9 = vadd.f32 %v2452_v25, %v1436_v4 }
 0x62c   :  { %1523 = vmatpush.msra.mxu0 %v1510_v5 }
 0x62d   :  { %v1413_v11 = vmul.f32 %v1794_v31, %v1412_v8  ;;  %1631 = vmatmul.msk.f32.gmra.mxu3 %vm51_vm0, %v1443_v9 }
 0x62f   :  { %v1417_v55 = vsel %vm1416_vm7, %v1794_v31, %v1413_v11 }
 0x630   :  { %v1430_v12 = vmul.f32 %v1417_v55, %v2419_v39 }
 0x632   :  { %v1437_v16 = vmul.f32 %v2447_v42, %v1430_v12  ;;  %v1379_v17 = vpop.xlane.xlu2 %1378 }
 0x633   :  { %v1383_v18 = vmul.f32 %v1379_v17, %v1924_v14  ;;  %v1509_v14 = vld [vmem:[%s2549_s11 + $0x50] sm:$0xff] }
 0x634   :  { %v1444_v20 = vadd.f32 %v2452_v25, %v1437_v16  ;;  %1524 = vmatpush.msra.mxu0 %v1509_v14 }
 0x635   :  { %v1387_v39 = vadd.f32 1e-05, %v1383_v18 }
 0x636   :  { %1632 = vmatmul.msk.f32.gmra.mxu3 %vm51_vm0, %v1444_v20  ;;  %1525 = vmatpush.msra.mxu0 %v1508_v26 }
 0x637   :  { %1795 = vrsqrt.f32 %v1387_v39  ;;  %vm1424_vm10 = vweird.f32 %v1387_v39 }
 0x638   :  { %1526 = vmatpush.msra.mxu0 %v1507_v47 }
 0x63a   :  { %1527 = vmatpush.msra.mxu0 %v1506_v23 }
 0x63c   :  { %1528 = vmatpush.msra.mxu0 %v1505_v56 }
 0x63d   :  { %v1796_v27 = vpop.eup %1795 }
 0x63e   :  { %v1419_v19 = vmul.f32 %v1796_v27, %v1387_v39  ;;  %vm1425_vm9 = vweird.f32 %v1796_v27  ;;  %1529 = vmatpush.msra.mxu0 %v1504_v33 }
 0x63f   :  { %vm1426_vm8 = vmor %vm1424_vm10, %vm1425_vm9 }
 0x640   :  { %v1420_v10 = vmul.f32 %v1796_v27, %v1419_v19  ;;  %1530 = vmatpush.msra.mxu0 %v1503_v44 }
 0x642   :  { %v1421_v30 = vmul.f32 0.5, %v1420_v10  ;;  %1531 = vmatpush.msra.mxu0 %v1502_v35 }
 0x644   :  { %v1422_v29 = vsub.f32 1.5, %v1421_v30  ;;  %1532 = vmatpush.msra.mxu0 %v1501_v6 }
 0x646   :  { %v1423_v24 = vmul.f32 %v1796_v27, %v1422_v29  ;;  %1533 = vmatpush.msra.mxu0 %v1500_v15 }
 0x648   :  { %v1427_v37 = vsel %vm1426_vm8, %v1796_v27, %v1423_v24  ;;  %1534 = vmatpush.msra.mxu0 %v1499_v43 }
 0x649   :  { %v1431_v40 = vmul.f32 %v1427_v37, %v2426_v53  ;;  %v1713_v53 = vld [vmem:[%s2548_s10] ss:$0 sm:$0xff] }
 0x64b   :  { %v1438_v32 = vmul.f32 %v2447_v42, %v1431_v40 }
 0x64d   :  { %v1445_v41 = vadd.f32 %v2452_v25, %v1438_v32 }
 0x64f   :  { %1633 = vmatmul.msk.f32.gmra.mxu3 %vm51_vm0, %v1445_v41 }
 0x693   :  { %v1483_v42 = vpop.f32.mrf.mxu3 }
 0x694   :  { %v1484_v25 = vadd.f32 %v1713_v53, %v1483_v42 }
 0x696   :  { %v1495_v45 = vmax.f32 %v1484_v25, 0.0 }
 0x698   :  { %1535 = vmatmul.f32.vlgmr.msra.gmra.mxu0 %v1495_v45 }
 0x6b0   :  { %v1486_v34 = vpop.f32.mrf.mxu3 }
 0x6b1   :  { %v1487_v38 = vadd.f32 %v1713_v53, %v1486_v34 }
 0x6b3   :  { %v1496_v48 = vmax.f32 %v1487_v38, 0.0 }
 0x6b5   :  { %1538 = vmatmul.f32.gmra.mxu0 %v1496_v48 }
 0x6b9   :  { %v1489_v50 = vpop.f32.mrf.mxu3 }
 0x6ba   :  { %v1490_v51 = vadd.f32 %v1713_v53, %v1489_v50 }
 0x6bc   :  { %v1497_v52 = vmax.f32 %v1490_v51, 0.0 }
 0x6be   :  { %1541 = vmatmul.f32.gmra.mxu0 %v1497_v52 }
 0x6d2   :  { %v1492_v28 = vpop.f32.mrf.mxu3 }
 0x6d3   :  { %v1493_v58 = vadd.f32 %v1713_v53, %v1492_v28 }
 0x6d5   :  { %v1498_v54 = vmax.f32 %v1493_v58, 0.0 }
 0x6d7   :  { %1544 = vmatmul.f32.gmra.mxu0 %v1498_v54 }
 0x715   :  { %v1536_v36 = vpop.f32.mrf.mxu0 }
 0x716   :  { %v1537_v59 = vadd.f32 %v1714_v57, %v1536_v36 }
 0x718   :  { %v1548_v31 = vadd.f32 %v1537_v59, %v2382_v22 }
 0x71a   :  { %1552 = vst.msk [vmem:[#allocation2] sm:$0xff] %vm51_vm0, %v1548_v31 }
 0x732   :  { %v1539_v49 = vpop.f32.mrf.mxu0 }
 0x733   :  { %v1540_v61 = vadd.f32 %v1714_v57, %v1539_v49 }
 0x735   :  { %v1549_v62 = vadd.f32 %v1540_v61, %v2389_v60 }
 0x737   :  { %1553 = vst.msk [vmem:[#allocation2 + $0x8] sm:$0xff] %vm51_vm0, %v1549_v62 }
 0x73b   :  { %v1542_v46 = vpop.f32.mrf.mxu0 }
 0x73c   :  { %v1543_v2 = vadd.f32 %v1714_v57, %v1542_v46 }
 0x73e   :  { %v1550_v3 = vadd.f32 %v1543_v2, %v2396_v63 }
 0x740   :  { %1554 = vst.msk [vmem:[#allocation2 + $0x10] sm:$0xff] %vm51_vm0, %v1550_v3 }
 0x754   :  { %v1545_v4 = vpop.f32.mrf.mxu0 }
 0x755   :  { %v1546_v22 = vadd.f32 %v1714_v57, %v1545_v4 }
 0x757   :  { %v1551_v8 = vadd.f32 %v1546_v22, %v2403_v7 }
 0x759   :  { %1555 = vst.msk [vmem:[#allocation2 + $0x18] sm:$0xff] %vm51_vm0, %v1551_v8 }
 0x75a   :  { %1568 = dma.vmem_to_hbm [thread:$0]  %s1561_s16, 512, %s1563_s15, [#allocation3], %s1837_s17, %s1837_s17, %s1833_s1  }
 0x75b   :  { %1825 = dma.done.wait [#allocation3], 512  }
 0x75c   :  { %1826 = vsyncadd [#allocation3], 4294966784 }
 0x75d   :  { %1573 = vsyncpa [#allocation3], 1 }

</bundles_post_ra>
